<compile_context>
chip_gen: v7x
topology: tpu7x:2x2x1
jax: 0.10.0
libtpu: 0.0.40
codegen_flags: <defaults>
</compile_context>

<pallas_src>
import jax
import jax.numpy as jnp
import numpy as np
from jax import lax
from jax.experimental import pallas as pl
from jax.experimental.pallas import tpu as pltpu


MAX_LEN = 18
LN_EPS = 1e-5


def _round_up(n, m):
    return -(-n // m) * m


def _make_kernel(H: int, W: int):
    """H = h_grid + 1 rows of the h table, W = w_grid + 1 rows of the w table."""

    def kernel(gsz_ref, x_ref, tab_ref, posidx_ref, gamma_ref, beta_ref, out_ref):
        x = x_ref[...]                           # (2, M) int32, M = BLOCK_B * MAX_LEN
        M = x.shape[1]
        K = tab_ref.shape[1]                     # H + W + 2 + MAX_LEN

        gh = gsz_ref[0]                          # SMEM scalar reads (prefetched)
        gw = gsz_ref[1]

        xh = x[0:1, :]                           # (1, M)
        xw = x[1:2, :]                           # (1, M)

        def trunc_div(num, g):
            # Exact trunc-toward-zero integer division matching
            # torch.div(rounding_mode='trunc').  The float reciprocal is a single
            # scalar per grid step (hoisted off the per-vreg path); the two-round
            # integer fixup makes the result exact for |quotient| within the
            # practical coordinate range.  Assumes g != 0.
            an = jnp.abs(num)
            ag = jnp.abs(g)
            inv = 1.0 / ag.astype(jnp.float32)                       # scalar
            q = jnp.floor(an.astype(jnp.float32) * inv).astype(jnp.int32)
            for _ in range(2):                                       # fixup |err| <= 2
                r = an - q * ag
                q = q + (r >= ag).astype(jnp.int32) - (r < 0).astype(jnp.int32)
            return jnp.where(jnp.logical_xor(num < 0, g < 0), -q, q)

        idx_h = trunc_div(xh + 1, gh)            # rows [0, H)
        idx_w = trunc_div(xw + 1, gw) + H        # rows [H, H+W)
        unknown = xh > 1
        # row H+W: unknown unit vector; row H+W+1: all zeros (known points)
        idx_u = jnp.where(unknown, H + W, H + W + 1)
        idx_p = posidx_ref[...]                  # (1, M): (lane % 18) + H + W + 2

        # Multi-hot selector at (K, M): 4 compares + 3 ORs, lanes fully dense.
        rows = lax.broadcasted_iota(jnp.int32, (K, M), 0)
        sel = ((rows == idx_h) | (rows == idx_w) | (rows == idx_u)
               | (rows == idx_p)).astype(jnp.float32)

        # (E, K) @ (K, M) on the MXU == h_emb + w_emb + unknown_flag + pos_emb,
        # already summed into the right feature rows.  HIGHEST precision so the
        # f32 table is not rounded through a single bf16 pass.
        emb = jnp.dot(tab_ref[...], sel,
                      preferred_element_type=jnp.float32,
                      precision=lax.Precision.HIGHEST)               # (E, M)

        # LayerNorm over the feature (sublane) axis: biased variance, eps=1e-5.
        mean = jnp.mean(emb, axis=0, keepdims=True)                  # (1, M)
        var = jnp.mean((emb - mean) ** 2, axis=0, keepdims=True)     # (1, M)
        normed = (emb - mean) * lax.rsqrt(var + LN_EPS)
        out_ref[...] = normed * gamma_ref[...] + beta_ref[...]       # (E,1) bcast over lanes

    return kernel


def embedding_forward(x, grid_size, combined_t, gamma, beta, *, H, W, block_b=128):
    """x: (B, L, 2) int; combined_t: (E, K) f32 transposed fused table."""
    B, L, _ = x.shape
    E, K = combined_t.shape

    # M = block_b * 18 is the lane axis of every block -> must be a multiple of
    # 128, i.e. block_b a multiple of 64.  Don't over-pad tiny batches.
    block_b = max(64, _round_up(block_b, 64))
    block_b = min(block_b, _round_up(B, 64))
    Bp = _round_up(B, block_b)
    n_blocks = Bp // block_b            # keep >= 2 (ideally even) for v7x's two TCs
    M = block_b * L

    if Bp != B:
        x = jnp.pad(x, ((0, Bp - B), (0, 0), (0, 0)))
    x_t = x.reshape(Bp * L, 2).astype(jnp.int32).T                    # (2, Bp*L), cheap HBM pass

    gsz = grid_size.reshape(2).astype(jnp.int32)                      # -> SMEM (scalar prefetch)
    # Per-lane positional row index (block-invariant since M % 18 == 0).
    pos_idx = (jnp.arange(M, dtype=jnp.int32) % MAX_LEN + (H + W + 2)).reshape(1, M)
    gamma2 = gamma.reshape(E, 1).astype(jnp.float32)
    beta2 = beta.reshape(E, 1).astype(jnp.float32)

    kernel = _make_kernel(H, W)
    out_t = pl.pallas_call(
        kernel,
        out_shape=jax.ShapeDtypeStruct((E, Bp * L), jnp.float32),
        grid_spec=pltpu.PrefetchScalarGridSpec(
            num_scalar_prefetch=1,                                    # grid_size -> SMEM
            grid=(n_blocks,),
            in_specs=[
                pl.BlockSpec((2, M), lambda i, gsz: (0, i)),          # coords, feature-major
                pl.BlockSpec((E, K), lambda i, gsz: (0, 0)),          # fused table (transposed)
                pl.BlockSpec((1, M), lambda i, gsz: (0, 0)),          # pos row index per lane
                pl.BlockSpec((E, 1), lambda i, gsz: (0, 0)),          # LayerNorm gamma
                pl.BlockSpec((E, 1), lambda i, gsz: (0, 0)),          # LayerNorm beta
            ],
            out_specs=pl.BlockSpec((E, M), lambda i, gsz: (0, i)),    # lane-dense output
        ),
        compiler_params=pltpu.CompilerParams(dimension_semantics=("parallel",)),
    )(gsz, x_t, combined_t.astype(jnp.float32), pos_idx, gamma2, beta2)

    # Back to the consumer-facing (B, L, E) layout.
    return out_t.T.reshape(Bp, L, E)[:B]


def build_params(key, h_grid, w_grid, embedding_dim):
    """Deterministic synthetic parameters matching nn.Embedding / nn.LayerNorm init."""
    H, W, D = h_grid + 1, w_grid + 1, embedding_dim
    E = 2 * D + 1
    K = H + W + 2 + MAX_LEN
    k1, k2, k3 = jax.random.split(key, 3)
    h_table = jax.random.normal(k1, (H, D), jnp.float32)              # nn.Embedding ~ N(0,1)
    w_table = jax.random.normal(k2, (W, D), jnp.float32)
    pos_table = jax.random.normal(k3, (MAX_LEN, E), jnp.float32)
    gamma = jnp.ones((E,), jnp.float32)
    beta = jnp.zeros((E,), jnp.float32)

    # Fused table: rows [0,H) -> h cols, [H,H+W) -> w cols, row H+W -> unknown
    # unit vector, row H+W+1 -> zeros (known points), rows [H+W+2, K) -> pos table.
    combined = jnp.zeros((K, E), jnp.float32)
    combined = combined.at[:H, :D].set(h_table)
    combined = combined.at[H:H + W, D:2 * D].set(w_table)
    combined = combined.at[H + W, 2 * D].set(1.0)
    combined = combined.at[H + W + 2:, :].set(pos_table)
    combined_t = combined.T                                           # (E, K) for feature-major dot
    return h_table, w_table, pos_table, gamma, beta, combined_t


def reference_forward(x, grid_size, h_table, w_table, pos_table, gamma, beta):
    unknown = (x > 1)[:, :, 0].astype(jnp.float32)
    idx = lax.div(x + 1, grid_size[None, None, :].astype(jnp.int32))  # trunc toward zero
    h_e = h_table[idx[:, :, 0]]
    w_e = w_table[idx[:, :, 1]]
    point = jnp.concatenate([h_e, w_e, unknown[..., None]], axis=2)
    emb = point + pos_table[None]
    mean = emb.mean(-1, keepdims=True)
    var = ((emb - mean) ** 2).mean(-1, keepdims=True)
    return (emb - mean) / jnp.sqrt(var + LN_EPS) * gamma + beta


if __name__ == "__main__":
    # Small synthetic config
    h_grid, w_grid, embedding_dim = 15, 15, 16
    H, W = h_grid + 1, w_grid + 1

    key = jax.random.PRNGKey(0)
    kp, kx1, kx2 = jax.random.split(key, 3)
    h_table, w_table, pos_table, gamma, beta, combined_t = build_params(
        kp, h_grid, w_grid, embedding_dim)

    grid_size = jnp.array([4, 4], dtype=jnp.int32)

    # Case 1: tiny batch (single padded block of 64 rows)
    x_small = jax.random.randint(kx1, (2, MAX_LEN, 2), minval=0, maxval=60, dtype=jnp.int32)
    out_small = jax.block_until_ready(
        embedding_forward(x_small, grid_size, combined_t, gamma, beta, H=H, W=W))
    ref_small = reference_forward(x_small, grid_size, h_table, w_table, pos_table, gamma, beta)
    np.testing.assert_allclose(np.asarray(out_small), np.asarray(ref_small), rtol=1e-4, atol=1e-4)

    # Case 2: larger batch exercising batch blocking (block_b=128 -> 2 grid steps) + padding
    x_big = jax.random.randint(kx2, (200, MAX_LEN, 2), minval=0, maxval=60, dtype=jnp.int32)
    out_big = jax.block_until_ready(
        embedding_forward(x_big, grid_size, combined_t, gamma, beta, H=H, W=W, block_b=128))
    ref_big = reference_forward(x_big, grid_size, h_table, w_table, pos_table, gamma, beta)
    np.testing.assert_allclose(np.asarray(out_big), np.asarray(ref_big), rtol=1e-4, atol=1e-4)

    print("KERNEL_OK")
</pallas_src>

<mosaic_0001>
module attributes {stable_mosaic.version = 11 : i64} {
  func.func @kernel(%arg0: i32, %arg1: memref<2xi32, #tpu.memory_space<smem>>, %arg2: memref<2x1152xi32, #tpu.memory_space<vmem>>, %arg3: memref<33x52xf32, #tpu.memory_space<vmem>>, %arg4: memref<1x1152xi32, #tpu.memory_space<vmem>>, %arg5: memref<33x1xf32, #tpu.memory_space<vmem>>, %arg6: memref<33x1xf32, #tpu.memory_space<vmem>>, %arg7: memref<33x1152xf32, #tpu.memory_space<vmem>>) attributes {dimension_semantics = [#tpu.dimension_semantics<parallel>], iteration_bounds = array<i64: 1>, scalar_prefetch = 1 : i64, scratch_operands = 0 : i64, tpu.core_type = #tpu.core_type<tc>, window_params = [{transform_indices = @transform_0, window_bounds = array<i64: 2, 1152>}, {pipeline_mode = #tpu.pipeline_mode<synchronous>, transform_indices = @transform_1, window_bounds = array<i64: 33, 52>}, {pipeline_mode = #tpu.pipeline_mode<synchronous>, transform_indices = @transform_2, window_bounds = array<i64: 1, 1152>}, {pipeline_mode = #tpu.pipeline_mode<synchronous>, transform_indices = @transform_3, window_bounds = array<i64: 33, 1>}, {pipeline_mode = #tpu.pipeline_mode<synchronous>, transform_indices = @transform_4, window_bounds = array<i64: 33, 1>}, {transform_indices = @transform_5, window_bounds = array<i64: 33, 1152>}]} {
    %c0 = arith.constant 0 : index
    %c0_0 = arith.constant 0 : index
    %0 = vector.load %arg2[%c0, %c0_0] : memref<2x1152xi32, #tpu.memory_space<vmem>>, vector<2x1152xi32>
    %c0_1 = arith.constant 0 : index
    %1 = memref.load %arg1[%c0_1] : memref<2xi32, #tpu.memory_space<smem>>
    %c1 = arith.constant 1 : index
    %2 = memref.load %arg1[%c1] : memref<2xi32, #tpu.memory_space<smem>>
    %3 = vector.extract_strided_slice %0 {offsets = [0, 0], sizes = [1, 1152], strides = [1, 1]} : vector<2x1152xi32> to vector<1x1152xi32>
    %4 = vector.extract_strided_slice %0 {offsets = [1, 0], sizes = [1, 1152], strides = [1, 1]} : vector<2x1152xi32> to vector<1x1152xi32>
    %c1_i32 = arith.constant 1 : i32
    %5 = vector.broadcast %c1_i32 : i32 to vector<1x1152xi32>
    %6 = arith.addi %3, %5 : vector<1x1152xi32>
    %7 = math.absi %6 : vector<1x1152xi32>
    %8 = math.absi %1 : i32
    %9 = arith.sitofp %8 : i32 to f32
    %cst = arith.constant 1.000000e+00 : f32
    %10 = arith.divf %cst, %9 : f32
    %11 = arith.sitofp %7 : vector<1x1152xi32> to vector<1x1152xf32>
    %12 = vector.broadcast %10 : f32 to vector<1x1152xf32>
    %13 = arith.mulf %11, %12 : vector<1x1152xf32>
    %14 = math.floor %13 : vector<1x1152xf32>
    %15 = arith.fptosi %14 : vector<1x1152xf32> to vector<1x1152xi32>
    %16 = vector.broadcast %8 : i32 to vector<1x1152xi32>
    %17 = arith.muli %15, %16 : vector<1x1152xi32>
    %18 = arith.subi %7, %17 : vector<1x1152xi32>
    %19 = vector.broadcast %8 : i32 to vector<1x1152xi32>
    %20 = arith.cmpi sge, %18, %19 : vector<1x1152xi32>
    %21 = arith.extui %20 : vector<1x1152xi1> to vector<1x1152xi32>
    %22 = arith.addi %15, %21 : vector<1x1152xi32>
    %c0_i32 = arith.constant 0 : i32
    %23 = vector.broadcast %c0_i32 : i32 to vector<1x1152xi32>
    %24 = arith.cmpi slt, %18, %23 : vector<1x1152xi32>
    %25 = arith.extui %24 : vector<1x1152xi1> to vector<1x1152xi32>
    %26 = arith.subi %22, %25 : vector<1x1152xi32>
    %27 = vector.broadcast %8 : i32 to vector<1x1152xi32>
    %28 = arith.muli %26, %27 : vector<1x1152xi32>
    %29 = arith.subi %7, %28 : vector<1x1152xi32>
    %30 = vector.broadcast %8 : i32 to vector<1x1152xi32>
    %31 = arith.cmpi sge, %29, %30 : vector<1x1152xi32>
    %32 = arith.extui %31 : vector<1x1152xi1> to vector<1x1152xi32>
    %33 = arith.addi %26, %32 : vector<1x1152xi32>
    %c0_i32_2 = arith.constant 0 : i32
    %34 = vector.broadcast %c0_i32_2 : i32 to vector<1x1152xi32>
    %35 = arith.cmpi slt, %29, %34 : vector<1x1152xi32>
    %36 = arith.extui %35 : vector<1x1152xi1> to vector<1x1152xi32>
    %37 = arith.subi %33, %36 : vector<1x1152xi32>
    %c0_i32_3 = arith.constant 0 : i32
    %38 = vector.broadcast %c0_i32_3 : i32 to vector<1x1152xi32>
    %39 = arith.cmpi slt, %6, %38 : vector<1x1152xi32>
    %c0_i32_4 = arith.constant 0 : i32
    %40 = arith.cmpi slt, %1, %c0_i32_4 : i32
    %41 = vector.broadcast %40 : i1 to vector<1x1152xi1>
    %42 = arith.xori %39, %41 : vector<1x1152xi1>
    %c0_i32_5 = arith.constant 0 : i32
    %43 = vector.broadcast %c0_i32_5 : i32 to vector<1x1152xi32>
    %44 = arith.subi %43, %37 : vector<1x1152xi32>
    %45 = arith.select %42, %44, %37 : vector<1x1152xi1>, vector<1x1152xi32>
    %c1_i32_6 = arith.constant 1 : i32
    %46 = vector.broadcast %c1_i32_6 : i32 to vector<1x1152xi32>
    %47 = arith.addi %4, %46 : vector<1x1152xi32>
    %48 = math.absi %47 : vector<1x1152xi32>
    %49 = math.absi %2 : i32
    %50 = arith.sitofp %49 : i32 to f32
    %cst_7 = arith.constant 1.000000e+00 : f32
    %51 = arith.divf %cst_7, %50 : f32
    %52 = arith.sitofp %48 : vector<1x1152xi32> to vector<1x1152xf32>
    %53 = vector.broadcast %51 : f32 to vector<1x1152xf32>
    %54 = arith.mulf %52, %53 : vector<1x1152xf32>
    %55 = math.floor %54 : vector<1x1152xf32>
    %56 = arith.fptosi %55 : vector<1x1152xf32> to vector<1x1152xi32>
    %57 = vector.broadcast %49 : i32 to vector<1x1152xi32>
    %58 = arith.muli %56, %57 : vector<1x1152xi32>
    %59 = arith.subi %48, %58 : vector<1x1152xi32>
    %60 = vector.broadcast %49 : i32 to vector<1x1152xi32>
    %61 = arith.cmpi sge, %59, %60 : vector<1x1152xi32>
    %62 = arith.extui %61 : vector<1x1152xi1> to vector<1x1152xi32>
    %63 = arith.addi %56, %62 : vector<1x1152xi32>
    %c0_i32_8 = arith.constant 0 : i32
    %64 = vector.broadcast %c0_i32_8 : i32 to vector<1x1152xi32>
    %65 = arith.cmpi slt, %59, %64 : vector<1x1152xi32>
    %66 = arith.extui %65 : vector<1x1152xi1> to vector<1x1152xi32>
    %67 = arith.subi %63, %66 : vector<1x1152xi32>
    %68 = vector.broadcast %49 : i32 to vector<1x1152xi32>
    %69 = arith.muli %67, %68 : vector<1x1152xi32>
    %70 = arith.subi %48, %69 : vector<1x1152xi32>
    %71 = vector.broadcast %49 : i32 to vector<1x1152xi32>
    %72 = arith.cmpi sge, %70, %71 : vector<1x1152xi32>
    %73 = arith.extui %72 : vector<1x1152xi1> to vector<1x1152xi32>
    %74 = arith.addi %67, %73 : vector<1x1152xi32>
    %c0_i32_9 = arith.constant 0 : i32
    %75 = vector.broadcast %c0_i32_9 : i32 to vector<1x1152xi32>
    %76 = arith.cmpi slt, %70, %75 : vector<1x1152xi32>
    %77 = arith.extui %76 : vector<1x1152xi1> to vector<1x1152xi32>
    %78 = arith.subi %74, %77 : vector<1x1152xi32>
    %c0_i32_10 = arith.constant 0 : i32
    %79 = vector.broadcast %c0_i32_10 : i32 to vector<1x1152xi32>
    %80 = arith.cmpi slt, %47, %79 : vector<1x1152xi32>
    %c0_i32_11 = arith.constant 0 : i32
    %81 = arith.cmpi slt, %2, %c0_i32_11 : i32
    %82 = vector.broadcast %81 : i1 to vector<1x1152xi1>
    %83 = arith.xori %80, %82 : vector<1x1152xi1>
    %c0_i32_12 = arith.constant 0 : i32
    %84 = vector.broadcast %c0_i32_12 : i32 to vector<1x1152xi32>
    %85 = arith.subi %84, %78 : vector<1x1152xi32>
    %86 = arith.select %83, %85, %78 : vector<1x1152xi1>, vector<1x1152xi32>
    %c16_i32 = arith.constant 16 : i32
    %87 = vector.broadcast %c16_i32 : i32 to vector<1x1152xi32>
    %88 = arith.addi %86, %87 : vector<1x1152xi32>
    %c1_i32_13 = arith.constant 1 : i32
    %89 = vector.broadcast %c1_i32_13 : i32 to vector<1x1152xi32>
    %90 = arith.cmpi sgt, %3, %89 : vector<1x1152xi32>
    %c32_i32 = arith.constant 32 : i32
    %c33_i32 = arith.constant 33 : i32
    %91 = vector.broadcast %c32_i32 : i32 to vector<1x1152xi32>
    %92 = vector.broadcast %c33_i32 : i32 to vector<1x1152xi32>
    %93 = arith.select %90, %91, %92 : vector<1x1152xi1>, vector<1x1152xi32>
    %c0_14 = arith.constant 0 : index
    %c0_15 = arith.constant 0 : index
    %94 = vector.load %arg4[%c0_14, %c0_15] : memref<1x1152xi32, #tpu.memory_space<vmem>>, vector<1x1152xi32>
    %95 = tpu.iota {dimensions = array<i32: 0>} : vector<52x1152xi32>
    %96 = vector.broadcast %45 : vector<1x1152xi32> to vector<52x1152xi32>
    %97 = arith.cmpi eq, %95, %96 : vector<52x1152xi32>
    %98 = vector.broadcast %88 : vector<1x1152xi32> to vector<52x1152xi32>
    %99 = arith.cmpi eq, %95, %98 : vector<52x1152xi32>
    %100 = arith.ori %97, %99 : vector<52x1152xi1>
    %101 = vector.broadcast %93 : vector<1x1152xi32> to vector<52x1152xi32>
    %102 = arith.cmpi eq, %95, %101 : vector<52x1152xi32>
    %103 = arith.ori %100, %102 : vector<52x1152xi1>
    %104 = vector.broadcast %94 : vector<1x1152xi32> to vector<52x1152xi32>
    %105 = arith.cmpi eq, %95, %104 : vector<52x1152xi32>
    %106 = arith.ori %103, %105 : vector<52x1152xi1>
    %107 = arith.extui %106 : vector<52x1152xi1> to vector<52x1152xi32>
    %108 = arith.sitofp %107 : vector<52x1152xi32> to vector<52x1152xf32>
    %c0_16 = arith.constant 0 : index
    %c0_17 = arith.constant 0 : index
    %109 = vector.load %arg3[%c0_16, %c0_17] : memref<33x52xf32, #tpu.memory_space<vmem>>, vector<33x52xf32>
    %cst_18 = arith.constant dense<0.000000e+00> : vector<33x1152xf32>
    %110 = tpu.matmul %109, %108, %cst_18 {dimension_numbers = #tpu.dot_dimension_numbers<[1], [0], [0], [1], [0, 0, 1, 1], [], []>, precision = #tpu.contract_precision<fp32>} : vector<33x52xf32>, vector<52x1152xf32>, vector<33x1152xf32> -> vector<33x1152xf32>
    %cst_19 = arith.constant dense<0.000000e+00> : vector<1152xf32>
    %111 = vector.multi_reduction <add>, %110, %cst_19 [0] : vector<33x1152xf32> to vector<1152xf32>
    %112 = vector.shape_cast %111 : vector<1152xf32> to vector<1x1152xf32>
    %cst_20 = arith.constant 3.300000e+01 : f32
    %113 = vector.broadcast %cst_20 : f32 to vector<1x1152xf32>
    %114 = arith.divf %112, %113 : vector<1x1152xf32>
    %115 = vector.broadcast %114 : vector<1x1152xf32> to vector<33x1152xf32>
    %116 = arith.subf %110, %115 : vector<33x1152xf32>
    %117 = arith.mulf %116, %116 : vector<33x1152xf32>
    %cst_21 = arith.constant dense<0.000000e+00> : vector<1152xf32>
    %118 = vector.multi_reduction <add>, %117, %cst_21 [0] : vector<33x1152xf32> to vector<1152xf32>
    %119 = vector.shape_cast %118 : vector<1152xf32> to vector<1x1152xf32>
    %cst_22 = arith.constant 3.300000e+01 : f32
    %120 = vector.broadcast %cst_22 : f32 to vector<1x1152xf32>
    %121 = arith.divf %119, %120 : vector<1x1152xf32>
    %122 = vector.broadcast %114 : vector<1x1152xf32> to vector<33x1152xf32>
    %123 = arith.subf %110, %122 : vector<33x1152xf32>
    %cst_23 = arith.constant 9.99999974E-6 : f32
    %124 = vector.broadcast %cst_23 : f32 to vector<1x1152xf32>
    %125 = arith.addf %121, %124 : vector<1x1152xf32>
    %126 = math.rsqrt %125 : vector<1x1152xf32>
    %127 = vector.broadcast %126 : vector<1x1152xf32> to vector<33x1152xf32>
    %128 = arith.mulf %123, %127 : vector<33x1152xf32>
    %c0_24 = arith.constant 0 : index
    %c0_25 = arith.constant 0 : index
    %129 = vector.load %arg5[%c0_24, %c0_25] : memref<33x1xf32, #tpu.memory_space<vmem>>, vector<33x1xf32>
    %130 = vector.broadcast %129 : vector<33x1xf32> to vector<33x1152xf32>
    %131 = arith.mulf %128, %130 : vector<33x1152xf32>
    %c0_26 = arith.constant 0 : index
    %c0_27 = arith.constant 0 : index
    %132 = vector.load %arg6[%c0_26, %c0_27] : memref<33x1xf32, #tpu.memory_space<vmem>>, vector<33x1xf32>
    %133 = vector.broadcast %132 : vector<33x1xf32> to vector<33x1152xf32>
    %134 = arith.addf %131, %133 : vector<33x1152xf32>
    %c0_28 = arith.constant 0 : index
    %c0_29 = arith.constant 0 : index
    %135 = vector.load %arg7[%c0_28, %c0_29] : memref<33x1152xf32, #tpu.memory_space<vmem>>, vector<33x1152xf32>
    tpu.vector_store %arg7[%c0_28, %c0_29], %134 {strides = array<i32>} : memref<33x1152xf32, #tpu.memory_space<vmem>>, vector<33x1152xf32>,
    return
  }
  func.func @transform_0(%arg0: i32, %arg1: memref<2xi32, #tpu.memory_space<smem>>) -> (i32, i32) {
    %c0_i32 = arith.constant 0 : i32
    %c0_i32_0 = arith.constant 0 : i32
    return %c0_i32, %arg0 : i32, i32
  }
  func.func @transform_1(%arg0: i32, %arg1: memref<2xi32, #tpu.memory_space<smem>>) -> (i32, i32) {
    %c0_i32 = arith.constant 0 : i32
    %c0_i32_0 = arith.constant 0 : i32
    %c0_i32_1 = arith.constant 0 : i32
    return %c0_i32, %c0_i32_0 : i32, i32
  }
  func.func @transform_2(%arg0: i32, %arg1: memref<2xi32, #tpu.memory_space<smem>>) -> (i32, i32) {
    %c0_i32 = arith.constant 0 : i32
    %c0_i32_0 = arith.constant 0 : i32
    %c0_i32_1 = arith.constant 0 : i32
    return %c0_i32, %c0_i32_0 : i32, i32
  }
  func.func @transform_3(%arg0: i32, %arg1: memref<2xi32, #tpu.memory_space<smem>>) -> (i32, i32) {
    %c0_i32 = arith.constant 0 : i32
    %c0_i32_0 = arith.constant 0 : i32
    %c0_i32_1 = arith.constant 0 : i32
    return %c0_i32, %c0_i32_0 : i32, i32
  }
  func.func @transform_4(%arg0: i32, %arg1: memref<2xi32, #tpu.memory_space<smem>>) -> (i32, i32) {
    %c0_i32 = arith.constant 0 : i32
    %c0_i32_0 = arith.constant 0 : i32
    %c0_i32_1 = arith.constant 0 : i32
    return %c0_i32, %c0_i32_0 : i32, i32
  }
  func.func @transform_5(%arg0: i32, %arg1: memref<2xi32, #tpu.memory_space<smem>>) -> (i32, i32) {
    %c0_i32 = arith.constant 0 : i32
    %c0_i32_0 = arith.constant 0 : i32
    return %c0_i32, %arg0 : i32, i32
  }
}

</mosaic_0001>

<bundles_post_ra>
// kernel: tpu_custom_call.1
= control target key start
LH: loop header
LB: loop body
LE: loop exit
PB: predicated region body
PF: predicated region fallthrough
CT: control target
= control target key end

     0   :  { %s10296_s0 = inlined_call_operand.vmem [shape: s32[2], index: 0, kind: input, shape index: {}]   ;;  %s10297_s1 = inlined_call_operand.vmem [shape: s32[2,1152], index: 1, kind: input, shape index: {}]   ;;  %s10298_s2 = inlined_call_operand.vmem [shape: f32[33,52], index: 2, kind: input, shape index: {}]   ;;  %s10299_s3 = inlined_call_operand.vmem [shape: s32[1,1152], index: 3, kind: input, shape index: {}]   ;;  %s10300_s4 = inlined_call_operand.vmem [shape: f32[33,1], index: 4, kind: input, shape index: {}]   ;;  %s10301_s5 = inlined_call_operand.vmem [shape: f32[33,1], index: 5, kind: input, shape index: {}]   ;;  %s10302_s6 = inlined_call_operand.hbm [shape: f32[33,1152], index: 6, kind: output, shape index: {}]  }
   0x1   :  { %s11_s23 = sshll.u32 %s10296_s0, 4  ;;  %s12_s23 = int_to_ptr.vmem [resolvable:$true] %s11_s23 }
   0x2   :  { %s6786_s24 = scalar_lea.vmem %s12_s23, 16  ;;  %p6791_p1 = scmp.lt.s32.totalorder %s12_s23, %s12_s23 }
   0x3   :  { %p6787_p0 = scmp.ne.s32.totalorder %s12_s23, %s6786_s24  ;;  %p6792_p2 = scmp.lt.s32.totalorder %s6786_s24, %s6786_s24 }
   0x5   :  { %p6793_p3 = por %p6792_p2, %p6791_p1 }
   0x7   :  { %p6794_p4 = pnand %p6793_p3, %p6787_p0 }
   0x9   :  { %6797 = shalt.err (!%p6794_p4)  }
   0xa   :  { %s6824_s25 = smov [#allocation3]  }
   0xb   :  { %14 = dma.vmem_to_smem %s12_s23, 16, %s6824_s25, [#allocation2] }
   0xc   :  { %6820 = dma.done.wait [#allocation2], 16 }
   0xd   :  { %6821 = vsyncadd [#allocation2], 4294967280 }
   0xe   :  { %16 = sfence }
   0xf   :  { %s6872_s26 = sld [smem:[#allocation3]]  ;;  %s6874_s27 = sld [smem:[#allocation3 + $0x1]]  ;;  %v6825_v0 = vmov 0  }
  0x10   :  { %6761 = vset.pattern.permute.xlu1 %v6825_v0  ;;  %6760 = vset.pattern.permute.xlu0 %v6825_v0 }
  0x11   :  { %17 = vsyncpa [#allocation5], 0  ;;  %v10306_v1 = vmov 0.0   ;;  %v6893_v6 = vld [vmem:[%s10297_s1] sm:$0xff]  ;;  %v6898_v7 = vld [vmem:[%s10297_s1 + $0x8] sm:$0xff] }
  0x12   :  { %1171 = vmatprep.mubr.f32.mxu1 %v10306_v1  ;;  %1608 = vmatprep.mubr.f32.mxu0 %v10306_v1  ;;  %v30_v8 = vld [vmem:[%s10297_s1 + $0x10] sm:$0x3]  ;;  %v6904_v9 = vadd.s32 1, %v6893_v6  ;;  %v6907_v10 = vadd.s32 1, %v6898_v7 }
  0x13   :  { %v6909_v11 = vadd.s32 1, %v30_v8 }
  0x14   :  { %v37_v12 = vsub.s32 0, %v6904_v9  ;;  %v40_v13 = vsub.s32 0, %v6907_v10  ;;  %vm36_vm6 = vcmp.lt.s32.totalorder %v6904_v9, 0  ;;  %vm39_vm8 = vcmp.lt.s32.totalorder %v6907_v10, 0 }
  0x15   :  { %s45_s0 = sshra.s32 %s6872_s26, 31  ;;  %s127_s28 = sshra.s32 %s6874_s27, 31  ;;  %v43_v14 = vsub.s32 0, %v6909_v11  ;;  %vm42_vm10 = vcmp.lt.s32.totalorder %v6909_v11, 0 }
  0x16   :  { %s46_s29 = sadd.s32 %s45_s0, %s6872_s26  ;;  %s128_s30 = sadd.s32 %s6874_s27, %s127_s28  ;;  %v6915_v15 = vmin.u32 %v37_v12, %v6904_v9  ;;  %v6918_v16 = vmin.u32 %v40_v13, %v6907_v10 }
  0x17   :  { %s6884_s7 = sxor.u32 %s46_s29, %s45_s0  ;;  %s6886_s8 = sxor.u32 %s128_s30, %s127_s28  ;;  %v6921_v17 = vmin.u32 %v43_v14, %v6909_v11 }
  0x18   :  { %s48_s9 = scvt.s32.f32 %s6884_s7  ;;  %s130_s10 = scvt.s32.f32 %s6886_s8  ;;  %v52_v18 = vcvt.s32.f32 %v6915_v15  ;;  %v53_v19 = vcvt.s32.f32 %v6918_v16  ;;  %v6928_v38 = vstv %s6884_s7  ;;  %v6931_v42 = vstv %s6886_s8 }
  0x19   :  { %v54_v20 = vcvt.s32.f32 %v6921_v17  ;;  %p114_p5 = scmp.lt.s32.totalorder %s6872_s26, 0  ;;  %p193_p6 = scmp.lt.s32.totalorder %s6874_s27, 0 }
  0x1a   :  { %v49_v2 = vstv %s48_s9  ;;  %v131_v3 = vstv %s130_s10 }
  0x1b   :  { %6762 = vrcp.f32 %v49_v2  ;;  %s6935_s19 = scalar_select %p114_p5, 1, 0 }
  0x1c   :  { %6764 = vrcp.f32 %v131_v3  ;;  %s194_s20 = scalar_select %p193_p6, 1, 0 }
  0x1d   :  { %v116_v58 = vstv %s6935_s19 }
  0x1e   :  { %vm6958_vm7 = vcmp.eq.s32.totalorder %v116_v58, 1 }
  0x25   :  { %v6763_v4 = vpop.eup %6762 }
  0x26   :  { %v6765_v5 = vpop.eup %6764  ;;  %6734 = vpush %v6763_v4 }
  0x27   :  { %6742 = vpush %v6765_v5 }
  0x57   :  { %s6735_s17 = spop %6734 }
  0x58   :  { %v55_v21 = vstv %s6735_s17  ;;  %s6743_s18 = spop %6742 }
  0x59   :  { %v56_v22 = vmul.f32 %v55_v21, %v52_v18  ;;  %v57_v23 = vmul.f32 %v55_v21, %v53_v19  ;;  %v58_v24 = vmul.f32 %v55_v21, %v54_v20  ;;  %v134_v25 = vstv %s6743_s18 }
  0x5a   :  { %v135_v26 = vmul.f32 %v134_v25, %v52_v18  ;;  %v136_v27 = vmul.f32 %v134_v25, %v53_v19  ;;  %v137_v28 = vmul.f32 %v134_v25, %v54_v20 }
  0x5b   :  { %v59_v29 = vfloor.f32 %v56_v22  ;;  %v60_v30 = vfloor.f32 %v57_v23  ;;  %v61_v31 = vfloor.f32 %v58_v24 }
  0x5c   :  { %v138_v32 = vfloor.f32 %v135_v26  ;;  %v139_v33 = vfloor.f32 %v136_v27  ;;  %v140_v34 = vfloor.f32 %v137_v28 }
  0x5d   :  { %v6736_v35 = vtrunc.f32 %v59_v29  ;;  %v6738_v36 = vtrunc.f32 %v60_v30  ;;  %v6740_v37 = vtrunc.f32 %v61_v31 }
  0x5e   :  { %v6744_v39 = vtrunc.f32 %v138_v32  ;;  %v6746_v40 = vtrunc.f32 %v139_v33  ;;  %v6748_v41 = vtrunc.f32 %v140_v34 }
  0x5f   :  { %v6737_v43 = vcvt.f32.s32 %v6736_v35  ;;  %v6739_v44 = vcvt.f32.s32 %v6738_v36  ;;  %v6741_v45 = vcvt.f32.s32 %v6740_v37 }
  0x60   :  { %v6745_v46 = vcvt.f32.s32 %v6744_v39  ;;  %v6747_v47 = vcvt.f32.s32 %v6746_v40  ;;  %v6749_v48 = vcvt.f32.s32 %v6748_v41 }
  0x61   :  { %v66_v49 = vmul.u32 %v6737_v43, %v6928_v38  ;;  %v67_v50 = vmul.u32 %v6739_v44, %v6928_v38 }
  0x62   :  { %v68_v51 = vmul.u32 %v6741_v45, %v6928_v38  ;;  %v145_v52 = vmul.u32 %v6745_v46, %v6931_v42 }
  0x63   :  { %v69_v53 = vsub.s32 %v6915_v15, %v66_v49  ;;  %v70_v54 = vsub.s32 %v6918_v16, %v67_v50  ;;  %v146_v55 = vmul.u32 %v6747_v47, %v6931_v42  ;;  %v147_v56 = vmul.u32 %v6749_v48, %v6931_v42 }
  0x64   :  { %v71_v57 = vsub.s32 %v6921_v17, %v68_v51  ;;  %v148_v59 = vsub.s32 %v6915_v15, %v145_v52 }
  0x65   :  { %vm72_vm0 = vcmp.ge.s32.totalorder %v69_v53, %v6928_v38  ;;  %vm73_vm1 = vcmp.ge.s32.totalorder %v70_v54, %v6928_v38  ;;  %vm81_vm2 = vcmp.lt.s32.totalorder %v69_v53, 0  ;;  %vm82_vm3 = vcmp.lt.s32.totalorder %v70_v54, 0 }
  0x66   :  { %vm74_vm4 = vcmp.ge.s32.totalorder %v71_v57, %v6928_v38  ;;  %v75_v60 = vsel %vm72_vm0, 1, %v6825_v0  ;;  %v76_v61 = vsel %vm73_vm1, 1, %v6825_v0  ;;  %vm83_vm5 = vcmp.lt.s32.totalorder %v71_v57, 0 }
  0x67   :  { %v77_v62 = vsel %vm74_vm4, 1, %v6825_v0  ;;  %v78_v63 = vadd.s32 %v6737_v43, %v75_v60  ;;  %v79_v2 = vadd.s32 %v6739_v44, %v76_v61  ;;  %v84_v3 = vsel %vm81_vm2, 1, %v6825_v0 }
  0x68   :  { %v80_v4 = vadd.s32 %v6741_v45, %v77_v62  ;;  %v85_v5 = vsel %vm82_vm3, 1, %v6825_v0  ;;  %v86_v8 = vsel %vm83_vm5, 1, %v6825_v0  ;;  %v149_v13 = vsub.s32 %v6918_v16, %v146_v55 }
  0x69   :  { %v87_v14 = vsub.s32 %v78_v63, %v84_v3  ;;  %v88_v18 = vsub.s32 %v79_v2, %v85_v5  ;;  %v150_v19 = vsub.s32 %v6921_v17, %v147_v56  ;;  %vm151_vm9 = vcmp.ge.s32.totalorder %v148_v59, %v6931_v42 }
  0x6a   :  { %v89_v20 = vsub.s32 %v80_v4, %v86_v8  ;;  %vm152_vm11 = vcmp.ge.s32.totalorder %v149_v13, %v6931_v42  ;;  %v154_v21 = vsel %vm151_vm9, 1, %v6825_v0  ;;  %vm160_vm12 = vcmp.lt.s32.totalorder %v148_v59, 0  ;;  %vm118_vm9 = vmxor %vm36_vm6, %vm6958_vm7 }
  0x6b   :  { %v90_v22 = vmul.u32 %v87_v14, %v6928_v38  ;;  %v91_v23 = vmul.u32 %v88_v18, %v6928_v38  ;;  %vm153_vm13 = vcmp.ge.s32.totalorder %v150_v19, %v6931_v42  ;;  %v155_v24 = vsel %vm152_vm11, 1, %v6825_v0  ;;  %vm119_vm11 = vmxor %vm39_vm8, %vm6958_vm7 }
  0x6c   :  { %v92_v25 = vmul.u32 %v89_v20, %v6928_v38  ;;  %v156_v26 = vsel %vm153_vm13, 1, %v6825_v0  ;;  %v157_v27 = vadd.s32 %v6745_v46, %v154_v21  ;;  %v158_v28 = vadd.s32 %v6747_v47, %v155_v24 }
  0x6d   :  { %v93_v29 = vsub.s32 %v6915_v15, %v90_v22  ;;  %v94_v30 = vsub.s32 %v6918_v16, %v91_v23  ;;  %v159_v31 = vadd.s32 %v6749_v48, %v156_v26  ;;  %vm161_vm14 = vcmp.lt.s32.totalorder %v149_v13, 0 }
  0x6e   :  { %v95_v32 = vsub.s32 %v6921_v17, %v92_v25  ;;  %vm162_vm15 = vcmp.lt.s32.totalorder %v150_v19, 0  ;;  %v163_v33 = vsel %vm160_vm12, 1, %v6825_v0  ;;  %v164_v34 = vsel %vm161_vm14, 1, %v6825_v0  ;;  %vm120_vm12 = vmxor %vm42_vm10, %vm6958_vm7 }
  0x6f   :  { %vm96_vm0 = vcmp.ge.s32.totalorder %v93_v29, %v6928_v38  ;;  %vm97_vm1 = vcmp.ge.s32.totalorder %v94_v30, %v6928_v38  ;;  %vm105_vm2 = vcmp.lt.s32.totalorder %v93_v29, 0  ;;  %vm106_vm3 = vcmp.lt.s32.totalorder %v94_v30, 0 }
  0x70   :  { %vm98_vm4 = vcmp.ge.s32.totalorder %v95_v32, %v6928_v38  ;;  %v99_v35 = vsel %vm96_vm0, 1, %v6825_v0  ;;  %v100_v36 = vsel %vm97_vm1, 1, %v6825_v0  ;;  %vm107_vm5 = vcmp.lt.s32.totalorder %v95_v32, 0 }
  0x71   :  { %v101_v37 = vsel %vm98_vm4, 1, %v6825_v0  ;;  %v102_v39 = vadd.s32 %v99_v35, %v87_v14  ;;  %v103_v40 = vadd.s32 %v100_v36, %v88_v18  ;;  %v108_v41 = vsel %vm105_vm2, 1, %v6825_v0 }
  0x72   :  { %v104_v43 = vadd.s32 %v101_v37, %v89_v20  ;;  %v109_v44 = vsel %vm106_vm3, 1, %v6825_v0  ;;  %v110_v45 = vsel %vm107_vm5, 1, %v6825_v0  ;;  %v165_v38 = vsel %vm162_vm15, 1, %v6825_v0 }
  0x73   :  { %v111_v46 = vsub.s32 %v102_v39, %v108_v41  ;;  %v112_v47 = vsub.s32 %v103_v40, %v109_v44  ;;  %v166_v48 = vsub.s32 %v157_v27, %v163_v33  ;;  %v167_v49 = vsub.s32 %v158_v28, %v164_v34  ;;  %v7079_v34 = vld [vmem:[%s10299_s3] sm:$0xff] }
  0x74   :  { %v113_v50 = vsub.s32 %v104_v43, %v110_v45  ;;  %v168_v51 = vsub.s32 %v159_v31, %v165_v38  ;;  %v217_v61 = vlaneseq  ;;  %v195_v2 = vstv %s194_s20 }
  0x75   :  { %v121_v52 = vsub.s32 0, %v111_v46  ;;  %v122_v53 = vsub.s32 0, %v112_v47  ;;  %v169_v54 = vmul.u32 %v166_v48, %v6931_v42  ;;  %v170_v55 = vmul.u32 %v167_v49, %v6931_v42 }
  0x76   :  { %v123_v56 = vsub.s32 0, %v113_v50  ;;  %v171_v57 = vmul.u32 %v168_v51, %v6931_v42  ;;  %vm209_vm7 = vcmp.gt.s32.totalorder %v6893_v6, 1  ;;  %v7018_v3 = vshrl.u32 %v217_v61, 7 }
  0x77   :  { %v7009_v58 = vsel %vm118_vm9, %v121_v52, %v111_v46  ;;  %v7011_v59 = vsel %vm119_vm11, %v122_v53, %v112_v47  ;;  %v172_v62 = vsub.s32 %v6915_v15, %v169_v54  ;;  %v173_v63 = vsub.s32 %v6918_v16, %v170_v55 }
  0x78   :  { %v7013_v60 = vsel %vm120_vm12, %v123_v56, %v113_v50  ;;  %v174_v4 = vsub.s32 %v6921_v17, %v171_v57  ;;  %vm7021_vm13 = vcmp.eq.s32.totalorder %v195_v2, 1  ;;  %v7032_v13 = vsub.s32 2, %v7018_v3 }
  0x79   :  { %10469 = vst [vmem:[#allocation8_spill] sm:$0xff] %v7013_v60  ;;  %vm175_vm14 = vcmp.ge.s32.totalorder %v172_v62, %v6931_v42  ;;  %vm176_vm15 = vcmp.ge.s32.totalorder %v173_v63, %v6931_v42  ;;  %vm184_vm0 = vcmp.lt.s32.totalorder %v172_v62, 0  ;;  %vm185_vm1 = vcmp.lt.s32.totalorder %v173_v63, 0  ;;  %vm197_vm4 = vmxor %vm36_vm6, %vm7021_vm13 }
  0x7a   :  { %vm177_vm2 = vcmp.ge.s32.totalorder %v174_v4, %v6931_v42  ;;  %v178_v15 = vsel %vm175_vm14, 1, %v6825_v0  ;;  %v179_v16 = vsel %vm176_vm15, 1, %v6825_v0  ;;  %vm186_vm3 = vcmp.lt.s32.totalorder %v174_v4, 0  ;;  %vm198_vm5 = vmxor %vm39_vm8, %vm7021_vm13 }
  0x7b   :  { %v180_v8 = vsel %vm177_vm2, 1, %v6825_v0  ;;  %v181_v17 = vadd.s32 %v178_v15, %v166_v48  ;;  %v182_v12 = vadd.s32 %v179_v16, %v167_v49  ;;  %v187_v18 = vsel %vm184_vm0, 1, %v6825_v0  ;;  %vm199_vm9 = vmxor %vm42_vm10, %vm7021_vm13 }
  0x7c   :  { %v183_v14 = vadd.s32 %v180_v8, %v168_v51  ;;  %v188_v19 = vsel %vm185_vm1, 1, %v6825_v0  ;;  %v10303_v20 = vmov 33   ;;  %v189_v21 = vsel %vm186_vm3, 1, %v6825_v0 }
  0x7d   :  { %v7039_v42 = vsel %vm209_vm7, 32, %v10303_v20  ;;  %v190_v22 = vsub.s32 %v181_v17, %v187_v18  ;;  %v191_v23 = vsub.s32 %v182_v12, %v188_v19  ;;  %v232_v25 = vrot.slane %v7009_v58, %v7032_v13  ;;  %v1044_v19 = vld [vmem:[%s10298_s2] sm:$0xff] }
  0x7e   :  { %v192_v24 = vsub.s32 %v183_v14, %v189_v21  ;;  %v565_v9 = vrot.slane %v7039_v42, %v7032_v13  ;;  %v7059_v27 = vsub.s32 3, %v7018_v3  ;;  %v7062_v29 = vsub.s32 1, %v7018_v3 }
  0x7f   :  { %v200_v6 = vsub.s32 0, %v190_v22  ;;  %v201_v0 = vsub.s32 0, %v191_v23  ;;  %v7065_v11 = vsub.s32 7, %v7018_v3  ;;  %v7068_v30 = vsub.s32 0, %v7018_v3 }
  0x80   :  { %v202_v26 = vsub.s32 0, %v192_v24  ;;  %v7094_v41 = vadd.s32 8, %v7018_v3  ;;  %v7101_v44 = vrot.slane %v7079_v34, %v7062_v29  ;;  %vm210_vm6 = vcmp.gt.s32.totalorder %v6898_v7, 1 }
  0x81   :  { %v203_v28 = vsel %vm197_vm4, %v200_v6, %v190_v22  ;;  %v204_v10 = vsel %vm198_vm5, %v201_v0, %v191_v23  ;;  %10472 = vst [vmem:[#allocation9_spill] sm:$0xff] %v7065_v11  ;;  %v7082_v35 = vrot.slane %v232_v25, %v7068_v30  ;;  %v7087_v37 = vrot.slane %v565_v9, %v7068_v30 }
  0x82   :  { %v7070_v31 = vsel %vm199_vm9, %v202_v26, %v192_v24  ;;  %v7072_v32 = vadd.s32 16, %v203_v28  ;;  %v7074_v33 = vadd.s32 16, %v204_v10  ;;  %v228_v45 = vrot.slane %v7009_v58, %v7068_v30 }
  0x83   :  { %10473 = vst [vmem:[#allocation10_spill] sm:$0xff] %v7070_v31  ;;  %v561_v38 = vrot.slane %v7039_v42, %v7068_v30  ;;  %vm298_vm8 = vcmp.eq.s32.totalorder %v7018_v3, %v7082_v35  ;;  %vm631_vm12 = vcmp.eq.s32.totalorder %v7018_v3, %v7087_v37  ;;  %vm307_vm7 = vcmp.eq.s32.totalorder %v7094_v41, %v7082_v35 }
  0x84   :  { %v367_v36 = vrot.slane %v7072_v32, %v7059_v27  ;;  %v363_v39 = vrot.slane %v7072_v32, %v7062_v29  ;;  %vm640_vm14 = vcmp.eq.s32.totalorder %v7094_v41, %v7087_v37  ;;  %v7124_v46 = vsel %vm210_vm6, 32, %v10303_v20 }
  0x85   :  { %10474 = vst [vmem:[#allocation11_spill] sm:$0xff] %v7124_v46  ;;  %vm793_vm0 = vcmp.eq.s32.totalorder %v7018_v3, %v7101_v44  ;;  %v7129_v47 = vsub.s32 4, %v7018_v3  ;;  %v7132_v48 = vrot.slane %v228_v45, %v7068_v30  ;;  %vm802_vm2 = vcmp.eq.s32.totalorder %v7094_v41, %v7101_v44 }
  0x86   :  { %v7097_v43 = vrot.slane %v367_v36, %v7062_v29  ;;  %v7117_v7 = vrot.slane %v363_v39, %v7062_v29  ;;  %v7137_v49 = vrot.slane %v561_v38, %v7068_v30  ;;  %v7140_v50 = vsub.s32 6, %v7018_v3  ;;  %v1045_v38 = vld [vmem:[%s10298_s2 + $0x8] sm:$0xff] }
  0x87   :  { %v569_v51 = vrot.slane %v7039_v42, %v7129_v47  ;;  %v7148_v52 = vrot.slane %v7079_v34, %v7068_v30  ;;  %v577_v54 = vrot.slane %v7124_v46, %v7068_v30  ;;  %v10304_v62 = vmov 1.0|1.0  }
  0x88   :  { %vm433_vm10 = vcmp.eq.s32.totalorder %v7018_v3, %v7097_v43  ;;  %vm442_vm11 = vcmp.eq.s32.totalorder %v7094_v41, %v7097_v43  ;;  %10475 = vst [vmem:[#allocation12_spill] sm:$0xff] %v7140_v50  ;;  %vm432_vm5 = vcmp.eq.s32.totalorder %v7018_v3, %v7117_v7  ;;  %v573_v53 = vrot.slane %v7039_v42, %v7140_v50 }
  0x89   :  { %vm496_vm13 = vmor %vm298_vm8, %vm433_vm10  ;;  %vm441_vm6 = vcmp.eq.s32.totalorder %v7094_v41, %v7117_v7  ;;  %vm297_vm10 = vcmp.eq.s32.totalorder %v7018_v3, %v7132_v48  ;;  %v581_v2 = vrot.slane %v7124_v46, %v7032_v13  ;;  %v7186_v4 = vrot.slane %v569_v51, %v7068_v30  ;;  %v1046_v51 = vld [vmem:[%s10298_s2 + $0x10] sm:$0xff] }
  0x8a   :  { %vm505_vm15 = vmor %vm307_vm7, %vm442_vm11  ;;  %vm630_vm11 = vcmp.eq.s32.totalorder %v7018_v3, %v7137_v49  ;;  %v7197_v15 = vadd.s32 16, %v7018_v3  ;;  %v7203_v17 = vrot.slane %v573_v53, %v7068_v30  ;;  %v7206_v12 = vrot.slane %v577_v54, %v7068_v30 }
  0x8b   :  { %vm694_vm1 = vmor %vm496_vm13, %vm631_vm12  ;;  %vm306_vm12 = vcmp.eq.s32.totalorder %v7094_v41, %v7132_v48  ;;  %vm639_vm13 = vcmp.eq.s32.totalorder %v7094_v41, %v7137_v49  ;;  %v7209_v14 = vadd.s32 24, %v7018_v3  ;;  %v10480_v6 = vmov 0 }
  0x8c   :  { %vm703_vm3 = vmor %vm505_vm15, %vm640_vm14  ;;  %vm792_vm15 = vcmp.eq.s32.totalorder %v7018_v3, %v7148_v52  ;;  %10478 = vst [vmem:[#allocation13_spill] sm:$0xff] %v7197_v15  ;;  %v7254_v28 = vrot.slane %v581_v2, %v7068_v30  ;;  %v7265_v39 = vsub.s32 5, %v7018_v3 }
  0x8d   :  { %vm856_vm4 = vmor %vm694_vm1, %vm793_vm0  ;;  %vm801_vm1 = vcmp.eq.s32.totalorder %v7094_v41, %v7148_v52  ;;  %10479 = vst [vmem:[#allocation14_spill] sm:$0xff] %v7209_v14 }
  0x8e   :  { %vm865_vm9 = vmor %vm703_vm3, %vm802_vm2  ;;  %v5645_v55 = vsel %vm856_vm4, 1.0, %v10306_v1 }
  0x8f   :  { %v5654_v56 = vsel %vm865_vm9, 1.0, %v10306_v1  ;;  %vm7158_vm8 = vmpackc.low %vm865_vm9, %vm856_vm4  ;;  %v7162_v61 = vsub.f32 %v5645_v55, %v5645_v55  ;;  %vm451_vm4 = vcmp.eq.s32.totalorder %v7197_v15, %v7097_v43 }
  0x90   :  { %6143 = vmatprep.subr.msk.bf16.mxu1 %vm7158_vm8, %v10304_v62  ;;  %v7171_v63 = vsub.f32 %v5654_v56, %v5654_v56  ;;  %6179 = vmatprep.subr.msk.bf16.mxu0 %vm7158_vm8, %v10304_v62  ;;  %vm495_vm7 = vmor %vm297_vm10, %vm432_vm5  ;;  %vm10314_vm5 = vcmask 424960   ;;  %vm649_vm10 = vcmp.eq.s32.totalorder %v7197_v15, %v7087_v37  ;;  %v7289_v56 = vadd.s32 32, %v7018_v3 }
  0x91   :  { %vm504_vm14 = vmor %vm306_vm12, %vm441_vm6  ;;  %v1229_v5 = vand.u32 4294901760, %v7162_v61  ;;  %vm460_vm6 = vcmp.eq.s32.totalorder %v7209_v14, %v7097_v43  ;;  %vm316_vm12 = vcmp.eq.s32.totalorder %v7197_v15, %v7082_v35  ;;  %v1051_v26 = vsel %vm10314_vm5, %v1044_v19, 0 }
  0x92   :  { %vm693_vm0 = vmor %vm495_vm7, %vm630_vm11  ;;  %v1241_v16 = vand.u32 4294901760, %v7171_v63  ;;  %vm325_vm7 = vcmp.eq.s32.totalorder %v7209_v14, %v7082_v35  ;;  %v7283_v54 = vand.u32 4294901760, %v1051_v26  ;;  %10486 = vst [vmem:[#allocation19_spill] sm:$0xff] %v7289_v56 }
  0x93   :  { %vm702_vm2 = vmor %vm504_vm14, %vm639_vm13  ;;  %v1230_v18 = vsub.f32 %v7162_v61, %v1229_v5  ;;  %vm658_vm14 = vcmp.eq.s32.totalorder %v7209_v14, %v7087_v37 }
  0x94   :  { %vm855_vm3 = vmor %vm693_vm0, %vm792_vm15  ;;  %v1242_v42 = vsub.f32 %v7171_v63, %v1241_v16  ;;  %v7218_v21 = vpack.c.bf16 %v1241_v16, %v1229_v5  ;;  %vm811_vm0 = vcmp.eq.s32.totalorder %v7197_v15, %v7101_v44  ;;  %10485 = vst [vmem:[#allocation18_spill] sm:$0xff] %v7283_v54 }
  0x95   :  { %vm864_vm9 = vmor %vm702_vm2, %vm801_vm1  ;;  %v5644_v22 = vsel %vm855_vm3, 1.0, %v10306_v1  ;;  %v1231_v23 = vand.u32 4294901760, %v1230_v18  ;;  %vm820_vm2 = vcmp.eq.s32.totalorder %v7209_v14, %v7101_v44  ;;  %v1054_v18 = vsel %vm10314_vm5, %v1045_v38, 0 }
  0x96   :  { %v5653_v24 = vsel %vm864_vm9, 1.0, %v10306_v1  ;;  %vm7229_vm11 = vmpackc.low %vm864_vm9, %vm855_vm3  ;;  %v7233_v0 = vsub.f32 %v5644_v22, %v5644_v22  ;;  %v1243_v25 = vand.u32 4294901760, %v1242_v42  ;;  %vm657_vm9 = vcmp.eq.s32.totalorder %v7209_v14, %v7137_v49 }
  0x97   :  { %v10481_v6 = vsel %vm7229_vm11, 4294967295, %v10480_v6  ;;  %6145 = vmatpush1.bf16.msk.msra.mxu1 %vm7229_vm11, %v10304_v62  ;;  %v7240_v9 = vsub.f32 %v5653_v24, %v5653_v24  ;;  %6181 = vmatpush1.bf16.msk.msra.mxu0 %vm7229_vm11, %v10304_v62  ;;  %vm514_vm13 = vmor %vm316_vm12, %vm451_vm4  ;;  %vm648_vm4 = vcmp.eq.s32.totalorder %v7197_v15, %v7137_v49  ;;  %v10487_v22 = vmov 0 }
  0x98   :  { %10482 = vst [vmem:[#allocation15_spill] sm:$0xff] %v10481_v6  ;;  %10483 = vst [vmem:[#allocation16_spill] sm:$0xff] %v7233_v0  ;;  %v1235_v10 = vand.u32 4294901760, %v7233_v0  ;;  %v7262_v36 = vpack.c.bf16 %v1243_v25, %v1231_v23  ;;  %v7320_v25 = vadd.s32 40, %v7018_v3 }
  0x99   :  { %10484 = vst [vmem:[#allocation17_spill] sm:$0xff] %v7240_v9  ;;  %vm523_vm15 = vmor %vm325_vm7, %vm460_vm6  ;;  %v1247_v45 = vand.u32 4294901760, %v7240_v9  ;;  %vm459_vm7 = vcmp.eq.s32.totalorder %v7209_v14, %v7117_v7 }
  0x9a   :  { %vm712_vm1 = vmor %vm514_vm13, %vm649_vm10  ;;  %v1236_v53 = vsub.f32 %v7233_v0, %v1235_v10  ;;  %vm450_vm10 = vcmp.eq.s32.totalorder %v7197_v15, %v7117_v7  ;;  %10492 = vst [vmem:[#allocation23_spill] sm:$0xff] %v7320_v25 }
  0x9b   :  { %vm721_vm3 = vmor %vm523_vm15, %vm658_vm14  ;;  %v1248_v55 = vsub.f32 %v7240_v9, %v1247_v45  ;;  %v7291_v2 = vpack.c.bf16 %v1247_v45, %v1235_v10  ;;  %vm315_vm14 = vcmp.eq.s32.totalorder %v7197_v15, %v7132_v48  ;;  %vm324_vm15 = vcmp.eq.s32.totalorder %v7209_v14, %v7132_v48 }
  0x9c   :  { %vm874_vm6 = vmor %vm712_vm1, %vm811_vm0  ;;  %v1237_v5 = vand.u32 4294901760, %v1236_v53  ;;  %v7323_v10 = vsub.f32 %v1051_v26, %v7283_v54  ;;  %v7330_v53 = vand.u32 4294901760, %v1054_v18  ;;  %v240_v54 = vrot.slane %v7009_v58, %v7140_v50 }
  0x9d   :  { %vm883_vm12 = vmor %vm721_vm3, %vm820_vm2  ;;  %v5663_v16 = vsel %vm874_vm6, 1.0, %v10306_v1  ;;  %v1249_v19 = vand.u32 4294901760, %v1248_v55  ;;  %vm810_vm2 = vcmp.eq.s32.totalorder %v7197_v15, %v7148_v52 }
  0x9e   :  { %v5672_v42 = vsel %vm883_vm12, 1.0, %v10306_v1  ;;  %vm7298_vm13 = vmpackc.low %vm883_vm12, %vm874_vm6  ;;  %v7302_v23 = vsub.f32 %v5663_v16, %v5663_v16  ;;  %10493 = vst [vmem:[#allocation24_spill] sm:$0xff] %v7323_v10  ;;  %vm819_vm6 = vcmp.eq.s32.totalorder %v7209_v14, %v7148_v52  ;;  %v7355_v16 = vand.u32 4294901760, %v7323_v10 }
  0x9f   :  { %v10488_v22 = vsel %vm7298_vm13, 4294967295, %v10487_v22  ;;  %6147 = vmatprep.subr.msk.bf16.mxu1 %vm7298_vm13, %v10304_v62  ;;  %v7309_v24 = vsub.f32 %v5672_v42, %v5672_v42  ;;  %6183 = vmatprep.subr.msk.bf16.mxu0 %vm7298_vm13, %v10304_v62  ;;  %vm513_vm0 = vmor %vm315_vm14, %vm450_vm10  ;;  %v7327_v45 = vpack.c.bf16 %v1249_v19, %v1237_v5  ;;  %10494 = vst [vmem:[#allocation25_spill] sm:$0xff] %v7330_v53  ;;  %v10497_v62 = vmov 0 }
  0xa0   :  { %10489 = vst [vmem:[#allocation20_spill] sm:$0xff] %v10488_v22  ;;  %10490 = vst [vmem:[#allocation21_spill] sm:$0xff] %v7302_v23  ;;  %v1253_v38 = vand.u32 4294901760, %v7302_v23  ;;  %vm667_vm10 = vcmp.eq.s32.totalorder %v7289_v56, %v7087_v37  ;;  %v7364_v55 = vsub.f32 %v1054_v18, %v7330_v53  ;;  %v1047_v18 = vld [vmem:[%s10298_s2 + $0x18] sm:$0xff]  ;;  %vm675_vm14 = vcmp.eq.s32.totalorder %v7320_v25, %v7137_v49 }
  0xa1   :  { %10491 = vst [vmem:[#allocation22_spill] sm:$0xff] %v7309_v24  ;;  %vm522_vm1 = vmor %vm324_vm15, %vm459_vm7  ;;  %v1265_v26 = vand.u32 4294901760, %v7309_v24  ;;  %vm676_vm7 = vcmp.eq.s32.totalorder %v7320_v25, %v7087_v37  ;;  %v1060_v46 = vsel %vm10314_vm5, %v1047_v18, 0 }
  0xa2   :  { %vm711_vm3 = vmor %vm513_vm0, %vm648_vm4  ;;  %vm829_vm4 = vcmp.eq.s32.totalorder %v7289_v56, %v7101_v44  ;;  %v1254_v5 = vsub.f32 %v7302_v23, %v1253_v38  ;;  %vm469_vm0 = vcmp.eq.s32.totalorder %v7289_v56, %v7097_v43  ;;  %10495 = vst [vmem:[#allocation26_spill] sm:$0xff] %v7355_v16  ;;  %v7448_v15 = vand.u32 4294901760, %v1060_v46 }
  0xa3   :  { %vm720_vm12 = vmor %vm522_vm1, %vm657_vm9  ;;  %v1266_v19 = vsub.f32 %v7309_v24, %v1265_v26  ;;  %v7358_v42 = vpack.c.bf16 %v1265_v26, %v1253_v38  ;;  %vm478_vm1 = vcmp.eq.s32.totalorder %v7320_v25, %v7097_v43  ;;  %10496 = vst [vmem:[#allocation27_spill] sm:$0xff] %v7364_v55 }
  0xa4   :  { %vm873_vm15 = vmor %vm711_vm3, %vm810_vm2  ;;  %v1255_v20 = vand.u32 4294901760, %v1254_v5  ;;  %vm334_vm3 = vcmp.eq.s32.totalorder %v7289_v56, %v7082_v35  ;;  %v10501_v5 = vmov 1.0|1.0   ;;  %10507 = vst [vmem:[#allocation33_spill] sm:$0xff] %v7448_v15  ;;  %v7513_v9 = vsub.f32 %v1060_v46, %v7448_v15 }
  0xa5   :  { %vm882_vm9 = vmor %vm720_vm12, %vm819_vm6  ;;  %v5662_v40 = vsel %vm873_vm15, 1.0, %v10306_v1  ;;  %v1267_v26 = vand.u32 4294901760, %v1266_v19  ;;  %vm343_vm6 = vcmp.eq.s32.totalorder %v7320_v25, %v7082_v35 }
  0xa6   :  { %v5671_v8 = vsel %vm882_vm9, 1.0, %v10306_v1  ;;  %vm7370_vm2 = vmpackc.low %vm882_vm9, %vm873_vm15  ;;  %v7374_v38 = vsub.f32 %v5662_v40, %v5662_v40  ;;  %vm666_vm15 = vcmp.eq.s32.totalorder %v7289_v56, %v7137_v49  ;;  %v7397_v40 = vadd.s32 48, %v7018_v3  ;;  %10513 = vst [vmem:[#allocation37_spill] sm:$0xff] %v7513_v9 }
  0xa7   :  { %v10498_v62 = vsel %vm7370_vm2, 4294967295, %v10497_v62  ;;  %6149 = vmatpush1.bf16.msk.msra.mxu1 %vm7370_vm2, %v10501_v5  ;;  %v7384_v31 = vsub.f32 %v5671_v8, %v5671_v8  ;;  %6185 = vmatpush1.bf16.msk.msra.mxu0 %vm7370_vm2, %v10501_v5  ;;  %vm532_vm12 = vmor %vm334_vm3, %vm469_vm0  ;;  %v7405_v19 = vpack.c.bf16 %v1267_v26, %v1255_v20  ;;  %v1057_v1 = vsel %vm10314_vm5, %v1046_v51, 0 }
  0xa8   :  { %10499 = vst [vmem:[#allocation28_spill] sm:$0xff] %v10498_v62  ;;  %10500 = vst [vmem:[#allocation29_spill] sm:$0xff] %v7374_v38  ;;  %v1259_v8 = vand.u32 4294901760, %v7374_v38  ;;  %v1175_v20 = vsub.f32 %v7323_v10, %v7355_v16  ;;  %v7425_v51 = vand.u32 4294901760, %v7364_v55  ;;  %v7438_v10 = vand.u32 4294901760, %v1057_v1 }
  0xa9   :  { %10502 = vst [vmem:[#allocation30_spill] sm:$0xff] %v7384_v31  ;;  %vm541_vm9 = vmor %vm343_vm6, %vm478_vm1  ;;  %v1271_v60 = vand.u32 4294901760, %v7384_v31  ;;  %vm352_vm3 = vcmp.eq.s32.totalorder %v7397_v40, %v7082_v35 }
  0xaa   :  { %vm730_vm0 = vmor %vm532_vm12, %vm667_vm10  ;;  %10503 = vst [vmem:[#allocation31_spill] sm:$0xff] %v7425_v51  ;;  %v1260_v26 = vsub.f32 %v7374_v38, %v1259_v8  ;;  %vm468_vm12 = vcmp.eq.s32.totalorder %v7289_v56, %v7117_v7  ;;  %v10506_v38 = vmov 0.0   ;;  %v7495_v24 = vand.u32 4294901760, %v1175_v20 }
  0xab   :  { %vm739_vm1 = vmor %vm541_vm9, %vm676_vm7  ;;  %v1272_v18 = vsub.f32 %v7384_v31, %v1271_v60  ;;  %v7436_v62 = vpack.c.bf16 %v1271_v60, %v1259_v8  ;;  %10504 = vst [vmem:[#allocation32_spill] sm:$0xff] %v7438_v10  ;;  %vm10505_vm9 = vcmp.eq.s32.totalorder %v7320_v25, %v7101_v44  ;;  %v10508_v8 = vmov 0 }
  0xac   :  { %vm892_vm10 = vmor %vm730_vm0, %vm829_vm4  ;;  %vm477_vm4 = vcmp.eq.s32.totalorder %v7320_v25, %v7117_v7  ;;  %v1261_v14 = vand.u32 4294901760, %v1260_v26  ;;  %vm684_vm0 = vcmp.eq.s32.totalorder %v7397_v40, %v7137_v49  ;;  %10511 = vst [vmem:[#allocation35_spill] sm:$0xff] %v7495_v24  ;;  %v7510_v20 = vsub.f32 %v1057_v1, %v7438_v10 }
  0xad   :  { %vm901_vm5 = vmor %vm739_vm1, %vm10505_vm9  ;;  %v5681_v53 = vsel %vm892_vm10, 1.0, %v10506_v38  ;;  %vm333_vm1 = vcmp.eq.s32.totalorder %v7289_v56, %v7132_v48  ;;  %v1273_v22 = vand.u32 4294901760, %v1272_v18  ;;  %vm10344_vm9 = vcmask 1043456  }
  0xae   :  { %v5690_v60 = vsel %vm901_vm5, 1.0, %v10506_v38  ;;  %vm7451_vm7 = vmpackc.low %vm901_vm5, %vm892_vm10  ;;  %v7455_v31 = vsub.f32 %v5681_v53, %v5681_v53  ;;  %vm342_vm5 = vcmp.eq.s32.totalorder %v7320_v25, %v7132_v48  ;;  %v7484_v18 = vrot.slane %v7079_v34, %v7059_v27  ;;  %10512 = vst [vmem:[#allocation36_spill] sm:$0xff] %v7510_v20 }
  0xaf   :  { %v10509_v8 = vsel %vm7451_vm7, 4294967295, %v10508_v8  ;;  %6151 = vmatprep.subr.msk.bf16.mxu1 %vm7451_vm7, %v10501_v5  ;;  %v7462_v23 = vsub.f32 %v5690_v60, %v5690_v60  ;;  %6187 = vmatprep.subr.msk.bf16.mxu0 %vm7451_vm7, %v10501_v5  ;;  %vm531_vm10 = vmor %vm333_vm1, %vm468_vm12  ;;  %v7479_v53 = vpack.c.bf16 %v1273_v22, %v1261_v14  ;;  %v7488_v60 = vrot.slane %v7079_v34, %v7265_v39  ;;  %v1048_v22 = vld [vmem:[%s10298_s2 + $0x20] sm:$0x1] }
  0xb0   :  { %10510 = vst [vmem:[#allocation34_spill] sm:$0xff] %v10509_v8  ;;  %vm540_vm6 = vmor %vm342_vm5, %vm477_vm4  ;;  %v1277_v26 = vand.u32 4294901760, %v7455_v31  ;;  %v375_v8 = vrot.slane %v7072_v32, %v7065_v11  ;;  %vm10515_vm5 = vcmp.eq.s32.totalorder %v7320_v25, %v7148_v52 }
  0xb1   :  { %vm729_vm12 = vmor %vm531_vm10, %vm666_vm15  ;;  %v1289_v14 = vand.u32 4294901760, %v7462_v23  ;;  %vm10514_vm15 = vcmp.eq.s32.totalorder %v7289_v56, %v7148_v52  ;;  %v10517_v56 = vmov 0 }
  0xb2   :  { %vm738_vm4 = vmor %vm540_vm6, %vm675_vm14  ;;  %v1278_v0 = vsub.f32 %v7455_v31, %v1277_v26  ;;  %vm487_vm14 = vcmp.eq.s32.totalorder %v7397_v40, %v7097_v43 }
  0xb3   :  { %vm891_vm1 = vmor %vm729_vm12, %vm10514_vm15  ;;  %v1290_v6 = vsub.f32 %v7462_v23, %v1289_v14  ;;  %v7523_v11 = vpack.c.bf16 %v1289_v14, %v1277_v26  ;;  %vm10516_vm12 = vcmask 424960   ;;  %vm642_vm15 = vcmp.eq.s32.totalorder %v7094_v41, %v7203_v17 }
  0xb4   :  { %vm900_vm10 = vmor %vm738_vm4, %vm10515_vm5  ;;  %v5680_v1 = vsel %vm891_vm1, 1.0, %v10506_v38  ;;  %v1279_v46 = vand.u32 4294901760, %v1278_v0  ;;  %v1063_v50 = vsel %vm10516_vm12, %v1048_v22, 0  ;;  %v7537_v26 = vrot.slane %v375_v8, %v7062_v29 }
  0xb5   :  { %v5689_v14 = vsel %vm900_vm10, 1.0, %v10506_v38  ;;  %vm7540_vm6 = vmpackc.low %vm900_vm10, %vm891_vm1  ;;  %v7544_v25 = vsub.f32 %v5680_v1, %v5680_v1  ;;  %v1291_v15 = vand.u32 4294901760, %v1290_v6  ;;  %vm486_vm5 = vcmp.eq.s32.totalorder %v7397_v40, %v7117_v7 }
  0xb6   :  { %v10518_v56 = vsel %vm7540_vm6, 4294967295, %v10517_v56  ;;  %6153 = vmatpush1.bf16.msk.msra.mxu1 %vm7540_vm6, %v10501_v5  ;;  %v7551_v35 = vsub.f32 %v5689_v14, %v5689_v14  ;;  %6189 = vmatpush1.bf16.msk.msra.mxu0 %vm7540_vm6, %v10501_v5  ;;  %vm550_vm1 = vmor %vm352_vm3, %vm487_vm14  ;;  %v7562_v6 = vand.u32 4294901760, %v7510_v20  ;;  %v7565_v0 = vand.u32 4294901760, %v7513_v9 }
  0xb7   :  { %10519 = vst [vmem:[#allocation38_spill] sm:$0xff] %v10518_v56  ;;  %v7570_v8 = vrot.slane %v240_v54, %v7068_v30  ;;  %v1283_v22 = vand.u32 4294901760, %v7544_v25  ;;  %vm10522_vm3 = vcmp.eq.s32.totalorder %v7397_v40, %v7087_v37  ;;  %v7576_v43 = vpack.c.bf16 %v1291_v15, %v1279_v46 }
  0xb8   :  { %10520 = vst [vmem:[#allocation39_spill] sm:$0xff] %v7562_v6  ;;  %10521 = vst [vmem:[#allocation40_spill] sm:$0xff] %v7565_v0  ;;  %v7578_v1 = vand.u32 4294901760, %v1063_v50  ;;  %v383_v14 = vrot.slane %v7074_v33, %v7059_v27  ;;  %v1295_v56 = vand.u32 4294901760, %v7551_v35  ;;  %vm10524_vm12 = vcmp.eq.s32.totalorder %v7397_v40, %v7101_v44 }
  0xb9   :  { %vm748_vm14 = vmor %vm550_vm1, %vm10522_vm3  ;;  %vm351_vm4 = vcmp.eq.s32.totalorder %v7397_v40, %v7132_v48  ;;  %v248_v15 = vrot.slane %v7011_v59, %v7032_v13  ;;  %v1284_v27 = vsub.f32 %v7544_v25, %v1283_v22  ;;  %vm435_vm3 = vcmp.eq.s32.totalorder %v7018_v3, %v7537_v26 }
  0xba   :  { %10523 = vst [vmem:[#allocation41_spill] sm:$0xff] %v7578_v1  ;;  %vm910_vm10 = vmor %vm748_vm14, %vm10524_vm12  ;;  %v1296_v7 = vsub.f32 %v7551_v35, %v1295_v56  ;;  %v7611_v48 = vpack.c.bf16 %v1295_v56, %v1283_v22  ;;  %v7626_v49 = vrot.slane %v383_v14, %v7062_v29  ;;  %vm309_vm12 = vcmp.eq.s32.totalorder %v7094_v41, %v7570_v8 }
  0xbb   :  { %v7593_v54 = vsel %vm910_vm10, 1.0, %v10506_v38  ;;  %vm549_vm1 = vmor %vm351_vm4, %vm486_vm5  ;;  %vm444_vm4 = vcmp.eq.s32.totalorder %v7094_v41, %v7537_v26  ;;  %vm10526_vm5 = vcmp.eq.s32.totalorder %v7397_v40, %v7148_v52  ;;  %v1285_v37 = vand.u32 4294901760, %v1284_v27 }
  0xbc   :  { %10525 = vst [vmem:[#allocation42_spill] sm:$0xff] %v7593_v54  ;;  %v1070_v44 = vsel %vm10344_vm9, %v7593_v54, 0  ;;  %5719 = vmatprep.subr.msk.mxu1 %vm10344_vm9, %v7593_v54  ;;  %5733 = vmatprep.subr.msk.mxu0 %vm10344_vm9, %v7593_v54  ;;  %vm747_vm10 = vmor %vm549_vm1, %vm684_vm0  ;;  %v7621_v54 = vsub.f32 %v1063_v50, %v7578_v1  ;;  %vm300_vm0 = vcmp.eq.s32.totalorder %v7018_v3, %v7570_v8  ;;  %v1297_v22 = vand.u32 4294901760, %v1296_v7 }
  0xbd   :  { %v7615_v46 = vsub.f32 %v1070_v44, %v1070_v44  ;;  %vm909_vm14 = vmor %vm747_vm10, %vm10526_vm5  ;;  %v7637_v50 = vrot.slane %v248_v15, %v7068_v30  ;;  %vm635_vm5 = vcmp.eq.s32.totalorder %v7018_v3, %v7254_v28  ;;  %v371_v14 = vrot.slane %v7072_v32, %v7265_v39 }
  0xbe   :  { %10527 = vst [vmem:[#allocation43_spill] sm:$0xff] %v7621_v54  ;;  %v7629_v56 = vsel %vm909_vm14, 1.0, %v10506_v38  ;;  %vm498_vm1 = vmor %vm300_vm0, %vm435_vm3  ;;  %v7658_v27 = vpack.c.bf16 %v1297_v22, %v1285_v37  ;;  %v10529_v44 = vsub.f32 %v7364_v55, %v7425_v51  ;;  %v1197_v7 = vsub.f32 %v7510_v20, %v7562_v6 }
  0xbf   :  { %v1067_v52 = vsel %vm10344_vm9, %v7629_v56, 0  ;;  %5720 = vmatpush1.msk.msra.mxu1 %vm10344_vm9, %v7629_v56  ;;  %5734 = vmatpush1.msk.msra.mxu0 %vm10344_vm9, %v7629_v56  ;;  %vm507_vm10 = vmor %vm309_vm12, %vm444_vm4  ;;  %vm10528_vm4 = vcmp.eq.s32.totalorder %v7018_v3, %v7203_v17  ;;  %v7683_v37 = vand.u32 4294901760, %v7621_v54  ;;  %vm10535_vm9 = vcmp.eq.s32.totalorder %v7094_v41, %v7484_v18 }
  0xc0   :  { %v7654_v15 = vsub.f32 %v1067_v52, %v1067_v52  ;;  %1177 = vmatmul.mubr.f32.vlgmr.msra.gmra.mrb[0].mxu1 %v7495_v24  ;;  %6155 = vmatprep.subr.bf16.mxu1 %v7262_v36  ;;  %vm696_vm14 = vmor %vm498_vm1, %vm10528_vm4  ;;  %v7668_v32 = vand.u32 4294901760, %v10529_v44  ;;  %v10347_v36 = vand.u32 4294901760, %v7615_v46  ;;  %vm10532_vm1 = vcmp.eq.s32.totalorder %v7018_v3, %v7484_v18 }
  0xc1   :  { %1612 = vmatmul.mubr.f32.vlgmr.msra.gmra.mrb[0].mxu0 %v7355_v16  ;;  %6191 = vmatprep.subr.bf16.mxu0 %v7218_v21  ;;  %vm705_vm0 = vmor %vm507_vm10, %vm642_vm15  ;;  %v1208_v21 = vsub.f32 %v7513_v9, %v7565_v0  ;;  %10531 = vst [vmem:[#allocation45_spill] sm:$0xff] %v7683_v37  ;;  %vm437_vm15 = vcmp.eq.s32.totalorder %v7018_v3, %v7626_v49  ;;  %v10536_v52 = vmov 0 }
  0xc2   :  { %10530 = vst [vmem:[#allocation44_spill] sm:$0xff] %v7668_v32  ;;  %6157 = vmatpush1.bf16.msra.mxu1 %v7327_v45  ;;  %6193 = vmatpush1.bf16.msra.mxu0 %v7291_v2  ;;  %vm7688_vm4 = vmor %vm696_vm14, %vm10532_vm1  ;;  %v236_v2 = vrot.slane %v7009_v58, %v7129_v47  ;;  %vm302_vm1 = vcmp.eq.s32.totalorder %v7018_v3, %v7637_v50 }
  0xc3   :  { %6159 = vmatprep.subr.bf16.mxu1 %v7405_v19  ;;  %6195 = vmatprep.subr.bf16.mxu0 %v7358_v42  ;;  %vm867_vm14 = vmor %vm705_vm0, %vm10535_vm9  ;;  %v5647_v45 = vsel %vm7688_vm4, 1.0, %v10506_v38  ;;  %vm446_vm10 = vcmp.eq.s32.totalorder %v7094_v41, %v7626_v49  ;;  %v7711_v58 = vrot.slane %v371_v14, %v7062_v29  ;;  %v7727_v14 = vand.u32 4294901760, %v1197_v7 }
  0xc4   :  { %1182 = vmatprep.mubr.f32.mxu1 %v10506_v38  ;;  %1617 = vmatprep.mubr.f32.mxu0 %v10506_v38  ;;  %v5656_v19 = vsel %vm867_vm14, 1.0, %v10506_v38  ;;  %vm7719_vm9 = vmpackc.low %vm867_vm14, %vm7688_vm4  ;;  %v7723_v44 = vsub.f32 %v5647_v45, %v5647_v45  ;;  %v1302_v42 = vsub.f32 %v7615_v46, %v10347_v36  ;;  %vm311_vm0 = vcmp.eq.s32.totalorder %v7094_v41, %v7637_v50 }
  0xc5   :  { %v10537_v52 = vsel %vm7719_vm9, 4294967295, %v10536_v52  ;;  %1188 = vmatmul.mubr.f32.gmra.mrb[2].mxu1 %v7668_v32  ;;  %1621 = vmatmul.mubr.f32.gmra.mrb[2].mxu0 %v7425_v51  ;;  %10540 = vst [vmem:[#allocation48_spill] sm:$0xff] %v7727_v14  ;;  %v7732_v16 = vsub.f32 %v5656_v19, %v5656_v19  ;;  %vm500_vm4 = vmor %vm302_vm1, %vm437_vm15  ;;  %vm632_vm12 = vcmp.eq.s32.totalorder %v7018_v3, %v7186_v4 }
  0xc6   :  { %10538 = vst [vmem:[#allocation46_spill] sm:$0xff] %v10537_v52  ;;  %10539 = vst [vmem:[#allocation47_spill] sm:$0xff] %v7723_v44  ;;  %6161 = vmatpush1.bf16.msra.mxu1 %v7479_v53  ;;  %6197 = vmatpush1.bf16.msra.mxu0 %v7436_v62  ;;  %v7757_v22 = vrot.slane %v7079_v34, %v7032_v13  ;;  %v2046_v53 = vand.u32 4294901760, %v7723_v44  ;;  %v7761_v62 = vrot.slane %v236_v2, %v7068_v30  ;;  %v10615_v52 = vmov 0 }
  0xc7   :  { %10541 = vst [vmem:[#allocation49_spill] sm:$0xff] %v7732_v16  ;;  %vm7747_vm14 = vmor %vm311_vm0, %vm446_vm10  ;;  %6163 = vmatprep.subr.bf16.mxu1 %v7576_v43  ;;  %6199 = vmatprep.subr.bf16.mxu0 %v7523_v11  ;;  %v1219_v45 = vsub.f32 %v7621_v54, %v7683_v37  ;;  %v2058_v19 = vand.u32 4294901760, %v7732_v16  ;;  %v379_v2 = vrot.slane %v7074_v33, %v7062_v29  ;;  %v7777_v11 = vand.u32 4294901760, %v1208_v21 }
  0xc8   :  { %vm698_vm15 = vmor %vm500_vm4, %vm635_vm5  ;;  %1193 = vmatprep.mubr.f32.mxu1 %v10506_v38  ;;  %1626 = vmatprep.mubr.f32.mxu0 %v10506_v38  ;;  %v10545_v43 = vand.u32 4294901760, %v7654_v15  ;;  %vm10546_vm5 = vcmp.eq.s32.totalorder %v7094_v41, %v7254_v28  ;;  %v2047_v13 = vsub.f32 %v7723_v44, %v2046_v53  ;;  %v1303_v51 = vand.u32 4294901760, %v1302_v42 }
  0xc9   :  { %10544 = vst [vmem:[#allocation50_spill] sm:$0xff] %v7777_v11  ;;  %vm707_vm10 = vmor %vm7747_vm14, %vm10546_vm5  ;;  %1199 = vmatmul.mubr.f32.gmra.mrb[4].mxu1 %v7727_v14  ;;  %1630 = vmatmul.mubr.f32.gmra.mrb[4].mxu0 %v7562_v6  ;;  %vm10547_vm1 = vcmp.eq.s32.totalorder %v7018_v3, %v7488_v60  ;;  %vm434_vm4 = vcmp.eq.s32.totalorder %v7018_v3, %v7711_v58 }
  0xca   :  { %v1308_v36 = vsub.f32 %v7654_v15, %v10545_v43  ;;  %vm860_vm0 = vmor %vm698_vm15, %vm10547_vm1  ;;  %v2059_v21 = vsub.f32 %v7732_v16, %v2058_v19  ;;  %v7796_v43 = vpack.c.bf16 %v2058_v19, %v2046_v53  ;;  %v244_v7 = vrot.slane %v7011_v59, %v7068_v30  ;;  %6165 = vmatpush1.bf16.msra.mxu1 %v7658_v27 }
  0xcb   :  { %6201 = vmatpush1.bf16.msra.mxu0 %v7611_v48  ;;  %vm10549_vm14 = vcmp.eq.s32.totalorder %v7094_v41, %v7488_v60  ;;  %v5649_v42 = vsel %vm860_vm0, 1.0, %v10506_v38  ;;  %vm443_vm15 = vcmp.eq.s32.totalorder %v7094_v41, %v7711_v58  ;;  %v2048_v6 = vand.u32 4294901760, %v2047_v13  ;;  %1304 = vmatprep.subr.mxu1 %v1303_v51 }
  0xcc   :  { %10548 = vst [vmem:[#allocation51_spill] sm:$0xff] %v7796_v43  ;;  %vm869_vm5 = vmor %vm707_vm10, %vm10549_vm14  ;;  %v10550_v53 = vand.u32 4294901760, %v7615_v46  ;;  %v10551_v27 = vmov 0  ;;  %v7815_v48 = vsub.f32 %v5649_v42, %v5649_v42  ;;  %vm299_vm10 = vcmp.eq.s32.totalorder %v7018_v3, %v7761_v62  ;;  %1204 = vmatprep.mubr.f32.mxu1 %v10506_v38  ;;  %1635 = vmatprep.mubr.f32.mxu0 %v10506_v38 }
  0xcd   :  { %v5658_v19 = vsel %vm869_vm5, 1.0, %v10506_v38  ;;  %vm7811_vm1 = vmpackc.low %vm869_vm5, %vm860_vm0  ;;  %v2060_v43 = vand.u32 4294901760, %v2059_v21  ;;  %v7820_v44 = vrot.slane %v379_v2, %v7062_v29  ;;  %v1309_v51 = vand.u32 4294901760, %v1308_v36  ;;  %1210 = vmatmul.mubr.f32.gmra.mrb[6].mxu1 %v7777_v11  ;;  %1639 = vmatmul.mubr.f32.gmra.mrb[6].mxu0 %v7565_v0 }
  0xce   :  { %1705 = vmatprep.subr.mxu0 %v10550_v53  ;;  %v10552_v27 = vsel %vm7811_vm1, 4294967295, %v10551_v27  ;;  %10554 = vst [vmem:[#allocation53_spill] sm:$0xff] %v7815_v48  ;;  %v7824_v13 = vsub.f32 %v5658_v19, %v5658_v19  ;;  %vm308_vm0 = vcmp.eq.s32.totalorder %v7094_v41, %v7761_v62  ;;  %vm497_vm14 = vmor %vm299_vm10, %vm434_vm4  ;;  %v7833_v2 = vand.u32 4294901760, %v1219_v45  ;;  %1215 = vmatprep.mubr.f32.mxu1 %v10506_v38 }
  0xcf   :  { %10553 = vst [vmem:[#allocation52_spill] sm:$0xff] %v10552_v27  ;;  %vm506_vm5 = vmor %vm308_vm0, %vm443_vm15  ;;  %vm794_vm3 = vcmp.eq.s32.totalorder %v7018_v3, %v7757_v22  ;;  %v7840_v36 = vpack.c.bf16 %v2060_v43, %v2048_v6  ;;  %v2863_v21 = vand.u32 4294901760, %v7815_v48  ;;  %v7844_v42 = vrot.slane %v244_v7, %v7068_v30  ;;  %1310 = vmatpush1.msra.mxu1 %v1309_v51 }
  0xd0   :  { %10555 = vst [vmem:[#allocation54_spill] sm:$0xff] %v7824_v13  ;;  %10556 = vst [vmem:[#allocation55_spill] sm:$0xff] %v7833_v2  ;;  %v10557_v53 = vand.u32 4294901760, %v7654_v15  ;;  %vm803_vm15 = vcmp.eq.s32.totalorder %v7094_v41, %v7757_v22  ;;  %v2875_v45 = vand.u32 4294901760, %v7824_v13  ;;  %v10558_v43 = vpack.c.bf16 %v7171_v63, %v7162_v61  ;;  %1644 = vmatprep.mubr.f32.mxu0 %v10506_v38 }
  0xd1   :  { %vm695_vm4 = vmor %vm497_vm14, %vm632_vm12  ;;  %vm10559_vm10 = vcmp.eq.s32.totalorder %v7094_v41, %v7186_v4  ;;  %v7867_v7 = vrot.slane %v7079_v34, %v7129_v47  ;;  %v2864_v19 = vsub.f32 %v7815_v48, %v2863_v21  ;;  %1221 = vmatmul.mubr.f32.gmra.mrb[8].mxu1 %v7833_v2  ;;  %1648 = vmatmul.mubr.f32.gmra.mrb[8].mxu0 %v7683_v37  ;;  %v10572_v2 = vld [vmem:[#allocation22_spill] sm:$0xff]  ;;  %v10573_v48 = vld [vmem:[#allocation21_spill] sm:$0xff] }
  0xd2   :  { %1709 = vmatpush1.msra.mxu0 %v10557_v53  ;;  %6167 = vmatprep.subr.bf16.mxu1 %v10558_v43  ;;  %vm704_vm12 = vmor %vm506_vm5, %vm10559_vm10  ;;  %v2876_v57 = vsub.f32 %v7824_v13, %v2875_v45  ;;  %v7878_v61 = vpack.c.bf16 %v2875_v45, %v2863_v21  ;;  %v10561_v21 = vmov 0  ;;  %vm310_vm10 = vcmp.eq.s32.totalorder %v7094_v41, %v7844_v42 }
  0xd3   :  { %6203 = vmatprep.subr.msk.bf16.mxu0 %vm7158_vm8, %v10501_v5  ;;  %vm857_vm0 = vmor %vm695_vm4, %vm794_vm3  ;;  %vm436_vm8 = vcmp.eq.s32.totalorder %v7018_v3, %v7820_v44  ;;  %vm445_vm3 = vcmp.eq.s32.totalorder %v7094_v41, %v7820_v44  ;;  %v2865_v63 = vand.u32 4294901760, %v2864_v19  ;;  %1361 = vmatprep.mubr.f32.mxu1 %v10506_v38  ;;  %vm796_vm5 = vcmp.eq.s32.totalorder %v7018_v3, %v7867_v7 }
  0xd4   :  { %10560 = vst [vmem:[#allocation56_spill] sm:$0xff] %v7878_v61  ;;  %vm866_vm14 = vmor %vm704_vm12, %vm803_vm15  ;;  %v5646_v34 = vsel %vm857_vm0, 1.0, %v10506_v38  ;;  %1760 = vmatprep.mubr.f32.mxu0 %v10506_v38  ;;  %vm301_vm15 = vcmp.eq.s32.totalorder %v7018_v3, %v7844_v42  ;;  %v2877_v45 = vand.u32 4294901760, %v2876_v57  ;;  %v10574_v13 = vpack.c.bf16 %v10572_v2, %v10573_v48  ;;  %v10578_v48 = vld [vmem:[#allocation14_spill] sm:$0xff]  ;;  %v10579_v2 = vld [vmem:[#allocation25_spill] sm:$0xff] }
  0xd5   :  { %v5655_v51 = vsel %vm866_vm14, 1.0, %v10506_v38  ;;  %vm7893_vm4 = vmpackc.low %vm866_vm14, %vm857_vm0  ;;  %v7897_v53 = vsub.f32 %v5646_v34, %v5646_v34  ;;  %vm643_vm0 = vcmp.eq.s32.totalorder %v7094_v41, %v7206_v12  ;;  %v10566_v34 = vld [vmem:[#allocation18_spill] sm:$0xff] }
  0xd6   :  { %v10562_v21 = vsel %vm7893_vm4, 4294967295, %v10561_v21  ;;  %v7901_v43 = vsub.f32 %v5655_v51, %v5655_v51  ;;  %vm499_vm12 = vmor %vm301_vm15, %vm436_vm8  ;;  %v7912_v19 = vpack.c.bf16 %v2877_v45, %v2865_v63  ;;  %1363 = vmatmul.mubr.f32.vlgmr.msra.gmra.mrb[0].mxu1 %v10566_v34  ;;  %1762 = vmatmul.mubr.f32.vlgmr.msra.gmra.mrb[0].mxu0 %v10566_v34  ;;  %vm10567_vm4 = vcmp.eq.s32.totalorder %v7018_v3, %v7206_v12  ;;  %v10568_v63 = vld [vmem:[#allocation17_spill] sm:$0xff]  ;;  %v10569_v45 = vld [vmem:[#allocation16_spill] sm:$0xff] }
  0xd7   :  { %10563 = vst [vmem:[#allocation57_spill] sm:$0xff] %v10562_v21  ;;  %10564 = vst [vmem:[#allocation58_spill] sm:$0xff] %v7897_v53  ;;  %v2052_v57 = vand.u32 4294901760, %v7897_v53  ;;  %vm805_vm8 = vcmp.eq.s32.totalorder %v7094_v41, %v7867_v7  ;;  %v10570_v37 = vpack.c.bf16 %v10568_v63, %v10569_v45  ;;  %6205 = vmatpush1.bf16.msk.msra.mxu0 %vm7229_vm11, %v10501_v5  ;;  %1368 = vmatprep.mubr.f32.mxu1 %v10506_v38 }
  0xd8   :  { %10565 = vst [vmem:[#allocation59_spill] sm:$0xff] %v7901_v43  ;;  %vm508_vm14 = vmor %vm310_vm10, %vm445_vm3  ;;  %v2064_v51 = vand.u32 4294901760, %v7901_v43  ;;  %6207 = vmatprep.subr.msk.bf16.mxu0 %vm7298_vm13, %v10501_v5  ;;  %1767 = vmatprep.mubr.f32.mxu0 %v10506_v38  ;;  %vm462_vm13 = vcmp.eq.s32.totalorder %v10578_v48, %v7537_v26 }
  0xd9   :  { %vm697_vm1 = vmor %vm499_vm12, %vm10567_vm4  ;;  %6169 = vmatpush1.bf16.msra.mxu1 %v10570_v37  ;;  %v2053_v61 = vsub.f32 %v7897_v53, %v2052_v57  ;;  %v10576_v37 = vld [vmem:[#allocation13_spill] sm:$0xff]  ;;  %vm327_vm12 = vcmp.eq.s32.totalorder %v10578_v48, %v7570_v8 }
  0xda   :  { %vm706_vm3 = vmor %vm508_vm14, %vm643_vm0  ;;  %6171 = vmatprep.subr.bf16.mxu1 %v10574_v13  ;;  %vm453_vm15 = vcmp.eq.s32.totalorder %v10576_v37, %v7537_v26  ;;  %v2065_v0 = vsub.f32 %v7901_v43, %v2064_v51  ;;  %v7944_v63 = vpack.c.bf16 %v2064_v51, %v2052_v57  ;;  %1370 = vmatmul.mubr.f32.gmra.mrb[2].mxu1 %v10579_v2  ;;  %v10580_v51 = vmov 0  ;;  %v10584_v53 = vld [vmem:[#allocation29_spill] sm:$0xff] }
  0xdb   :  { %vm859_vm4 = vmor %vm697_vm1, %vm796_vm5  ;;  %vm651_vm1 = vcmp.eq.s32.totalorder %v10576_v37, %v7203_v17  ;;  %v2054_v13 = vand.u32 4294901760, %v2053_v61  ;;  %1769 = vmatmul.mubr.f32.gmra.mrb[2].mxu0 %v10579_v2  ;;  %vm318_vm10 = vcmp.eq.s32.totalorder %v10576_v37, %v7570_v8  ;;  %vm660_vm14 = vcmp.eq.s32.totalorder %v10578_v48, %v7203_v17  ;;  %1375 = vmatprep.mubr.f32.mxu1 %v10506_v38 }
  0xdc   :  { %10577 = vst [vmem:[#allocation18_spill] sm:$0xff] %v7944_v63  ;;  %vm868_vm11 = vmor %vm706_vm3, %vm805_vm8  ;;  %v5648_v16 = vsel %vm859_vm4, 1.0, %v10506_v38  ;;  %v2066_v6 = vand.u32 4294901760, %v2065_v0  ;;  %v10583_v63 = vld [vmem:[#allocation30_spill] sm:$0xff]  ;;  %6209 = vmatpush1.bf16.msk.msra.mxu0 %vm7370_vm2, %v10501_v5  ;;  %vm813_vm8 = vcmp.eq.s32.totalorder %v10576_v37, %v7484_v18  ;;  %1774 = vmatprep.mubr.f32.mxu0 %v10506_v38 }
  0xdd   :  { %v5657_v57 = vsel %vm868_vm11, 1.0, %v10506_v38  ;;  %vm7959_vm5 = vmpackc.low %vm868_vm11, %vm859_vm4  ;;  %v7963_v45 = vsub.f32 %v5648_v16, %v5648_v16  ;;  %v10585_v43 = vpack.c.bf16 %v10583_v63, %v10584_v53  ;;  %v10587_v53 = vpack.c.bf16 %v7462_v23, %v7455_v31  ;;  %6211 = vmatprep.subr.msk.bf16.mxu0 %vm7451_vm7, %v10501_v5 }
  0xde   :  { %v10581_v51 = vsel %vm7959_vm5, 4294967295, %v10580_v51  ;;  %v7973_v11 = vsub.f32 %v5657_v57, %v5657_v57  ;;  %vm516_vm0 = vmor %vm318_vm10, %vm453_vm15  ;;  %v7993_v0 = vpack.c.bf16 %v2066_v6, %v2054_v13  ;;  %vm822_vm7 = vcmp.eq.s32.totalorder %v10578_v48, %v7484_v18  ;;  %1377 = vmatmul.mubr.f32.gmra.mrb[4].mxu1 %v7438_v10 }
  0xdf   :  { %10582 = vst [vmem:[#allocation17_spill] sm:$0xff] %v10581_v51  ;;  %6173 = vmatpush1.bf16.msra.mxu1 %v10585_v43  ;;  %vm525_vm2 = vmor %vm327_vm12, %vm462_vm13  ;;  %v2869_v63 = vand.u32 4294901760, %v7963_v45  ;;  %1776 = vmatmul.mubr.f32.gmra.mrb[4].mxu0 %v7438_v10  ;;  %v10589_v16 = vpack.c.bf16 %v7551_v35, %v7544_v25  ;;  %vm455_vm11 = vcmp.eq.s32.totalorder %v10576_v37, %v7626_v49  ;;  %vm10593_vm13 = vcmask 1043456  }
  0xe0   :  { %6175 = vmatprep.subr.bf16.mxu1 %v10587_v53  ;;  %vm714_vm3 = vmor %vm516_vm0, %vm651_vm1  ;;  %v2881_v31 = vand.u32 4294901760, %v7973_v11  ;;  %6213 = vmatpush1.bf16.msk.msra.mxu0 %vm7540_vm6, %v10501_v5  ;;  %v10592_v53 = vld [vmem:[#allocation42_spill] sm:$0xff]  ;;  %vm464_vm1 = vcmp.eq.s32.totalorder %v10578_v48, %v7626_v49  ;;  %vm653_vm10 = vcmp.eq.s32.totalorder %v10576_v37, %v7254_v28  ;;  %v10594_v43 = vmov 0 }
  0xe1   :  { %vm723_vm4 = vmor %vm525_vm2, %vm660_vm14  ;;  %v2870_v6 = vsub.f32 %v7963_v45, %v2869_v63  ;;  %5747 = vmatprep.subr.msk.mxu0 %vm10593_vm13, %v10592_v53  ;;  %1382 = vmatprep.mubr.f32.mxu1 %v10506_v38  ;;  %vm320_vm0 = vcmp.eq.s32.totalorder %v10576_v37, %v7637_v50  ;;  %vm329_vm14 = vcmp.eq.s32.totalorder %v10578_v48, %v7637_v50 }
  0xe2   :  { %vm876_vm15 = vmor %vm714_vm3, %vm813_vm8  ;;  %v2882_v57 = vsub.f32 %v7973_v11, %v2881_v31  ;;  %v8024_v61 = vpack.c.bf16 %v2881_v31, %v2869_v63  ;;  %1781 = vmatprep.mubr.f32.mxu0 %v10506_v38  ;;  %vm662_vm8 = vcmp.eq.s32.totalorder %v10578_v48, %v7254_v28 }
  0xe3   :  { %6177 = vmatpush1.bf16.msra.mxu1 %v10589_v16  ;;  %vm885_vm6 = vmor %vm723_vm4, %vm822_vm7  ;;  %v5665_v25 = vsel %vm876_vm15, 1.0, %v10506_v38  ;;  %v2871_v35 = vand.u32 4294901760, %v2870_v6  ;;  %v10597_v16 = vld [vmem:[#allocation33_spill] sm:$0xff]  ;;  %vm815_vm4 = vcmp.eq.s32.totalorder %v10576_v37, %v7488_v60 }
  0xe4   :  { %10591 = vst [vmem:[#allocation16_spill] sm:$0xff] %v8024_v61  ;;  %1435 = vmatprep.subr.mxu1 %v7615_v46  ;;  %v5674_v46 = vsel %vm885_vm6, 1.0, %v10506_v38  ;;  %vm8040_vm12 = vmpackc.low %vm885_vm6, %vm876_vm15  ;;  %v8044_v63 = vsub.f32 %v5665_v25, %v5665_v25  ;;  %v2883_v31 = vand.u32 4294901760, %v2882_v57  ;;  %1384 = vmatmul.mubr.f32.gmra.mrb[6].mxu1 %v10597_v16  ;;  %vm10599_vm15 = vnez %v10552_v27 }
  0xe5   :  { %v10595_v43 = vsel %vm8040_vm12, 4294967295, %v10594_v43  ;;  %1783 = vmatmul.mubr.f32.gmra.mrb[6].mxu0 %v10597_v16  ;;  %v8050_v6 = vsub.f32 %v5674_v46, %v5674_v46  ;;  %vm518_vm2 = vmor %vm320_vm0, %vm455_vm11  ;;  %1389 = vmatprep.mubr.f32.mxu1 %v10506_v38 }
  0xe6   :  { %10596 = vst [vmem:[#allocation15_spill] sm:$0xff] %v10595_v43  ;;  %vm10598_vm3 = vmmov %vm10593_vm13  ;;  %v8067_v13 = vpack.c.bf16 %v2883_v31, %v2871_v35  ;;  %v2070_v57 = vand.u32 4294901760, %v8044_v63  ;;  %vm824_vm13 = vcmp.eq.s32.totalorder %v10578_v48, %v7488_v60  ;;  %1788 = vmatprep.mubr.f32.mxu0 %v10506_v38 }
  0xe7   :  { %1438 = vmatpush1.msra.mxu1 %v7654_v15  ;;  %5748 = vmatpush1.msk.msra.mxu0 %vm10598_vm3, %v7629_v56  ;;  %vm527_vm7 = vmor %vm329_vm14, %vm464_vm1  ;;  %v2082_v56 = vand.u32 4294901760, %v8050_v6  ;;  %vm461_vm14 = vcmp.eq.s32.totalorder %v10578_v48, %v7711_v58  ;;  %vm317_vm3 = vcmp.eq.s32.totalorder %v10576_v37, %v7761_v62 }
  0xe8   :  { %6215 = vmatprep.subr.msk.bf16.mxu1 %vm7719_vm9, %v10501_v5  ;;  %6287 = vmatprep.subr.msk.bf16.mxu0 %vm10599_vm15, %v10501_v5  ;;  %vm716_vm11 = vmor %vm518_vm2, %vm653_vm10  ;;  %v2071_v53 = vsub.f32 %v8044_v63, %v2070_v57  ;;  %vm452_vm10 = vcmp.eq.s32.totalorder %v10576_v37, %v7711_v58  ;;  %vm650_vm2 = vcmp.eq.s32.totalorder %v10576_v37, %v7186_v4 }
  0xe9   :  { %vm725_vm6 = vmor %vm527_vm7, %vm662_vm8  ;;  %1391 = vmatmul.mubr.f32.gmra.mrb[8].mxu1 %v7578_v1  ;;  %1790 = vmatmul.mubr.f32.gmra.mrb[8].mxu0 %v7578_v1  ;;  %v2083_v25 = vsub.f32 %v8050_v6, %v2082_v56  ;;  %v8098_v35 = vpack.c.bf16 %v2082_v56, %v2070_v57  ;;  %v10601_v56 = vmov 0  ;;  %vm326_vm7 = vcmp.eq.s32.totalorder %v10578_v48, %v7761_v62 }
  0xea   :  { %vm878_vm1 = vmor %vm716_vm11, %vm815_vm4  ;;  %1489 = vmatprep.mubr.f32.mxu1 %v10506_v38  ;;  %1874 = vmatprep.mubr.f32.mxu0 %v10506_v38  ;;  %v2072_v31 = vand.u32 4294901760, %v2071_v53  ;;  %vm659_vm11 = vcmp.eq.s32.totalorder %v10578_v48, %v7186_v4  ;;  %v10604_v53 = vld [vmem:[#allocation24_spill] sm:$0xff] }
  0xeb   :  { %10600 = vst [vmem:[#allocation22_spill] sm:$0xff] %v8098_v35  ;;  %vm887_vm0 = vmor %vm725_vm6, %vm824_vm13  ;;  %v5667_v46 = vsel %vm878_vm1, 1.0, %v10506_v38  ;;  %v2084_v15 = vand.u32 4294901760, %v2083_v25  ;;  %vm812_vm6 = vcmp.eq.s32.totalorder %v10576_v37, %v7757_v22 }
  0xec   :  { %v5676_v57 = vsel %vm887_vm0, 1.0, %v10506_v38  ;;  %vm8111_vm8 = vmpackc.low %vm887_vm0, %vm878_vm1  ;;  %v8115_v23 = vsub.f32 %v5667_v46, %v5667_v46  ;;  %vm10605_vm1 = vnez %v10562_v21  ;;  %vm821_vm0 = vcmp.eq.s32.totalorder %v10578_v48, %v7757_v22 }
  0xed   :  { %v10602_v56 = vsel %vm8111_vm8, 4294967295, %v10601_v56  ;;  %v8119_v61 = vsub.f32 %v5676_v57, %v5676_v57  ;;  %vm515_vm4 = vmor %vm317_vm3, %vm452_vm10  ;;  %1492 = vmatmul.mubr.f32.vlgmr.msra.gmra.mrb[0].mxu1 %v10604_v53  ;;  %1876 = vmatmul.mubr.f32.vlgmr.msra.gmra.mrb[0].mxu0 %v10566_v34  ;;  %v8132_v25 = vpack.c.bf16 %v2084_v15, %v2072_v31  ;;  %vm454_vm3 = vcmp.eq.s32.totalorder %v10576_v37, %v7820_v44 }
  0xee   :  { %10603 = vst [vmem:[#allocation21_spill] sm:$0xff] %v10602_v56  ;;  %vm524_vm13 = vmor %vm326_vm7, %vm461_vm14  ;;  %v2887_v46 = vand.u32 4294901760, %v8115_v23  ;;  %6217 = vmatpush1.bf16.msk.msra.mxu1 %vm10605_vm1, %v10501_v5  ;;  %6289 = vmatpush1.bf16.msk.msra.mxu0 %vm7959_vm5, %v10501_v5 }
  0xef   :  { %vm713_vm10 = vmor %vm515_vm4, %vm650_vm2  ;;  %v2899_v15 = vand.u32 4294901760, %v8119_v61  ;;  %6219 = vmatprep.subr.msk.bf16.mxu1 %vm8040_vm12, %v10501_v5  ;;  %6291 = vmatprep.subr.msk.bf16.mxu0 %vm8111_vm8, %v10501_v5  ;;  %vm319_vm4 = vcmp.eq.s32.totalorder %v10576_v37, %v7844_v42  ;;  %vm823_vm8 = vcmp.eq.s32.totalorder %v10578_v48, %v7867_v7 }
  0xf0   :  { %vm722_vm14 = vmor %vm524_vm13, %vm659_vm11  ;;  %v2888_v57 = vsub.f32 %v8115_v23, %v2887_v46  ;;  %1497 = vmatprep.mubr.f32.mxu1 %v10506_v38  ;;  %1881 = vmatprep.mubr.f32.mxu0 %v10506_v38  ;;  %vm463_vm11 = vcmp.eq.s32.totalorder %v10578_v48, %v7820_v44 }
  0xf1   :  { %vm875_vm2 = vmor %vm713_vm10, %vm812_vm6  ;;  %v2900_v31 = vsub.f32 %v8119_v61, %v2899_v15  ;;  %v8167_v35 = vpack.c.bf16 %v2899_v15, %v2887_v46  ;;  %1500 = vmatmul.mubr.f32.gmra.mrb[2].mxu1 %v7364_v55  ;;  %1883 = vmatmul.mubr.f32.gmra.mrb[2].mxu0 %v10579_v2  ;;  %v10607_v15 = vmov 0  ;;  %vm652_vm6 = vcmp.eq.s32.totalorder %v10576_v37, %v7206_v12 }
  0xf2   :  { %vm884_vm7 = vmor %vm722_vm14, %vm821_vm0  ;;  %v5664_v56 = vsel %vm875_vm2, 1.0, %v10506_v38  ;;  %v2889_v51 = vand.u32 4294901760, %v2888_v57  ;;  %1505 = vmatprep.mubr.f32.mxu1 %v10506_v38  ;;  %1888 = vmatprep.mubr.f32.mxu0 %v10506_v38  ;;  %vm328_vm10 = vcmp.eq.s32.totalorder %v10578_v48, %v7844_v42  ;;  %vm661_vm14 = vcmp.eq.s32.totalorder %v10578_v48, %v7206_v12 }
  0xf3   :  { %10606 = vst [vmem:[#allocation20_spill] sm:$0xff] %v8167_v35  ;;  %v5673_v46 = vsel %vm884_vm7, 1.0, %v10506_v38  ;;  %vm8180_vm13 = vmpackc.low %vm884_vm7, %vm875_vm2  ;;  %v8184_v35 = vsub.f32 %v5664_v56, %v5664_v56  ;;  %v2901_v55 = vand.u32 4294901760, %v2900_v31  ;;  %vm814_vm7 = vcmp.eq.s32.totalorder %v10576_v37, %v7867_v7 }
  0xf4   :  { %v10608_v15 = vsel %vm8180_vm13, 4294967295, %v10607_v15  ;;  %6221 = vmatpush1.bf16.msk.msra.mxu1 %vm8180_vm13, %v10501_v5  ;;  %v8193_v57 = vsub.f32 %v5673_v46, %v5673_v46  ;;  %vm517_vm0 = vmor %vm319_vm4, %vm454_vm3 }
  0xf5   :  { %10609 = vst [vmem:[#allocation13_spill] sm:$0xff] %v10608_v15  ;;  %10610 = vst [vmem:[#allocation14_spill] sm:$0xff] %v8184_v35  ;;  %v8204_v56 = vpack.c.bf16 %v2901_v55, %v2889_v51  ;;  %v2076_v31 = vand.u32 4294901760, %v8184_v35  ;;  %1508 = vmatmul.mubr.f32.gmra.mrb[4].mxu1 %v7510_v20  ;;  %1890 = vmatmul.mubr.f32.gmra.mrb[4].mxu0 %v7438_v10  ;;  %v10612_v51 = vld [vmem:[#allocation19_spill] sm:$0xff] }
  0xf6   :  { %10611 = vst [vmem:[#allocation30_spill] sm:$0xff] %v8193_v57  ;;  %vm526_vm2 = vmor %vm328_vm10, %vm463_vm11  ;;  %v2088_v46 = vand.u32 4294901760, %v8193_v57  ;;  %1513 = vmatprep.mubr.f32.mxu1 %v10506_v38  ;;  %1895 = vmatprep.mubr.f32.mxu0 %v10506_v38  ;;  %vm471_vm11 = vcmp.eq.s32.totalorder %v10612_v51, %v7537_v26  ;;  %vm336_vm10 = vcmp.eq.s32.totalorder %v10612_v51, %v7570_v8  ;;  %v10614_v15 = vld [vmem:[#allocation23_spill] sm:$0xff] }
  0xf7   :  { %vm715_vm13 = vmor %vm517_vm0, %vm652_vm6  ;;  %v2077_v55 = vsub.f32 %v8184_v35, %v2076_v31  ;;  %vm480_vm0 = vcmp.eq.s32.totalorder %v10614_v15, %v7537_v26 }
  0xf8   :  { %vm724_vm3 = vmor %vm526_vm2, %vm661_vm14  ;;  %v2089_v20 = vsub.f32 %v8193_v57, %v2088_v46  ;;  %v8220_v43 = vpack.c.bf16 %v2088_v46, %v2076_v31  ;;  %vm345_vm14 = vcmp.eq.s32.totalorder %v10614_v15, %v7570_v8  ;;  %v10639_v57 = vmov 33  }
  0xf9   :  { %vm877_vm4 = vmor %vm715_vm13, %vm814_vm7  ;;  %v2078_v53 = vand.u32 4294901760, %v2077_v55  ;;  %1516 = vmatmul.mubr.f32.gmra.mrb[6].mxu1 %v7513_v9  ;;  %1897 = vmatmul.mubr.f32.gmra.mrb[6].mxu0 %v10597_v16  ;;  %vm678_vm7 = vcmp.eq.s32.totalorder %v10614_v15, %v7203_v17 }
  0xfa   :  { %10613 = vst [vmem:[#allocation29_spill] sm:$0xff] %v8220_v43  ;;  %vm886_vm6 = vmor %vm724_vm3, %vm823_vm8  ;;  %v5666_v21 = vsel %vm877_vm4, 1.0, %v10506_v38  ;;  %vm669_vm8 = vcmp.eq.s32.totalorder %v10612_v51, %v7203_v17  ;;  %v2090_v31 = vand.u32 4294901760, %v2089_v20  ;;  %1521 = vmatprep.mubr.f32.mxu1 %v10506_v38  ;;  %1902 = vmatprep.mubr.f32.mxu0 %v10506_v38 }
  0xfb   :  { %v5675_v27 = vsel %vm886_vm6, 1.0, %v10506_v38  ;;  %vm8228_vm13 = vmpackc.low %vm886_vm6, %vm877_vm4  ;;  %v8232_v10 = vsub.f32 %v5666_v21, %v5666_v21  ;;  %vm831_vm4 = vcmp.eq.s32.totalorder %v10612_v51, %v7484_v18  ;;  %vm840_vm6 = vcmp.eq.s32.totalorder %v10614_v15, %v7484_v18 }
  0xfc   :  { %v10616_v52 = vsel %vm8228_vm13, 4294967295, %v10615_v52  ;;  %6293 = vmatpush1.bf16.msk.msra.mxu0 %vm8228_vm13, %v10501_v5  ;;  %v8241_v46 = vsub.f32 %v5675_v27, %v5675_v27  ;;  %vm534_vm2 = vmor %vm336_vm10, %vm471_vm11  ;;  %v8257_v20 = vpack.c.bf16 %v2090_v31, %v2078_v53 }
  0xfd   :  { %10617 = vst [vmem:[#allocation28_spill] sm:$0xff] %v10616_v52  ;;  %10618 = vst [vmem:[#allocation34_spill] sm:$0xff] %v8232_v10  ;;  %v2893_v27 = vand.u32 4294901760, %v8232_v10  ;;  %1524 = vmatmul.mubr.f32.gmra.mrb[8].mxu1 %v7621_v54  ;;  %1904 = vmatmul.mubr.f32.gmra.mrb[8].mxu0 %v7578_v1  ;;  %v10621_v52 = vmov 0 }
  0xfe   :  { %10619 = vst [vmem:[#allocation38_spill] sm:$0xff] %v8241_v46  ;;  %vm543_vm3 = vmor %vm345_vm14, %vm480_vm0  ;;  %v2905_v21 = vand.u32 4294901760, %v8241_v46  ;;  %vm473_vm14 = vcmp.eq.s32.totalorder %v10612_v51, %v7626_v49  ;;  %1988 = vmatprep.mubr.f32.mxu1 %v10506_v38  ;;  %2805 = vmatprep.mubr.f32.mxu0 %v10506_v38 }
  0xff   :  { %vm732_vm11 = vmor %vm534_vm2, %vm669_vm8  ;;  %v2894_v53 = vsub.f32 %v8232_v10, %v2893_v27  ;;  %vm338_vm2 = vcmp.eq.s32.totalorder %v10612_v51, %v7637_v50  ;;  %v10627_v10 = vmov 0 }
 0x100   :  { %vm741_vm10 = vmor %vm543_vm3, %vm678_vm7  ;;  %v2906_v31 = vsub.f32 %v8241_v46, %v2905_v21  ;;  %v8276_v43 = vpack.c.bf16 %v2905_v21, %v2893_v27  ;;  %vm482_vm7 = vcmp.eq.s32.totalorder %v10614_v15, %v7626_v49 }
 0x101   :  { %vm894_vm0 = vmor %vm732_vm11, %vm831_vm4  ;;  %v2895_v54 = vand.u32 4294901760, %v2894_v53  ;;  %vm671_vm4 = vcmp.eq.s32.totalorder %v10612_v51, %v7254_v28  ;;  %vm347_vm11 = vcmp.eq.s32.totalorder %v10614_v15, %v7637_v50 }
 0x102   :  { %10620 = vst [vmem:[#allocation42_spill] sm:$0xff] %v8276_v43  ;;  %vm903_vm8 = vmor %vm741_vm10, %vm840_vm6  ;;  %v5683_v55 = vsel %vm894_vm0, 1.0, %v10506_v38  ;;  %v2907_v27 = vand.u32 4294901760, %v2906_v31  ;;  %vm680_vm10 = vcmp.eq.s32.totalorder %v10614_v15, %v7254_v28 }
 0x103   :  { %v5692_v9 = vsel %vm903_vm8, 1.0, %v10506_v38  ;;  %vm8284_vm3 = vmpackc.low %vm903_vm8, %vm894_vm0  ;;  %v8288_v1 = vsub.f32 %v5683_v55, %v5683_v55  ;;  %vm833_vm8 = vcmp.eq.s32.totalorder %v10612_v51, %v7488_v60 }
 0x104   :  { %v10622_v52 = vsel %vm8284_vm3, 4294967295, %v10621_v52  ;;  %6223 = vmatprep.subr.msk.bf16.mxu1 %vm8284_vm3, %v10501_v5  ;;  %v8295_v21 = vsub.f32 %v5692_v9, %v5692_v9  ;;  %vm536_vm6 = vmor %vm338_vm2, %vm473_vm14  ;;  %v8306_v55 = vpack.c.bf16 %v2907_v27, %v2895_v54  ;;  %vm842_vm3 = vcmp.eq.s32.totalorder %v10614_v15, %v7488_v60 }
 0x105   :  { %10623 = vst [vmem:[#allocation60_spill] sm:$0xff] %v10622_v52  ;;  %10624 = vst [vmem:[#allocation61_spill] sm:$0xff] %v8288_v1  ;;  %v2094_v53 = vand.u32 4294901760, %v8288_v1 }
 0x106   :  { %10625 = vst [vmem:[#allocation62_spill] sm:$0xff] %v8295_v21  ;;  %vm545_vm0 = vmor %vm347_vm11, %vm482_vm7  ;;  %v2106_v9 = vand.u32 4294901760, %v8295_v21  ;;  %vm470_vm7 = vcmp.eq.s32.totalorder %v10612_v51, %v7711_v58  ;;  %vm335_vm11 = vcmp.eq.s32.totalorder %v10612_v51, %v7761_v62 }
 0x107   :  { %vm734_vm13 = vmor %vm536_vm6, %vm671_vm4  ;;  %v2095_v43 = vsub.f32 %v8288_v1, %v2094_v53  ;;  %vm479_vm6 = vcmp.eq.s32.totalorder %v10614_v15, %v7711_v58 }
 0x108   :  { %vm743_vm14 = vmor %vm545_vm0, %vm680_vm10  ;;  %v2107_v54 = vsub.f32 %v8295_v21, %v2106_v9  ;;  %v8318_v27 = vpack.c.bf16 %v2106_v9, %v2094_v53  ;;  %vm344_vm10 = vcmp.eq.s32.totalorder %v10614_v15, %v7761_v62  ;;  %v10633_v21 = vmov 0 }
 0x109   :  { %vm896_vm2 = vmor %vm734_vm13, %vm833_vm8  ;;  %v2096_v31 = vand.u32 4294901760, %v2095_v43  ;;  %vm677_vm8 = vcmp.eq.s32.totalorder %v10614_v15, %v7186_v4 }
 0x10a   :  { %10626 = vst [vmem:[#allocation63_spill] sm:$0xff] %v8318_v27  ;;  %vm905_vm4 = vmor %vm743_vm14, %vm842_vm3  ;;  %v5685_v52 = vsel %vm896_vm2, 1.0, %v10506_v38  ;;  %vm668_vm3 = vcmp.eq.s32.totalorder %v10612_v51, %v7186_v4  ;;  %v2108_v53 = vand.u32 4294901760, %v2107_v54 }
 0x10b   :  { %v5694_v16 = vsel %vm905_vm4, 1.0, %v10506_v38  ;;  %vm8326_vm13 = vmpackc.low %vm905_vm4, %vm896_vm2  ;;  %v8330_v46 = vsub.f32 %v5685_v52, %v5685_v52  ;;  %vm830_vm2 = vcmp.eq.s32.totalorder %v10612_v51, %v7757_v22 }
 0x10c   :  { %v10628_v10 = vsel %vm8326_vm13, 4294967295, %v10627_v10  ;;  %6295 = vmatprep.subr.msk.bf16.mxu0 %vm8326_vm13, %v10501_v5  ;;  %v8337_v9 = vsub.f32 %v5694_v16, %v5694_v16  ;;  %vm533_vm0 = vmor %vm335_vm11, %vm470_vm7  ;;  %v8348_v52 = vpack.c.bf16 %v2108_v53, %v2096_v31  ;;  %vm839_vm13 = vcmp.eq.s32.totalorder %v10614_v15, %v7757_v22 }
 0x10d   :  { %10629 = vst [vmem:[#allocation64_spill] sm:$0xff] %v10628_v10  ;;  %10630 = vst [vmem:[#allocation65_spill] sm:$0xff] %v8330_v46  ;;  %v2911_v43 = vand.u32 4294901760, %v8330_v46  ;;  %v6784_v10 = vld [vmem:[%s10297_s1 + $0x10] sm:$0x3] }
 0x10e   :  { %10631 = vst [vmem:[#allocation66_spill] sm:$0xff] %v8337_v9  ;;  %vm542_vm14 = vmor %vm344_vm10, %vm479_vm6  ;;  %v2923_v16 = vand.u32 4294901760, %v8337_v9 }
 0x10f   :  { %vm731_vm4 = vmor %vm533_vm0, %vm668_vm3  ;;  %v2912_v27 = vsub.f32 %v8330_v46, %v2911_v43  ;;  %vm472_vm3 = vcmp.eq.s32.totalorder %v10612_v51, %v7820_v44  ;;  %vm337_vm0 = vcmp.eq.s32.totalorder %v10612_v51, %v7844_v42 }
 0x110   :  { %vm740_vm7 = vmor %vm542_vm14, %vm677_vm8  ;;  %v2924_v31 = vsub.f32 %v8337_v9, %v2923_v16  ;;  %v8363_v53 = vpack.c.bf16 %v2923_v16, %v2911_v43  ;;  %vm481_vm8 = vcmp.eq.s32.totalorder %v10614_v15, %v7820_v44  ;;  %v10637_v16 = vld [vmem:[#allocation12_spill] sm:$0xff] }
 0x111   :  { %vm893_vm6 = vmor %vm731_vm4, %vm830_vm2  ;;  %v2913_v54 = vand.u32 4294901760, %v2912_v27  ;;  %vm346_vm2 = vcmp.eq.s32.totalorder %v10614_v15, %v7844_v42 }
 0x112   :  { %10632 = vst [vmem:[#allocation67_spill] sm:$0xff] %v8363_v53  ;;  %vm902_vm10 = vmor %vm740_vm7, %vm839_vm13  ;;  %v5682_v1 = vsel %vm893_vm6, 1.0, %v10506_v38  ;;  %vm670_vm13 = vcmp.eq.s32.totalorder %v10612_v51, %v7206_v12  ;;  %v2925_v43 = vand.u32 4294901760, %v2924_v31  ;;  %v10638_v53 = vld [vmem:[#allocation11_spill] sm:$0xff]  ;;  %vm679_vm7 = vcmp.eq.s32.totalorder %v10614_v15, %v7206_v12 }
 0x113   :  { %v5691_v46 = vsel %vm902_vm10, 1.0, %v10506_v38  ;;  %vm8371_vm14 = vmpackc.low %vm902_vm10, %vm893_vm6  ;;  %v8375_v35 = vsub.f32 %v5682_v1, %v5682_v1  ;;  %v589_v9 = vrot.slane %v10638_v53, %v10637_v16  ;;  %vm832_vm10 = vcmp.eq.s32.totalorder %v10612_v51, %v7867_v7 }
 0x114   :  { %v10634_v21 = vsel %vm8371_vm14, 4294967295, %v10633_v21  ;;  %6225 = vmatpush1.bf16.msk.msra.mxu1 %vm8371_vm14, %v10501_v5  ;;  %v8384_v27 = vsub.f32 %v5691_v46, %v5691_v46  ;;  %vm535_vm4 = vmor %vm337_vm0, %vm472_vm3  ;;  %v8395_v1 = vpack.c.bf16 %v2925_v43, %v2913_v54  ;;  %vm841_vm14 = vcmp.eq.s32.totalorder %v10614_v15, %v7867_v7 }
 0x115   :  { %10635 = vst [vmem:[#allocation68_spill] sm:$0xff] %v10634_v21  ;;  %10636 = vst [vmem:[#allocation69_spill] sm:$0xff] %v8375_v35  ;;  %v2100_v31 = vand.u32 4294901760, %v8375_v35  ;;  %vm10640_vm3 = vcmp.gt.s32.totalorder %v6784_v10, 1  ;;  %v8411_v43 = vrot.slane %v589_v9, %v7068_v30  ;;  %v10642_v51 = vmov 0 }
 0x116   :  { %vm544_vm6 = vmor %vm346_vm2, %vm481_vm8  ;;  %v2112_v46 = vand.u32 4294901760, %v8384_v27  ;;  %v8405_v2 = vsel %vm10640_vm3, 32, %v10639_v57 }
 0x117   :  { %vm733_vm11 = vmor %vm535_vm4, %vm670_vm13  ;;  %v2101_v54 = vsub.f32 %v8375_v35, %v2100_v31  ;;  %vm489_vm13 = vcmp.eq.s32.totalorder %v7397_v40, %v7537_v26  ;;  %vm354_vm4 = vcmp.eq.s32.totalorder %v7397_v40, %v7570_v8  ;;  %v256_v8 = vrot.slane %v7011_v59, %v10637_v16 }
 0x118   :  { %vm742_vm0 = vmor %vm544_vm6, %vm679_vm7  ;;  %v2113_v15 = vsub.f32 %v8384_v27, %v2112_v46  ;;  %v8416_v21 = vpack.c.bf16 %v2112_v46, %v2100_v31  ;;  %vm687_vm7 = vcmp.eq.s32.totalorder %v7397_v40, %v7203_v17  ;;  %v252_v46 = vrot.slane %v7011_v59, %v7129_v47 }
 0x119   :  { %vm895_vm8 = vmor %vm733_vm11, %vm832_vm10  ;;  %v2102_v57 = vand.u32 4294901760, %v2101_v54  ;;  %vm491_vm10 = vcmp.eq.s32.totalorder %v7397_v40, %v7626_v49 }
 0x11a   :  { %10641 = vst [vmem:[#allocation12_spill] sm:$0xff] %v8416_v21  ;;  %vm904_vm2 = vmor %vm742_vm0, %vm841_vm14  ;;  %v5684_v10 = vsel %vm895_vm8, 1.0, %v10506_v38  ;;  %vm849_vm14 = vcmp.eq.s32.totalorder %v7397_v40, %v7484_v18  ;;  %v2114_v31 = vand.u32 4294901760, %v2113_v15  ;;  %v10645_v18 = vld [vmem:[#allocation8_spill] sm:$0xff]  ;;  %vm689_vm0 = vcmp.eq.s32.totalorder %v7397_v40, %v7254_v28 }
 0x11b   :  { %v5693_v9 = vsel %vm904_vm2, 1.0, %v10506_v38  ;;  %vm8424_vm11 = vmpackc.low %vm904_vm2, %vm895_vm8  ;;  %v8428_v35 = vsub.f32 %v5684_v10, %v5684_v10  ;;  %vm356_vm2 = vcmp.eq.s32.totalorder %v7397_v40, %v7637_v50  ;;  %v10646_v10 = vld [vmem:[#allocation10_spill] sm:$0xff] }
 0x11c   :  { %v10643_v51 = vsel %vm8424_vm11, 4294967295, %v10642_v51  ;;  %6297 = vmatpush1.bf16.msk.msra.mxu0 %vm8424_vm11, %v10501_v5  ;;  %v8439_v17 = vsub.f32 %v5693_v9, %v5693_v9  ;;  %vm552_vm6 = vmor %vm354_vm4, %vm489_vm13  ;;  %v8450_v59 = vpack.c.bf16 %v2114_v31, %v2102_v57  ;;  %vm851_vm13 = vcmp.eq.s32.totalorder %v7397_v40, %v7488_v60  ;;  %v10647_v31 = vld [vmem:[#allocation9_spill] sm:$0xff] }
 0x11d   :  { %10644 = vst [vmem:[#allocation11_spill] sm:$0xff] %v10643_v51  ;;  %vm750_vm3 = vmor %vm552_vm6, %vm687_vm7  ;;  %v2917_v54 = vand.u32 4294901760, %v8428_v35  ;;  %v8461_v9 = vadd.s32 16, %v10646_v10  ;;  %vm488_vm7 = vcmp.eq.s32.totalorder %v7397_v40, %v7711_v58  ;;  %v10648_v15 = vrot.slane %v7074_v33, %v10647_v31 }
 0x11e   :  { %vm912_vm8 = vmor %vm750_vm3, %vm849_vm14  ;;  %v2929_v26 = vand.u32 4294901760, %v8439_v17  ;;  %vm10649_vm14 = vcmask 1043456  }
 0x11f   :  { %v8464_v57 = vsel %vm912_vm8, 1.0, %v10506_v38  ;;  %vm554_vm4 = vmor %vm356_vm2, %vm491_vm10  ;;  %v2918_v50 = vsub.f32 %v8428_v35, %v2917_v54  ;;  %v8473_v21 = vrot.slane %v10648_v15, %v7062_v29  ;;  %vm686_vm10 = vcmp.eq.s32.totalorder %v7397_v40, %v7186_v4 }
 0x120   :  { %5761 = vmatprep.subr.msk.mxu1 %vm10649_vm14, %v8464_v57  ;;  %vm752_vm6 = vmor %vm554_vm4, %vm689_vm0  ;;  %v2930_v10 = vsub.f32 %v8439_v17, %v2929_v26  ;;  %v8483_v49 = vpack.c.bf16 %v2929_v26, %v2917_v54  ;;  %vm353_vm2 = vcmp.eq.s32.totalorder %v7397_v40, %v7761_v62  ;;  %vm848_vm0 = vcmp.eq.s32.totalorder %v7397_v40, %v7757_v22 }
 0x121   :  { %vm10650_vm3 = vmmov %vm10649_vm14  ;;  %v2919_v28 = vand.u32 4294901760, %v2918_v50  ;;  %v387_v15 = vrot.slane %v7074_v33, %v7265_v39  ;;  %v8505_v62 = vrot.slane %v252_v46, %v7068_v30  ;;  %v8508_v22 = vrot.slane %v256_v8, %v7068_v30 }
 0x122   :  { %v1076_v51 = vsel %vm10650_vm3, %v8464_v57, 0  ;;  %vm914_vm8 = vmor %vm752_vm6, %vm851_vm13  ;;  %v2931_v60 = vand.u32 4294901760, %v2930_v10  ;;  %vm850_vm13 = vcmp.eq.s32.totalorder %v7397_v40, %v7867_v7  ;;  %v395_v46 = vrot.slane %v8461_v9, %v7062_v29 }
 0x123   :  { %v8497_v54 = vsel %vm914_vm8, 1.0, %v10506_v38  ;;  %vm551_vm4 = vmor %vm353_vm2, %vm488_vm7  ;;  %v8519_v39 = vsub.f32 %v1076_v51, %v1076_v51  ;;  %vm355_vm2 = vcmp.eq.s32.totalorder %v7397_v40, %v7844_v42  ;;  %v6785_v42 = vld [vmem:[%s10299_s3] sm:$0xff]  ;;  %v8544_v8 = vrot.slane %v387_v15, %v7062_v29 }
 0x124   :  { %vm10651_vm14 = vmmov %vm10650_vm3  ;;  %v8525_v58 = vpack.c.bf16 %v2931_v60, %v2919_v28  ;;  %v8541_v51 = vrot.slane %v6785_v42, %v10647_v31  ;;  %v10656_v50 = vrot.slane %v10638_v53, %v7129_v47  ;;  %v10657_v47 = vrot.slane %v10645_v18, %v7068_v30 }
 0x125   :  { %v1082_v33 = vsel %vm10651_vm14, %v8497_v54, 0  ;;  %vm10652_vm6 = vmmov %vm10650_vm3  ;;  %vm688_vm3 = vcmp.eq.s32.totalorder %v7397_v40, %v7206_v12  ;;  %v10434_v7 = vand.u32 4294901760, %v8519_v39  ;;  %v8616_v10 = vrot.slane %v395_v46, %v7062_v29 }
 0x126   :  { %5803 = vmatprep.subr.msk.mxu0 %vm10652_vm6, %v8497_v54  ;;  %vm749_vm7 = vmor %vm551_vm4, %vm686_vm10  ;;  %vm10653_vm10 = vcmp.eq.s32.totalorder %v7397_v40, %v7820_v44  ;;  %v8546_v26 = vsub.f32 %v1082_v33, %v1082_v33  ;;  %v8613_v53 = vrot.slane %v10657_v47, %v7068_v30  ;;  %v10658_v28 = vmov 0 }
 0x127   :  { %vm911_vm8 = vmor %vm749_vm7, %vm848_vm0  ;;  %vm439_vm0 = vcmp.eq.s32.totalorder %v7018_v3, %v8473_v21  ;;  %v2119_v29 = vsub.f32 %v8519_v39, %v10434_v7 }
 0x128   :  { %v8530_v4 = vsel %vm911_vm8, 1.0, %v10506_v38  ;;  %vm553_vm4 = vmor %vm355_vm2, %vm10653_vm10  ;;  %vm448_vm8 = vcmp.eq.s32.totalorder %v7094_v41, %v8473_v21  ;;  %vm304_vm10 = vcmp.eq.s32.totalorder %v7018_v3, %v8508_v22 }
 0x129   :  { %vm10654_vm14 = vmmov %vm10652_vm6  ;;  %5762 = vmatpush1.msk.msra.mxu1 %vm10652_vm6, %v8530_v4  ;;  %v2120_v33 = vand.u32 4294901760, %v2119_v29  ;;  %v10665_v29 = vld [vmem:[#allocation50_spill] sm:$0xff] }
 0x12a   :  { %v1073_v9 = vsel %vm10654_vm14, %v8530_v4, 0  ;;  %vm751_vm7 = vmor %vm553_vm4, %vm688_vm3  ;;  %6227 = vmatprep.subr.bf16.mxu1 %v7840_v36  ;;  %1994 = vmatmul.mubr.f32.vlgmr.msra.gmra.mrb[10].mxu1 %v7495_v24  ;;  %vm637_vm14 = vcmp.eq.s32.totalorder %v7018_v3, %v8411_v43  ;;  %vm646_vm4 = vcmp.eq.s32.totalorder %v7094_v41, %v8411_v43  ;;  %v593_v36 = vrot.slane %v8405_v2, %v7068_v30 }
 0x12b   :  { %v8557_v44 = vsub.f32 %v1073_v9, %v1073_v9  ;;  %vm913_vm2 = vmor %vm751_vm7, %vm850_vm13  ;;  %6229 = vmatpush1.bf16.msra.mxu1 %v7993_v0  ;;  %1999 = vmatprep.mubr.f32.mxu1 %v10506_v38  ;;  %vm313_vm13 = vcmp.eq.s32.totalorder %v7094_v41, %v8508_v22  ;;  %v8597_v2 = vrot.slane %v10656_v50, %v7068_v30 }
 0x12c   :  { %v8569_v12 = vsel %vm913_vm2, 1.0, %v10506_v38  ;;  %vm502_vm3 = vmor %vm304_vm10, %vm439_vm0  ;;  %6231 = vmatprep.subr.bf16.mxu1 %v8132_v25  ;;  %vm799_vm0 = vcmp.eq.s32.totalorder %v7018_v3, %v8541_v51  ;;  %v10432_v25 = vand.u32 4294901760, %v8546_v26  ;;  %vm808_vm10 = vcmp.eq.s32.totalorder %v7094_v41, %v8541_v51 }
 0x12d   :  { %v1079_v0 = vsel %vm10652_vm6, %v8569_v12, 0  ;;  %vm10655_vm7 = vmmov %vm10652_vm6  ;;  %vm438_vm6 = vcmp.eq.s32.totalorder %v7018_v3, %v8544_v8 }
 0x12e   :  { %5804 = vmatpush1.msk.msra.mxu0 %vm10655_vm7, %v8569_v12  ;;  %vm511_vm2 = vmor %vm313_vm13, %vm448_vm8  ;;  %v8599_v31 = vsub.f32 %v1079_v0, %v1079_v0  ;;  %vm303_vm13 = vcmp.eq.s32.totalorder %v7018_v3, %v8505_v62  ;;  %2005 = vmatmul.mubr.f32.gmra.mrb[12].mxu1 %v7668_v32  ;;  %vm312_vm7 = vcmp.eq.s32.totalorder %v7094_v41, %v8505_v62 }
 0x12f   :  { %6299 = vmatprep.subr.bf16.mxu0 %v7912_v19  ;;  %2811 = vmatmul.mubr.f32.vlgmr.msra.gmra.mrb[10].mxu0 %v7495_v24  ;;  %vm700_vm8 = vmor %vm502_vm3, %vm637_vm14  ;;  %v10431_v19 = vand.u32 4294901760, %v8557_v44 }
 0x130   :  { %6301 = vmatpush1.bf16.msra.mxu0 %v8067_v13  ;;  %2816 = vmatprep.mubr.f32.mxu0 %v10506_v38  ;;  %vm709_vm14 = vmor %vm511_vm2, %vm646_vm4  ;;  %v8637_v13 = vrot.slane %v6785_v42, %v10637_v16  ;;  %vm447_vm2 = vcmp.eq.s32.totalorder %v7094_v41, %v8544_v8  ;;  %v10670_v42 = vld [vmem:[#allocation47_spill] sm:$0xff] }
 0x131   :  { %6303 = vmatprep.subr.bf16.mxu0 %v8204_v56  ;;  %vm862_vm3 = vmor %vm700_vm8, %vm799_vm0  ;;  %6233 = vmatpush1.bf16.msra.mxu1 %v8257_v20  ;;  %v10430_v56 = vand.u32 4294901760, %v8599_v31  ;;  %v2936_v20 = vsub.f32 %v8546_v26, %v10432_v25  ;;  %vm636_vm8 = vcmp.eq.s32.totalorder %v7018_v3, %v8597_v2 }
 0x132   :  { %2010 = vmatprep.mubr.f32.mxu1 %v10506_v38  ;;  %vm871_vm4 = vmor %vm709_vm14, %vm808_vm10  ;;  %v5651_v18 = vsel %vm862_vm3, 1.0, %v10506_v38  ;;  %6235 = vmatprep.subr.bf16.mxu1 %v8348_v52  ;;  %v2125_v52 = vsub.f32 %v8557_v44, %v10431_v19  ;;  %vm645_vm14 = vcmp.eq.s32.totalorder %v7094_v41, %v8597_v2  ;;  %v10705_v19 = vld [vmem:[#allocation66_spill] sm:$0xff] }
 0x133   :  { %2822 = vmatmul.mubr.f32.gmra.mrb[12].mxu0 %v7668_v32  ;;  %v5660_v16 = vsel %vm871_vm4, 1.0, %v10506_v38  ;;  %vm8656_vm0 = vmpackc.low %vm871_vm4, %vm862_vm3  ;;  %v8660_v15 = vsub.f32 %v5651_v18, %v5651_v18  ;;  %2016 = vmatmul.mubr.f32.gmra.mrb[14].mxu1 %v7727_v14  ;;  %vm807_vm4 = vcmp.eq.s32.totalorder %v7094_v41, %v8637_v13  ;;  %v8737_v18 = vld [vmem:[%s10299_s3 + $0x8] ss:$0 sm:$0xff] }
 0x134   :  { %v10659_v28 = vsel %vm8656_vm0, 4294967295, %v10658_v28  ;;  %6305 = vmatpush1.bf16.msra.mxu0 %v8306_v55  ;;  %2827 = vmatprep.mubr.f32.mxu0 %v10506_v38  ;;  %v8669_v60 = vsub.f32 %v5660_v16, %v5660_v16  ;;  %vm501_vm10 = vmor %vm303_vm13, %vm438_vm6  ;;  %v8680_v55 = vrot.slane %v593_v36, %v7068_v30  ;;  %vm798_vm13 = vcmp.eq.s32.totalorder %v7018_v3, %v8637_v13 }
 0x135   :  { %10660 = vst [vmem:[#allocation8_spill] sm:$0xff] %v8660_v15  ;;  %6307 = vmatprep.subr.bf16.mxu0 %v8395_v1  ;;  %vm510_vm3 = vmor %vm312_vm7, %vm447_vm2  ;;  %v3680_v46 = vand.u32 4294901760, %v8660_v15  ;;  %6237 = vmatpush1.bf16.msra.mxu1 %v8450_v59  ;;  %v2942_v30 = vsub.f32 %v8599_v31, %v10430_v56  ;;  %v2937_v59 = vand.u32 4294901760, %v2936_v20  ;;  %vm305_vm2 = vcmp.eq.s32.totalorder %v7018_v3, %v8613_v53 }
 0x136   :  { %10661 = vst [vmem:[#allocation10_spill] sm:$0xff] %v8669_v60  ;;  %2021 = vmatprep.mubr.f32.mxu1 %v10506_v38  ;;  %vm699_vm6 = vmor %vm501_vm10, %vm636_vm8  ;;  %v3692_v1 = vand.u32 4294901760, %v8669_v60  ;;  %2121 = vmatprep.subr.mxu1 %v2120_v33  ;;  %v2126_v36 = vand.u32 4294901760, %v2125_v52  ;;  %vm440_vm10 = vcmp.eq.s32.totalorder %v7018_v3, %v8616_v10  ;;  %v10666_v33 = vmov 0 }
 0x137   :  { %2833 = vmatmul.mubr.f32.gmra.mrb[14].mxu0 %v7727_v14  ;;  %vm708_vm7 = vmor %vm510_vm3, %vm645_vm14  ;;  %v3681_v9 = vsub.f32 %v8660_v15, %v3680_v46  ;;  %2027 = vmatmul.mubr.f32.gmra.mrb[16].mxu1 %v10665_v29  ;;  %vm449_vm3 = vcmp.eq.s32.totalorder %v7094_v41, %v8616_v10  ;;  %v2943_v16 = vand.u32 4294901760, %v2942_v30  ;;  %v10751_v15 = vld [vmem:[#allocation28_spill] sm:$0xff] }
 0x138   :  { %6309 = vmatpush1.bf16.msra.mxu0 %v8525_v58  ;;  %2838 = vmatprep.mubr.f32.mxu0 %v10506_v38  ;;  %vm8718_vm8 = vmor %vm699_vm6, %vm798_vm13  ;;  %v3693_v50 = vsub.f32 %v8669_v60, %v3692_v1  ;;  %v8725_v47 = vpack.c.bf16 %v3692_v1, %v3680_v46  ;;  %vm800_vm13 = vcmp.eq.s32.totalorder %v7018_v3, %v8737_v18 }
 0x139   :  { %2938 = vmatprep.subr.mxu0 %v2937_v59  ;;  %vm870_vm14 = vmor %vm708_vm7, %vm807_vm4  ;;  %v5650_v58 = vsel %vm8718_vm8, 1.0, %v10506_v38  ;;  %v3682_v20 = vand.u32 4294901760, %v3681_v9  ;;  %2127 = vmatpush1.msra.mxu1 %v2126_v36  ;;  %v10669_v59 = vld [vmem:[#allocation49_spill] sm:$0xff]  ;;  %vm314_vm4 = vcmp.eq.s32.totalorder %v7094_v41, %v8613_v53 }
 0x13a   :  { %10664 = vst [vmem:[#allocation9_spill] sm:$0xff] %v8725_v47  ;;  %2032 = vmatprep.mubr.f32.mxu1 %v10506_v38  ;;  %v5659_v52 = vsel %vm870_vm14, 1.0, %v10506_v38  ;;  %vm8747_vm6 = vmpackc.low %vm870_vm14, %vm8718_vm8  ;;  %v8751_v46 = vsub.f32 %v5650_v58, %v5650_v58  ;;  %v3694_v1 = vand.u32 4294901760, %v3693_v50  ;;  %v10671_v9 = vpack.c.bf16 %v10669_v59, %v10670_v42  ;;  %v5430_v42 = vld [vmem:[%s10300_s4 + $0x10] sm:$0xff]  ;;  %v5428_v50 = vld [vmem:[%s10300_s4] sm:$0xff] }
 0x13b   :  { %v10667_v33 = vsel %vm8747_vm6, 4294967295, %v10666_v33  ;;  %2844 = vmatmul.mubr.f32.gmra.mrb[16].mxu0 %v10665_v29  ;;  %v8757_v30 = vsub.f32 %v5659_v52, %v5659_v52  ;;  %vm503_vm7 = vmor %vm305_vm2, %vm440_vm10  ;;  %vm647_vm8 = vcmp.eq.s32.totalorder %v7094_v41, %v8680_v55  ;;  %v10673_v58 = vld [vmem:[#allocation54_spill] sm:$0xff]  ;;  %v10674_v52 = vld [vmem:[#allocation53_spill] sm:$0xff]  ;;  %vm10677_vm2 = vcmp.eq.s32.totalorder %v7018_v3, %v8680_v55  ;;  %5445 = vperm.xlu1 %6761, %v5430_v42  }
 0x13c   :  { %10668 = vst [vmem:[#allocation70_spill] sm:$0xff] %v8751_v46  ;;  %6239 = vmatprep.subr.bf16.mxu1 %v10671_v9  ;;  %2944 = vmatpush1.msra.mxu0 %v2943_v16  ;;  %vm512_vm14 = vmor %vm314_vm4, %vm449_vm3  ;;  %v8778_v36 = vpack.c.bf16 %v3694_v1, %v3682_v20  ;;  %v3686_v0 = vand.u32 4294901760, %v8751_v46  ;;  %v10675_v16 = vpack.c.bf16 %v10673_v58, %v10674_v52  ;;  %v10676_v59 = vld [vmem:[#allocation55_spill] sm:$0xff]  ;;  %v10683_v1 = vld [vmem:[#allocation58_spill] sm:$0xff] }
 0x13d   :  { %10672 = vst [vmem:[#allocation49_spill] sm:$0xff] %v8757_v30  ;;  %2849 = vmatprep.mubr.f32.mxu0 %v10506_v38  ;;  %2038 = vmatmul.mubr.f32.gmra.mrb[18].mxu1 %v10676_v59  ;;  %vm701_vm10 = vmor %vm503_vm7, %vm10677_vm2  ;;  %vm809_vm3 = vcmp.eq.s32.totalorder %v7094_v41, %v8737_v18  ;;  %v3698_v20 = vand.u32 4294901760, %v8757_v30  ;;  %vm457_vm2 = vcmp.eq.s32.totalorder %v10576_v37, %v8473_v21  ;;  %v10730_v47 = vld [vmem:[#allocation24_spill] sm:$0xff] }
 0x13e   :  { %6311 = vmatprep.subr.bf16.mxu0 %v10675_v16  ;;  %2178 = vmatprep.mubr.f32.mxu1 %v10506_v38  ;;  %vm710_vm4 = vmor %vm512_vm14, %vm647_vm8  ;;  %v3687_v9 = vsub.f32 %v8751_v46, %v3686_v0  ;;  %vm322_vm14 = vcmp.eq.s32.totalorder %v10576_v37, %v8508_v22  ;;  %vm466_vm6 = vcmp.eq.s32.totalorder %v10578_v48, %v8473_v21 }
 0x13f   :  { %2855 = vmatmul.mubr.f32.gmra.mrb[18].mxu0 %v10676_v59  ;;  %vm863_vm7 = vmor %vm701_vm10, %vm800_vm13  ;;  %v3699_v58 = vsub.f32 %v8757_v30, %v3698_v20  ;;  %5435 = vperm.xlu0 %6760, %v5428_v50   ;;  %v8808_v52 = vpack.c.bf16 %v3698_v20, %v3686_v0  ;;  %v10679_v50 = vmov 0  ;;  %v10682_v20 = vld [vmem:[#allocation59_spill] sm:$0xff]  ;;  %vm817_vm10 = vcmp.eq.s32.totalorder %v10576_v37, %v8541_v51  ;;  %v10747_v30 = vld [vmem:[#allocation60_spill] sm:$0xff] }
 0x140   :  { %2995 = vmatprep.mubr.f32.mxu0 %v10506_v38  ;;  %vm872_vm8 = vmor %vm710_vm4, %vm809_vm3  ;;  %v5652_v41 = vsel %vm863_vm7, 1.0, %v10506_v38  ;;  %v3688_v3 = vand.u32 4294901760, %v3687_v9  ;;  %v10684_v56 = vpack.c.bf16 %v10682_v20, %v10683_v1  ;;  %vm331_vm3 = vcmp.eq.s32.totalorder %v10578_v48, %v8508_v22 }
 0x141   :  { %10678 = vst [vmem:[#allocation47_spill] sm:$0xff] %v8808_v52  ;;  %2180 = vmatmul.mubr.f32.vlgmr.msra.gmra.mrb[10].mxu1 %v10566_v34  ;;  %v5661_v42 = vsel %vm872_vm8, 1.0, %v10506_v38  ;;  %vm8818_vm13 = vmpackc.low %vm872_vm8, %vm863_vm7  ;;  %v8822_v0 = vsub.f32 %v5652_v41, %v5652_v41  ;;  %v3700_v16 = vand.u32 4294901760, %v3699_v58  ;;  %vm664_vm7 = vcmp.eq.s32.totalorder %v10578_v48, %v8411_v43 }
 0x142   :  { %v10680_v50 = vsel %vm8818_vm13, 4294967295, %v10679_v50  ;;  %6241 = vmatpush1.bf16.msra.mxu1 %v10684_v56  ;;  %2185 = vmatprep.mubr.f32.mxu1 %v10506_v38  ;;  %v8830_v9 = vsub.f32 %v5661_v42, %v5661_v42  ;;  %vm520_vm4 = vmor %vm322_vm14, %vm457_vm2  ;;  %v10686_v1 = vpack.c.bf16 %v8050_v6, %v8044_v63  ;;  %v10688_v41 = vpack.c.bf16 %v7973_v11, %v7963_v45  ;;  %v10691_v11 = vld [vmem:[#allocation25_spill] sm:$0xff]  ;;  %v10692_v42 = vld [vmem:[#allocation30_spill] sm:$0xff] }
 0x143   :  { %10681 = vst [vmem:[#allocation54_spill] sm:$0xff] %v8822_v0  ;;  %2997 = vmatmul.mubr.f32.vlgmr.msra.gmra.mrb[10].mxu0 %v10566_v34  ;;  %vm529_vm8 = vmor %vm331_vm3, %vm466_vm6  ;;  %v8848_v56 = vpack.c.bf16 %v3700_v16, %v3688_v3  ;;  %v4486_v58 = vand.u32 4294901760, %v8822_v0  ;;  %vm10689_vm2 = vcmp.eq.s32.totalorder %v10576_v37, %v8411_v43  ;;  %vm826_vm6 = vcmp.eq.s32.totalorder %v10578_v48, %v8541_v51  ;;  %v10693_v16 = vld [vmem:[#allocation14_spill] sm:$0xff] }
 0x144   :  { %10685 = vst [vmem:[#allocation53_spill] sm:$0xff] %v8830_v9  ;;  %6243 = vmatprep.subr.bf16.mxu1 %v10686_v1  ;;  %6313 = vmatpush1.bf16.msra.mxu0 %v10688_v41  ;;  %vm718_vm14 = vmor %vm520_vm4, %vm10689_vm2  ;;  %v4493_v63 = vand.u32 4294901760, %v8830_v9  ;;  %v10690_v3 = vpack.c.bf16 %v8119_v61, %v8115_v23  ;;  %v10694_v20 = vpack.c.bf16 %v10692_v42, %v10693_v16  ;;  %v10696_v1 = vld [vmem:[#allocation62_spill] sm:$0xff]  ;;  %v10697_v41 = vld [vmem:[#allocation61_spill] sm:$0xff] }
 0x145   :  { %10687 = vst [vmem:[#allocation59_spill] sm:$0xff] %v8848_v56  ;;  %3002 = vmatprep.mubr.f32.mxu0 %v10506_v38  ;;  %2187 = vmatmul.mubr.f32.gmra.mrb[12].mxu1 %v10691_v11  ;;  %vm727_vm3 = vmor %vm529_vm8, %vm664_vm7  ;;  %v4487_v45 = vsub.f32 %v8822_v0, %v4486_v58  ;;  %vm456_vm2 = vcmp.eq.s32.totalorder %v10576_v37, %v8544_v8  ;;  %v10700_v16 = vld [vmem:[#allocation34_spill] sm:$0xff]  ;;  %v10780_v56 = vld [vmem:[#allocation43_spill] sm:$0xff] }
 0x146   :  { %6315 = vmatprep.subr.bf16.mxu0 %v10690_v3  ;;  %6245 = vmatpush1.bf16.msra.mxu1 %v10694_v20  ;;  %vm880_vm4 = vmor %vm718_vm14, %vm817_vm10  ;;  %v4494_v23 = vsub.f32 %v8830_v9, %v4493_v63  ;;  %v8881_v61 = vpack.c.bf16 %v4493_v63, %v4486_v58  ;;  %v10698_v3 = vpack.c.bf16 %v10696_v1, %v10697_v41  ;;  %v10699_v63 = vld [vmem:[#allocation38_spill] sm:$0xff]  ;;  %v10702_v41 = vmov 0 }
 0x147   :  { %2192 = vmatprep.mubr.f32.mxu1 %v10506_v38  ;;  %3004 = vmatmul.mubr.f32.gmra.mrb[12].mxu0 %v10691_v11  ;;  %vm889_vm7 = vmor %vm727_vm3, %vm826_vm6  ;;  %v5669_v42 = vsel %vm880_vm4, 1.0, %v10506_v38  ;;  %vm321_vm10 = vcmp.eq.s32.totalorder %v10576_v37, %v8505_v62  ;;  %vm465_vm8 = vcmp.eq.s32.totalorder %v10578_v48, %v8544_v8  ;;  %v4488_v58 = vand.u32 4294901760, %v4487_v45  ;;  %v10706_v45 = vld [vmem:[#allocation65_spill] sm:$0xff] }
 0x148   :  { %10695 = vst [vmem:[#allocation58_spill] sm:$0xff] %v8881_v61  ;;  %6247 = vmatprep.subr.bf16.mxu1 %v10698_v3  ;;  %v10701_v20 = vpack.c.bf16 %v10699_v63, %v10700_v16  ;;  %3009 = vmatprep.mubr.f32.mxu0 %v10506_v38  ;;  %v5678_v1 = vsel %vm889_vm7, 1.0, %v10506_v38  ;;  %vm8900_vm14 = vmpackc.low %vm889_vm7, %vm880_vm4  ;;  %v8904_v3 = vsub.f32 %v5669_v42, %v5669_v42  ;;  %v4495_v6 = vand.u32 4294901760, %v4494_v23  ;;  %v10708_v63 = vld [vmem:[#allocation32_spill] sm:$0xff]  ;;  %v10710_v23 = vld [vmem:[#allocation69_spill] sm:$0xff] }
 0x149   :  { %v10703_v41 = vsel %vm8900_vm14, 4294967295, %v10702_v41  ;;  %v10707_v25 = vpack.c.bf16 %v10705_v19, %v10706_v45  ;;  %2194 = vmatmul.mubr.f32.gmra.mrb[14].mxu1 %v10708_v63  ;;  %v8912_v16 = vsub.f32 %v5678_v1, %v5678_v1  ;;  %vm330_vm3 = vcmp.eq.s32.totalorder %v10578_v48, %v8505_v62  ;;  %vm519_vm4 = vmor %vm321_vm10, %vm456_vm2  ;;  %v10716_v1 = vld [vmem:[#allocation33_spill] sm:$0xff] }
 0x14a   :  { %6317 = vmatpush1.bf16.msra.mxu0 %v10701_v20  ;;  %10704 = vst [vmem:[#allocation25_spill] sm:$0xff] %v8904_v3  ;;  %v10711_v42 = vpack.c.bf16 %v8384_v27, %v10710_v23  ;;  %2199 = vmatprep.mubr.f32.mxu1 %v10506_v38  ;;  %vm528_vm6 = vmor %vm330_vm3, %vm465_vm8  ;;  %vm816_vm13 = vcmp.eq.s32.totalorder %v10576_v37, %v8637_v13  ;;  %v3704_v19 = vand.u32 4294901760, %v8904_v3 }
 0x14b   :  { %6319 = vmatprep.subr.bf16.mxu0 %v10707_v25  ;;  %10709 = vst [vmem:[#allocation30_spill] sm:$0xff] %v8912_v16  ;;  %v8930_v25 = vpack.c.bf16 %v4495_v6, %v4488_v58  ;;  %3011 = vmatmul.mubr.f32.gmra.mrb[14].mxu0 %v10708_v63  ;;  %vm10713_vm2 = vcmp.eq.s32.totalorder %v10576_v37, %v8597_v2  ;;  %v3716_v27 = vand.u32 4294901760, %v8912_v16 }
 0x14c   :  { %6249 = vmatpush1.bf16.msra.mxu1 %v10711_v42  ;;  %vm717_vm10 = vmor %vm519_vm4, %vm10713_vm2  ;;  %vm825_vm7 = vcmp.eq.s32.totalorder %v10578_v48, %v8637_v13  ;;  %v10714_v6 = vpack.c.bf16 %v8439_v17, %v8428_v35  ;;  %3016 = vmatprep.mubr.f32.mxu0 %v10506_v38  ;;  %vm10715_vm8 = vcmp.eq.s32.totalorder %v10578_v48, %v8597_v2 }
 0x14d   :  { %10712 = vst [vmem:[#allocation14_spill] sm:$0xff] %v8930_v25  ;;  %2252 = vmatprep.subr.mxu1 %v8519_v39  ;;  %vm726_vm3 = vmor %vm528_vm6, %vm10715_vm8  ;;  %v3705_v58 = vsub.f32 %v8904_v3, %v3704_v19  ;;  %2201 = vmatmul.mubr.f32.gmra.mrb[16].mxu1 %v10716_v1  ;;  %vm458_vm2 = vcmp.eq.s32.totalorder %v10576_v37, %v8616_v10  ;;  %v10742_v3 = vld [vmem:[#allocation27_spill] sm:$0xff] }
 0x14e   :  { %6321 = vmatpush1.bf16.msra.mxu0 %v10714_v6  ;;  %vm879_vm4 = vmor %vm717_vm10, %vm816_vm13  ;;  %v3717_v35 = vsub.f32 %v8912_v16, %v3716_v27  ;;  %v8959_v17 = vpack.c.bf16 %v3716_v27, %v3704_v19  ;;  %2206 = vmatprep.mubr.f32.mxu1 %v10506_v38  ;;  %vm323_vm13 = vcmp.eq.s32.totalorder %v10576_v37, %v8613_v53  ;;  %v10719_v27 = vmov 0 }
 0x14f   :  { %3069 = vmatprep.subr.mxu0 %v8546_v26  ;;  %vm888_vm6 = vmor %vm726_vm3, %vm825_vm7  ;;  %v5668_v45 = vsel %vm879_vm4, 1.0, %v10506_v38  ;;  %vm467_vm10 = vcmp.eq.s32.totalorder %v10578_v48, %v8616_v10  ;;  %v3706_v23 = vand.u32 4294901760, %v3705_v58  ;;  %3018 = vmatmul.mubr.f32.gmra.mrb[16].mxu0 %v10716_v1  ;;  %v5431_v58 = vld [vmem:[%s10300_s4 + $0x18] sm:$0xff]  ;;  %vm332_vm3 = vcmp.eq.s32.totalorder %v10578_v48, %v8613_v53 }
 0x150   :  { %10717 = vst [vmem:[#allocation62_spill] sm:$0xff] %v8959_v17  ;;  %2255 = vmatpush1.msra.mxu1 %v8557_v44  ;;  %v5677_v19 = vsel %vm888_vm6, 1.0, %v10506_v38  ;;  %vm8976_vm8 = vmpackc.low %vm888_vm6, %vm879_vm4  ;;  %v8980_v6 = vsub.f32 %v5668_v45, %v5668_v45  ;;  %v3718_v20 = vand.u32 4294901760, %v3717_v35  ;;  %3023 = vmatprep.mubr.f32.mxu0 %v10506_v38  ;;  %v5429_v35 = vld [vmem:[%s10300_s4 + $0x8] sm:$0xff]  ;;  %v10832_v45 = vld [vmem:[#allocation59_spill] sm:$0xff] }
 0x151   :  { %6251 = vmatprep.subr.msk.bf16.mxu1 %vm7719_vm9, %v10501_v5  ;;  %v10720_v27 = vsel %vm8976_vm8, 4294967295, %v10719_v27  ;;  %v8989_v7 = vsub.f32 %v5677_v19, %v5677_v19  ;;  %vm521_vm4 = vmor %vm323_vm13, %vm458_vm2  ;;  %v10724_v19 = vld [vmem:[#allocation41_spill] sm:$0xff]  ;;  %vm818_vm2 = vcmp.eq.s32.totalorder %v10576_v37, %v8737_v18  ;;  %vm10726_vm13 = vcmp.eq.s32.totalorder %v10576_v37, %v8680_v55  ;;  %5450 = vperm.xlu1 %6761, %v5431_v58   ;;  %v10728_v37 = vld [vmem:[#allocation19_spill] sm:$0xff] }
 0x152   :  { %10721 = vst [vmem:[#allocation61_spill] sm:$0xff] %v8980_v6  ;;  %3072 = vmatpush1.msra.mxu0 %v8599_v31  ;;  %2208 = vmatmul.mubr.f32.gmra.mrb[18].mxu1 %v10724_v19  ;;  %vm530_vm7 = vmor %vm332_vm3, %vm467_vm10  ;;  %v9013_v61 = vpack.c.bf16 %v3718_v20, %v3706_v23  ;;  %v3710_v17 = vand.u32 4294901760, %v8980_v6  ;;  %vm827_vm8 = vcmp.eq.s32.totalorder %v10578_v48, %v8737_v18 }
 0x153   :  { %10722 = vst [vmem:[#allocation38_spill] sm:$0xff] %v8989_v7  ;;  %6323 = vmatprep.subr.msk.bf16.mxu0 %vm10599_vm15, %v10501_v5  ;;  %2306 = vmatprep.mubr.f32.mxu1 %v10506_v38  ;;  %vm719_vm6 = vmor %vm521_vm4, %vm10726_vm13  ;;  %v3722_v52 = vand.u32 4294901760, %v8989_v7  ;;  %vm10727_vm10 = vcmp.eq.s32.totalorder %v10578_v48, %v8680_v55  ;;  %vm475_vm13 = vcmp.eq.s32.totalorder %v10728_v37, %v8473_v21  ;;  %v10731_v48 = vld [vmem:[#allocation23_spill] sm:$0xff] }
 0x154   :  { %10725 = vst [vmem:[#allocation34_spill] sm:$0xff] %v9013_v61  ;;  %3025 = vmatmul.mubr.f32.gmra.mrb[18].mxu0 %v10724_v19  ;;  %vm728_vm3 = vmor %vm530_vm7, %vm10727_vm10  ;;  %v3711_v20 = vsub.f32 %v8980_v6, %v3710_v17  ;;  %5440 = vperm.xlu0 %6760, %v5429_v35   ;;  %vm340_vm7 = vcmp.eq.s32.totalorder %v10728_v37, %v8508_v22  ;;  %v10779_v61 = vld [vmem:[#allocation56_spill] sm:$0xff] }
 0x155   :  { %3123 = vmatprep.mubr.f32.mxu0 %v10506_v38  ;;  %vm881_vm4 = vmor %vm719_vm6, %vm818_vm2  ;;  %v3723_v23 = vsub.f32 %v8989_v7, %v3722_v52  ;;  %v9034_v58 = vpack.c.bf16 %v3722_v52, %v3710_v17  ;;  %vm484_vm10 = vcmp.eq.s32.totalorder %v10731_v48, %v8473_v21  ;;  %v10733_v17 = vmov 0 }
 0x156   :  { %2309 = vmatmul.mubr.f32.vlgmr.msra.gmra.mrb[10].mxu1 %v10730_v47  ;;  %vm890_vm14 = vmor %vm728_vm3, %vm827_vm8  ;;  %v5670_v0 = vsel %vm881_vm4, 1.0, %v10506_v38  ;;  %v3712_v35 = vand.u32 4294901760, %v3711_v20  ;;  %vm10746_vm8 = vcmp.eq.s32.totalorder %v10731_v48, %v8411_v43 }
 0x157   :  { %10729 = vst [vmem:[#allocation66_spill] sm:$0xff] %v9034_v58  ;;  %6253 = vmatpush1.bf16.msk.msra.mxu1 %vm10605_vm1, %v10501_v5  ;;  %2314 = vmatprep.mubr.f32.mxu1 %v10506_v38  ;;  %v5679_v52 = vsel %vm890_vm14, 1.0, %v10506_v38  ;;  %vm9047_vm6 = vmpackc.low %vm890_vm14, %vm881_vm4  ;;  %v9051_v58 = vsub.f32 %v5670_v0, %v5670_v0  ;;  %v3724_v7 = vand.u32 4294901760, %v3723_v23  ;;  %vm349_vm14 = vcmp.eq.s32.totalorder %v10731_v48, %v8508_v22  ;;  %v10834_v0 = vld [vmem:[#allocation14_spill] sm:$0xff] }
 0x158   :  { %v10734_v17 = vsel %vm9047_vm6, 4294967295, %v10733_v17  ;;  %3126 = vmatmul.mubr.f32.vlgmr.msra.gmra.mrb[10].mxu0 %v10730_v47  ;;  %6255 = vmatprep.subr.msk.bf16.mxu1 %vm8040_vm12, %v10501_v5  ;;  %v9059_v9 = vsub.f32 %v5679_v52, %v5679_v52  ;;  %vm538_vm2 = vmor %vm340_vm7, %vm475_vm13  ;;  %v10740_v47 = vld [vmem:[#allocation21_spill] sm:$0xff]  ;;  %vm10743_vm7 = vcmp.eq.s32.totalorder %v10728_v37, %v8411_v43 }
 0x159   :  { %10735 = vst [vmem:[#allocation65_spill] sm:$0xff] %v9051_v58  ;;  %6325 = vmatpush1.bf16.msk.msra.mxu0 %vm7959_vm5, %v10501_v5  ;;  %3131 = vmatprep.mubr.f32.mxu0 %v10506_v38  ;;  %vm547_vm4 = vmor %vm349_vm14, %vm484_vm10  ;;  %v9077_v23 = vpack.c.bf16 %v3724_v7, %v3712_v35  ;;  %v4500_v52 = vand.u32 4294901760, %v9051_v58  ;;  %vm10741_vm13 = vnez %v10740_v47  ;;  %v10744_v35 = vld [vmem:[#allocation13_spill] sm:$0xff] }
 0x15a   :  { %10737 = vst [vmem:[#allocation32_spill] sm:$0xff] %v9059_v9  ;;  %6327 = vmatprep.subr.msk.bf16.mxu0 %vm10741_vm13, %v10501_v5  ;;  %2317 = vmatmul.mubr.f32.gmra.mrb[12].mxu1 %v10742_v3  ;;  %vm736_vm3 = vmor %vm538_vm2, %vm10743_vm7  ;;  %v4507_v16 = vand.u32 4294901760, %v9059_v9  ;;  %vm10745_vm14 = vnez %v10744_v35  ;;  %vm10748_vm2 = vnez %v10747_v30  ;;  %vm10749_vm7 = vcmp.eq.s32.totalorder %v10728_v37, %v8541_v51 }
 0x15b   :  { %10739 = vst [vmem:[#allocation69_spill] sm:$0xff] %v9077_v23  ;;  %6257 = vmatpush1.bf16.msk.msra.mxu1 %vm10745_vm14, %v10501_v5  ;;  %2322 = vmatprep.mubr.f32.mxu1 %v10506_v38  ;;  %vm745_vm6 = vmor %vm547_vm4, %vm10746_vm8  ;;  %v4501_v46 = vsub.f32 %v9051_v58, %v4500_v52  ;;  %vm10752_vm8 = vnez %v10751_v15  ;;  %vm10753_vm4 = vcmp.eq.s32.totalorder %v10731_v48, %v8541_v51  ;;  %v10833_v20 = vld [vmem:[#allocation34_spill] sm:$0xff] }
 0x15c   :  { %3134 = vmatmul.mubr.f32.gmra.mrb[12].mxu0 %v10742_v3  ;;  %6259 = vmatprep.subr.msk.bf16.mxu1 %vm10748_vm2, %v10501_v5  ;;  %vm898_vm10 = vmor %vm736_vm3, %vm10749_vm7  ;;  %v4508_v7 = vsub.f32 %v9059_v9, %v4507_v16  ;;  %v9110_v59 = vpack.c.bf16 %v4507_v16, %v4500_v52  ;;  %vm339_vm3 = vcmp.eq.s32.totalorder %v10728_v37, %v8505_v62  ;;  %v10754_v52 = vld [vmem:[#allocation64_spill] sm:$0xff]  ;;  %v10757_v9 = vmov 0 }
 0x15d   :  { %6329 = vmatpush1.bf16.msk.msra.mxu0 %vm10752_vm8, %v10501_v5  ;;  %3139 = vmatprep.mubr.f32.mxu0 %v10506_v38  ;;  %vm907_vm2 = vmor %vm745_vm6, %vm10753_vm4  ;;  %v5687_v3 = vsel %vm898_vm10, 1.0, %v10506_v38  ;;  %v4502_v16 = vand.u32 4294901760, %v4501_v46  ;;  %vm10755_vm0 = vnez %v10754_v52  ;;  %v10760_v46 = vld [vmem:[#allocation68_spill] sm:$0xff]  ;;  %vm10764_vm6 = vcmask 1043456  }
 0x15e   :  { %10750 = vst [vmem:[#allocation33_spill] sm:$0xff] %v9110_v59  ;;  %6331 = vmatprep.subr.msk.bf16.mxu0 %vm10755_vm0, %v10501_v5  ;;  %v10756_v59 = vld [vmem:[#allocation36_spill] sm:$0xff]  ;;  %v5696_v58 = vsel %vm907_vm2, 1.0, %v10506_v38  ;;  %vm9129_vm8 = vmpackc.low %vm907_vm2, %vm898_vm10  ;;  %v9133_v60 = vsub.f32 %v5687_v3, %v5687_v3  ;;  %v4509_v29 = vand.u32 4294901760, %v4508_v7  ;;  %vm10761_vm4 = vnez %v10760_v46 }
 0x15f   :  { %2325 = vmatmul.mubr.f32.gmra.mrb[14].mxu1 %v10756_v59  ;;  %v10758_v9 = vsel %vm9129_vm8, 4294967295, %v10757_v9  ;;  %v9141_v14 = vsub.f32 %v5696_v58, %v5696_v58  ;;  %vm348_vm10 = vcmp.eq.s32.totalorder %v10731_v48, %v8505_v62  ;;  %vm10763_vm2 = vcmp.eq.s32.totalorder %v10728_v37, %v8544_v8 }
 0x160   :  { %10759 = vst [vmem:[#allocation46_spill] sm:$0xff] %v9133_v60  ;;  %6261 = vmatpush1.bf16.msk.msra.mxu1 %vm10761_vm4, %v10501_v5  ;;  %2330 = vmatprep.mubr.f32.mxu1 %v10506_v38  ;;  %vm537_vm7 = vmor %vm339_vm3, %vm10763_vm2  ;;  %vm681_vm8 = vcmp.eq.s32.totalorder %v10731_v48, %v8597_v2  ;;  %vm10765_vm4 = vcmp.eq.s32.totalorder %v10731_v48, %v8544_v8  ;;  %v3728_v58 = vand.u32 4294901760, %v9133_v60 }
 0x161   :  { %10762 = vst [vmem:[#allocation52_spill] sm:$0xff] %v9141_v14  ;;  %3142 = vmatmul.mubr.f32.gmra.mrb[14].mxu0 %v10756_v59  ;;  %5775 = vmatprep.subr.msk.mxu1 %vm10764_vm6, %v8464_v57  ;;  %vm546_vm0 = vmor %vm348_vm10, %vm10765_vm4  ;;  %vm834_vm14 = vcmp.eq.s32.totalorder %v10728_v37, %v8637_v13  ;;  %v9158_v3 = vpack.c.bf16 %v4509_v29, %v4502_v16  ;;  %v3740_v59 = vand.u32 4294901760, %v9141_v14  ;;  %vm10769_vm10 = vcmask 1043456   ;;  %v10770_v16 = vld [vmem:[#allocation37_spill] sm:$0xff]  ;;  %v10785_v29 = vld [vmem:[#allocation22_spill] sm:$0xff] }
 0x162   :  { %6333 = vmatpush1.bf16.msk.msra.mxu0 %vm8424_vm11, %v10501_v5  ;;  %3147 = vmatprep.mubr.f32.mxu0 %v10506_v38  ;;  %vm10768_vm3 = vcmp.eq.s32.totalorder %v10728_v37, %v8597_v2  ;;  %vm843_vm4 = vcmp.eq.s32.totalorder %v10731_v48, %v8637_v13  ;;  %vm744_vm2 = vmor %vm546_vm0, %vm681_vm8  ;;  %vm485_vm8 = vcmp.eq.s32.totalorder %v10731_v48, %v8616_v10  ;;  %v10836_v7 = vld [vmem:[#allocation69_spill] sm:$0xff] }
 0x163   :  { %10766 = vst [vmem:[#allocation41_spill] sm:$0xff] %v9158_v3  ;;  %vm735_vm6 = vmor %vm537_vm7, %vm10768_vm3  ;;  %5817 = vmatprep.subr.msk.mxu0 %vm10769_vm10, %v8497_v54  ;;  %2333 = vmatmul.mubr.f32.gmra.mrb[16].mxu1 %v10770_v16  ;;  %v3729_v3 = vsub.f32 %v9133_v60, %v3728_v58  ;;  %v3741_v23 = vsub.f32 %v9141_v14, %v3740_v59  ;;  %v10775_v60 = vld [vmem:[#allocation51_spill] sm:$0xff] }
 0x164   :  { %vm10771_vm7 = vmmov %vm10769_vm10  ;;  %2338 = vmatprep.mubr.f32.mxu1 %v10506_v38  ;;  %vm476_vm10 = vcmp.eq.s32.totalorder %v10728_v37, %v8616_v10  ;;  %v9193_v32 = vpack.c.bf16 %v3740_v59, %v3728_v58  ;;  %v5503_v58 = vld [vmem:[%s10301_s5] sm:$0xff] }
 0x165   :  { %5776 = vmatpush1.msk.msra.mxu1 %vm10771_vm7, %v8530_v4  ;;  %vm9186_vm3 = vmor %vm735_vm6, %vm834_vm14  ;;  %3150 = vmatmul.mubr.f32.gmra.mrb[16].mxu0 %v10770_v16  ;;  %vm341_vm14 = vcmp.eq.s32.totalorder %v10728_v37, %v8613_v53  ;;  %v3730_v59 = vand.u32 4294901760, %v3729_v3  ;;  %v3742_v3 = vand.u32 4294901760, %v3741_v23  ;;  %v5432_v14 = vld [vmem:[%s10300_s4 + $0x20] sm:$0x1] }
 0x166   :  { %10774 = vst [vmem:[#allocation19_spill] sm:$0xff] %v9193_v32  ;;  %6263 = vmatprep.subr.bf16.mxu1 %v10775_v60  ;;  %vm906_vm0 = vmor %vm744_vm2, %vm843_vm4  ;;  %v5686_v25 = vsel %vm9186_vm3, 1.0, %v10506_v38  ;;  %3155 = vmatprep.mubr.f32.mxu0 %v10506_v38  ;;  %v10777_v32 = vmov 0  ;;  %vm836_vm2 = vcmp.eq.s32.totalorder %v10728_v37, %v8737_v18 }
 0x167   :  { %vm10776_vm6 = vmmov %vm10771_vm7  ;;  %v5695_v60 = vsel %vm906_vm0, 1.0, %v10506_v38  ;;  %v9220_v16 = vsub.f32 %v5686_v25, %v5686_v25  ;;  %2341 = vmatmul.mubr.f32.gmra.mrb[18].mxu1 %v10780_v56  ;;  %vm350_vm7 = vcmp.eq.s32.totalorder %v10731_v48, %v8613_v53  ;;  %5510 = vperm.xlu1 %6761, %v5503_v58   ;;  %v10782_v58 = vld [vmem:[#allocation26_spill] sm:$0xff] }
 0x168   :  { %5818 = vmatpush1.msk.msra.mxu0 %vm10776_vm6, %v8569_v12  ;;  %vm9216_vm4 = vmpackc.low %vm906_vm0, %vm9186_vm3  ;;  %v9229_v24 = vsub.f32 %v5695_v60, %v5695_v60  ;;  %vm683_vm0 = vcmp.eq.s32.totalorder %v10731_v48, %v8680_v55  ;;  %2425 = vmatprep.mubr.f32.mxu1 %v10506_v38  ;;  %v10784_v60 = vld [vmem:[#allocation18_spill] sm:$0xff] }
 0x169   :  { %v10778_v32 = vsel %vm9216_vm4, 4294967295, %v10777_v32  ;;  %6335 = vmatprep.subr.bf16.mxu0 %v10779_v61  ;;  %vm539_vm3 = vmor %vm341_vm14, %vm476_vm10  ;;  %v9247_v61 = vpack.c.bf16 %v3742_v3, %v3730_v59  ;;  %v3734_v25 = vand.u32 4294901760, %v9220_v16  ;;  %3158 = vmatmul.mubr.f32.gmra.mrb[18].mxu0 %v10780_v56  ;;  %vm10781_vm10 = vcmp.eq.s32.totalorder %v10728_v37, %v8680_v55 }
 0x16a   :  { %vm548_vm6 = vmor %vm350_vm7, %vm485_vm8  ;;  %vm845_vm4 = vcmp.eq.s32.totalorder %v10731_v48, %v8737_v18  ;;  %v3746_v23 = vand.u32 4294901760, %v9229_v24  ;;  %5455 = vperm.xlu0 %6760, %v5432_v14   ;;  %3242 = vmatprep.mubr.f32.mxu0 %v10506_v38 }
 0x16b   :  { %vm737_vm14 = vmor %vm539_vm3, %vm10781_vm10  ;;  %v3735_v59 = vsub.f32 %v9220_v16, %v3734_v25  ;;  %2429 = vmatmul.mubr.f32.vlgmr.msra.gmra.mrb[10].mxu1 %v10782_v58  ;;  %vm493_vm3 = vcmp.eq.s32.totalorder %v7397_v40, %v8473_v21  ;;  %v10791_v21 = vld [vmem:[#allocation29_spill] sm:$0xff] }
 0x16c   :  { %vm746_vm8 = vmor %vm548_vm6, %vm683_vm0  ;;  %v3747_v37 = vsub.f32 %v9229_v24, %v3746_v23  ;;  %v9265_v48 = vpack.c.bf16 %v3746_v23, %v3734_v25  ;;  %6265 = vmatpush1.bf16.msra.mxu1 %v10784_v60  ;;  %2434 = vmatprep.mubr.f32.mxu1 %v10506_v38  ;;  %vm358_vm0 = vcmp.eq.s32.totalorder %v7397_v40, %v8508_v22 }
 0x16d   :  { %vm899_vm7 = vmor %vm737_vm14, %vm836_vm2  ;;  %vm691_vm2 = vcmp.eq.s32.totalorder %v7397_v40, %v8411_v43  ;;  %v3736_v3 = vand.u32 4294901760, %v3735_v59  ;;  %3246 = vmatmul.mubr.f32.vlgmr.msra.gmra.mrb[10].mxu0 %v10782_v58  ;;  %6267 = vmatprep.subr.bf16.mxu1 %v10785_v29  ;;  %v10789_v29 = vld [vmem:[#allocation20_spill] sm:$0xff] }
 0x16e   :  { %10783 = vst [vmem:[#allocation23_spill] sm:$0xff] %v9265_v48  ;;  %vm908_vm10 = vmor %vm746_vm8, %vm845_vm4  ;;  %v5688_v14 = vsel %vm899_vm7, 1.0, %v10506_v38  ;;  %vm853_vm4 = vcmp.eq.s32.totalorder %v7397_v40, %v8541_v51  ;;  %v3748_v22 = vand.u32 4294901760, %v3747_v37  ;;  %v10788_v48 = vld [vmem:[#allocation16_spill] sm:$0xff]  ;;  %3251 = vmatprep.mubr.f32.mxu0 %v10506_v38  ;;  %vm492_vm8 = vcmp.eq.s32.totalorder %v7397_v40, %v8544_v8 }
 0x16f   :  { %v5697_v25 = vsel %vm908_vm10, 1.0, %v10506_v38  ;;  %vm9277_vm6 = vmpackc.low %vm908_vm10, %vm899_vm7  ;;  %v9281_v60 = vsub.f32 %v5688_v14, %v5688_v14  ;;  %6337 = vmatpush1.bf16.msra.mxu0 %v10788_v48  ;;  %v10790_v14 = vld [vmem:[#allocation31_spill] sm:$0xff]  ;;  %vm690_vm10 = vcmp.eq.s32.totalorder %v7397_v40, %v8597_v2  ;;  %v10800_v2 = vld [vmem:[#allocation12_spill] sm:$0xff] }
 0x170   :  { %v9287_v59 = vsub.f32 %v5697_v25, %v5697_v25  ;;  %vm556_vm14 = vmor %vm358_vm0, %vm493_vm3  ;;  %6339 = vmatprep.subr.bf16.mxu0 %v10789_v29  ;;  %2438 = vmatmul.mubr.f32.gmra.mrb[12].mxu1 %v10790_v14  ;;  %v9301_v37 = vpack.c.bf16 %v3748_v22, %v3736_v3  ;;  %vm357_vm0 = vcmp.eq.s32.totalorder %v7397_v40, %v8505_v62  ;;  %v10794_v22 = vld [vmem:[#allocation63_spill] sm:$0xff]  ;;  %v10795_v29 = vld [vmem:[#allocation42_spill] sm:$0xff] }
 0x171   :  { %vm754_vm7 = vmor %vm556_vm14, %vm691_vm2  ;;  %v4514_v48 = vand.u32 4294901760, %v9281_v60  ;;  %6269 = vmatpush1.bf16.msra.mxu1 %v10791_v21  ;;  %2443 = vmatprep.mubr.f32.mxu1 %v10506_v38 }
 0x172   :  { %vm9309_vm3 = vmor %vm754_vm7, %vm853_vm4  ;;  %v4521_v43 = vand.u32 4294901760, %v9287_v59  ;;  %3255 = vmatmul.mubr.f32.gmra.mrb[12].mxu0 %v10790_v14  ;;  %6271 = vmatprep.subr.bf16.mxu1 %v10794_v22  ;;  %vm494_vm4 = vcmp.eq.s32.totalorder %v7397_v40, %v8616_v10  ;;  %vm692_vm7 = vcmp.eq.s32.totalorder %v7397_v40, %v8680_v55  ;;  %v10798_v10 = vld [vmem:[#allocation67_spill] sm:$0xff]  ;;  %v10801_v55 = vand.u32 4294901760, %v8519_v39 }
 0x173   :  { %vm555_vm2 = vmor %vm357_vm0, %vm492_vm8  ;;  %v4515_v51 = vsub.f32 %v9281_v60, %v4514_v48  ;;  %6341 = vmatpush1.bf16.msra.mxu0 %v10795_v29  ;;  %3260 = vmatprep.mubr.f32.mxu0 %v10506_v38  ;;  %v10799_v22 = vld [vmem:[#allocation39_spill] sm:$0xff]  ;;  %vm359_vm8 = vcmp.eq.s32.totalorder %v7397_v40, %v8613_v53  ;;  %v10807_v39 = vand.u32 4294901760, %v8599_v31 }
 0x174   :  { %vm9331_vm14 = vmor %vm555_vm2, %vm690_vm10  ;;  %v4522_v8 = vsub.f32 %v9287_v59, %v4521_v43  ;;  %v9338_v21 = vpack.c.bf16 %v4521_v43, %v4514_v48  ;;  %6343 = vmatprep.subr.bf16.mxu0 %v10798_v10  ;;  %2447 = vmatmul.mubr.f32.gmra.mrb[14].mxu1 %v10799_v22  ;;  %v10804_v43 = vand.u32 4294901760, %v8546_v26  ;;  %v5504_v26 = vld [vmem:[%s10301_s5 + $0x8] sm:$0xff]  ;;  %v10840_v48 = vld [vmem:[#allocation10_spill] sm:$0xff] }
 0x175   :  { %v4516_v29 = vand.u32 4294901760, %v4515_v51  ;;  %6273 = vmatpush1.bf16.msra.mxu1 %v10800_v2  ;;  %2452 = vmatprep.mubr.f32.mxu1 %v10506_v38  ;;  %vm557_vm10 = vmor %vm359_vm8, %vm494_vm4  ;;  %v10805_v51 = vld [vmem:[#allocation40_spill] sm:$0xff]  ;;  %vm10819_vm8 = vnez %v10667_v33 }
 0x176   :  { %v4523_v3 = vand.u32 4294901760, %v4522_v8  ;;  %3264 = vmatmul.mubr.f32.gmra.mrb[14].mxu0 %v10799_v22  ;;  %2522 = vmatprep.subr.mxu1 %v10801_v55  ;;  %vm9349_vm0 = vmor %vm557_vm10, %vm692_vm7  ;;  %v10806_v8 = vand.u32 4294901760, %v8557_v44  ;;  %v10808_v44 = vld [vmem:[#allocation45_spill] sm:$0xff]  ;;  %vm10817_vm7 = vnez %v10659_v28  ;;  %vm10820_vm10 = vnez %v10703_v41  ;;  %v10838_v10 = vld [vmem:[#allocation48_spill] sm:$0xff] }
 0x177   :  { %6345 = vmatpush1.bf16.msra.mxu0 %v8483_v49  ;;  %3269 = vmatprep.mubr.f32.mxu0 %v10506_v38  ;;  %v5505_v49 = vld [vmem:[%s10301_s5 + $0x10] sm:$0xff]  ;;  %v10839_v55 = vld [vmem:[#allocation50_spill] sm:$0xff] }
 0x178   :  { %v9355_v53 = vpack.c.bf16 %v4523_v3, %v4516_v29  ;;  %3339 = vmatprep.subr.mxu0 %v10804_v43  ;;  %2456 = vmatmul.mubr.f32.gmra.mrb[16].mxu1 %v10805_v51  ;;  %v10837_v3 = vld [vmem:[#allocation41_spill] sm:$0xff]  ;;  %v10841_v43 = vld [vmem:[#allocation8_spill] sm:$0xff] }
 0x179   :  { %2526 = vmatpush1.msra.mxu1 %v10806_v8  ;;  %2461 = vmatprep.mubr.f32.mxu1 %v10506_v38  ;;  %v10842_v8 = vpack.c.bf16 %v10840_v48, %v10841_v43 }
 0x17a   :  { %3273 = vmatmul.mubr.f32.gmra.mrb[16].mxu0 %v10805_v51  ;;  %6275 = vmatprep.subr.msk.bf16.mxu1 %vm7719_vm9, %v10501_v5  ;;  %vm10809_vm9 = vnez %v10744_v35 }
 0x17b   :  { %3343 = vmatpush1.msra.mxu0 %v10807_v39  ;;  %3278 = vmatprep.mubr.f32.mxu0 %v10506_v38  ;;  %v10845_v39 = vld [vmem:[#allocation70_spill] sm:$0xff] }
 0x17c   :  { %6347 = vmatprep.subr.msk.bf16.mxu0 %vm10599_vm15, %v10501_v5  ;;  %2465 = vmatmul.mubr.f32.gmra.mrb[18].mxu1 %v10808_v44  ;;  %vm10812_vm15 = vnez %v10754_v52  ;;  %v10835_v52 = vld [vmem:[#allocation44_spill] sm:$0xff] }
 0x17d   :  { %2577 = vmatprep.mubr.f32.mxu1 %v10506_v38  ;;  %5520 = vperm.xlu1 %6761, %v5505_v49   ;;  %v10844_v49 = vld [vmem:[#allocation49_spill] sm:$0xff] }
 0x17e   :  { %3282 = vmatmul.mubr.f32.gmra.mrb[18].mxu0 %v10808_v44  ;;  %5515 = vperm.xlu0 %6760, %v5504_v26   ;;  %v10846_v26 = vpack.c.bf16 %v10844_v49, %v10845_v39  ;;  %v10865_v39 = vld [vmem:[#allocation27_spill] sm:$0xff] }
 0x17f   :  { %3394 = vmatprep.mubr.f32.mxu0 %v10506_v38 }
 0x180   :  { %2579 = vmatmul.mubr.f32.vlgmr.msra.gmra.mrb[10].mxu1 %v10566_v34 }
 0x181   :  { %6277 = vmatpush1.bf16.msk.msra.mxu1 %vm10605_vm1, %v10501_v5  ;;  %2584 = vmatprep.mubr.f32.mxu1 %v10506_v38  ;;  %vm10813_vm1 = vnez %v10760_v46 }
 0x182   :  { %3396 = vmatmul.mubr.f32.vlgmr.msra.gmra.mrb[10].mxu0 %v10566_v34  ;;  %6279 = vmatprep.subr.msk.bf16.mxu1 %vm8040_vm12, %v10501_v5  ;;  %vm10810_vm12 = vnez %v10747_v30 }
 0x183   :  { %6349 = vmatpush1.bf16.msk.msra.mxu0 %vm7959_vm5, %v10501_v5  ;;  %3401 = vmatprep.mubr.f32.mxu0 %v10506_v38  ;;  %vm10811_vm5 = vnez %v10751_v15 }
 0x184   :  { %6351 = vmatprep.subr.msk.bf16.mxu0 %vm10741_vm13, %v10501_v5  ;;  %2586 = vmatmul.mubr.f32.gmra.mrb[12].mxu1 %v10691_v11  ;;  %vm10814_vm13 = vcmask 1043456  }
 0x185   :  { %6281 = vmatpush1.bf16.msk.msra.mxu1 %vm10809_vm9, %v10501_v5  ;;  %2591 = vmatprep.mubr.f32.mxu1 %v10506_v38  ;;  %vm10815_vm2 = vmmov %vm10814_vm13  ;;  %vm10821_vm9 = vnez %v10680_v50 }
 0x186   :  { %3403 = vmatmul.mubr.f32.gmra.mrb[12].mxu0 %v10691_v11  ;;  %6283 = vmatprep.subr.msk.bf16.mxu1 %vm10810_vm12, %v10501_v5  ;;  %vm10816_vm4 = vmmov %vm10815_vm2  ;;  %vm10822_vm12 = vnez %v10720_v27 }
 0x187   :  { %6353 = vmatpush1.bf16.msk.msra.mxu0 %vm10811_vm5, %v10501_v5  ;;  %3408 = vmatprep.mubr.f32.mxu0 %v10506_v38  ;;  %vm10823_vm5 = vnez %v10758_v9 }
 0x188   :  { %6355 = vmatprep.subr.msk.bf16.mxu0 %vm10812_vm15, %v10501_v5  ;;  %2593 = vmatmul.mubr.f32.gmra.mrb[14].mxu1 %v10708_v63  ;;  %vm852_vm15 = vcmp.eq.s32.totalorder %v7397_v40, %v8637_v13 }
 0x189   :  { %6285 = vmatpush1.bf16.msk.msra.mxu1 %vm10813_vm1, %v10501_v5  ;;  %2598 = vmatprep.mubr.f32.mxu1 %v10506_v38  ;;  %vm10824_vm1 = vnez %v10734_v17 }
 0x18a   :  { %3410 = vmatmul.mubr.f32.gmra.mrb[14].mxu0 %v10708_v63  ;;  %5789 = vmatprep.subr.msk.mxu1 %vm10814_vm13, %v8464_v57  ;;  %v5507_v57 = vld [vmem:[%s10301_s5 + $0x20] sm:$0x1]  ;;  %vm854_vm13 = vcmp.eq.s32.totalorder %v7397_v40, %v8737_v18 }
 0x18b   :  { %6357 = vmatpush1.bf16.msk.msra.mxu0 %vm8424_vm11, %v10501_v5  ;;  %3415 = vmatprep.mubr.f32.mxu0 %v10506_v38  ;;  %vm10818_vm11 = vmmov %vm10815_vm2 }
 0x18c   :  { %5831 = vmatprep.subr.msk.mxu0 %vm10815_vm2, %v8497_v54  ;;  %2600 = vmatmul.mubr.f32.gmra.mrb[16].mxu1 %v10716_v1  ;;  %v5506_v54 = vld [vmem:[%s10301_s5 + $0x18] sm:$0xff]  ;;  %vm10825_vm2 = vnez %v10778_v32  ;;  %s6831_s5 = smov [#allocation4]  }
 0x18d   :  { %5790 = vmatpush1.msk.msra.mxu1 %vm10816_vm4, %v8530_v4  ;;  %2605 = vmatprep.mubr.f32.mxu1 %v10506_v38  ;;  %v6829_v4 = vmov 0.0|0.0   ;;  %vm915_vm4 = vmor %vm9331_vm14, %vm852_vm15  ;;  %s5628_s29 = sshll.u32 %s6831_s5, 4  ;;  %s5629_s29 = int_to_ptr.vmem [resolvable:$true] %s5628_s29 }
 0x18e   :  { %3417 = vmatmul.mubr.f32.gmra.mrb[16].mxu0 %v10716_v1  ;;  %6359 = vmatprep.subr.msk.bf16.mxu1 %vm10817_vm7, %v10501_v5  ;;  %v9507_v40 = vsel %vm915_vm4, 1.0, %v10506_v38  ;;  %vm10826_vm14 = vmmov %vm10818_vm11  ;;  %s6798_s30 = scalar_lea.vmem %s5629_s29, 5760  ;;  %p6803_p8 = scmp.lt.s32.totalorder %s5629_s29, %s5629_s29 }
 0x18f   :  { %5832 = vmatpush1.msk.msra.mxu0 %vm10818_vm11, %v8569_v12  ;;  %3422 = vmatprep.mubr.f32.mxu0 %v10506_v38  ;;  %v9490_v12 = vsel %vm9309_vm3, 1.0, %v10506_v38  ;;  %vm917_vm3 = vmor %vm9349_vm0, %vm854_vm13  ;;  %p6799_p7 = scmp.ne.s32.totalorder %s5629_s29, %s6798_s30  ;;  %p6804_p9 = scmp.lt.s32.totalorder %s6798_s30, %s6798_s30 }
 0x190   :  { %2607 = vmatmul.mubr.f32.gmra.mrb[18].mxu1 %v10724_v19  ;;  %6430 = vmatprep.subr.bf16.mxu0 %v6829_v4  ;;  %v1088_v31 = vsel %vm10826_vm14, %v9490_v12, 0  ;;  %vm10827_vm15 = vmmov %vm10818_vm11  ;;  %v9516_v13 = vsel %vm917_vm3, 1.0, %v10506_v38 }
 0x191   :  { %2691 = vmatprep.mubr.f32.mxu1 %v10506_v38  ;;  %5530 = vperm.xlu1 %6761, %v5507_v57   ;;  %vm10828_vm0 = vmmov %vm10818_vm11  ;;  %v9522_v15 = vsub.f32 %v1088_v31, %v1088_v31  ;;  %v10847_v57 = vld [vmem:[#allocation30_spill] sm:$0xff]  ;;  %p6805_p10 = por %p6804_p9, %p6803_p8 }
 0x192   :  { %3424 = vmatmul.mubr.f32.gmra.mrb[18].mxu0 %v10724_v19  ;;  %5525 = vperm.xlu0 %6760, %v5506_v54   ;;  %vm10829_vm13 = vmmov %vm10828_vm0  ;;  %v10848_v54 = vld [vmem:[#allocation25_spill] sm:$0xff] }
 0x193   :  { %3508 = vmatprep.mubr.f32.mxu0 %v10506_v38  ;;  %v1085_v47 = vsel %vm10829_vm13, %v9507_v40, 0  ;;  %vm10830_vm4 = vmmov %vm10828_vm0  ;;  %v3752_v42 = vand.u32 4294901760, %v9522_v15  ;;  %v10849_v31 = vpack.c.bf16 %v10847_v57, %v10848_v54  ;;  %p6806_p11 = pnand %p6805_p10, %p6799_p7 }
 0x194   :  { %2693 = vmatmul.mubr.f32.vlgmr.msra.gmra.mrb[10].mxu1 %v10566_v34  ;;  %v1091_v18 = vsel %vm10830_vm4, %v9516_v13, 0  ;;  %v9532_v30 = vsub.f32 %v1085_v47, %v1085_v47  ;;  %v10850_v47 = vld [vmem:[#allocation53_spill] sm:$0xff]  ;;  %vm10867_vm3 = vmmov %vm10828_vm0 }
 0x195   :  { %6361 = vmatpush1.bf16.msk.msra.mxu1 %vm10819_vm8, %v10501_v5  ;;  %2698 = vmatprep.mubr.f32.mxu1 %v10506_v38  ;;  %v9538_v6 = vsub.f32 %v1091_v18, %v1091_v18  ;;  %v3753_v46 = vsub.f32 %v9522_v15, %v3752_v42  ;;  %v10851_v18 = vld [vmem:[#allocation54_spill] sm:$0xff]  ;;  %vm10869_vm14 = vmmov %vm10828_vm0 }
 0x196   :  { %3510 = vmatmul.mubr.f32.vlgmr.msra.gmra.mrb[10].mxu0 %v10566_v34  ;;  %6363 = vmatprep.subr.msk.bf16.mxu1 %vm10820_vm10, %v10501_v5  ;;  %v3758_v35 = vand.u32 4294901760, %v9532_v30 }
 0x197   :  { %6432 = vmatpush3.bf16.msk.msra.mxu0 %vm10821_vm9, %v10501_v5  ;;  %3515 = vmatprep.mubr.f32.mxu0 %v10506_v38  ;;  %v4528_v25 = vand.u32 4294901760, %v9538_v6  ;;  %v3754_v29 = vand.u32 4294901760, %v3753_v46  ;;  %v10857_v46 = vld [vmem:[#allocation46_spill] sm:$0xff] }
 0x198   :  { %6433 = vmatprep.subr.bf16.mxu0 %v6829_v4  ;;  %2700 = vmatmul.mubr.f32.gmra.mrb[12].mxu1 %v10691_v11  ;;  %v3759_v62 = vsub.f32 %v9532_v30, %v3758_v35 }
 0x199   :  { %6365 = vmatpush1.bf16.msk.msra.mxu1 %vm10822_vm12, %v10501_v5  ;;  %2705 = vmatprep.mubr.f32.mxu1 %v10506_v38 }
 0x19a   :  { %3517 = vmatmul.mubr.f32.gmra.mrb[12].mxu0 %v10691_v11  ;;  %6367 = vmatprep.subr.msk.bf16.mxu1 %vm10823_vm5, %v10501_v5  ;;  %v3760_v2 = vand.u32 4294901760, %v3759_v62  ;;  %v10860_v62 = vld [vmem:[#allocation65_spill] sm:$0xff] }
 0x19b   :  { %6435 = vmatpush3.bf16.msk.msra.mxu0 %vm10824_vm1, %v10501_v5  ;;  %3522 = vmatprep.mubr.f32.mxu0 %v10506_v38 }
 0x19c   :  { %6436 = vmatprep.subr.bf16.mxu0 %v6829_v4  ;;  %2707 = vmatmul.mubr.f32.gmra.mrb[14].mxu1 %v10708_v63 }
 0x19d   :  { %6369 = vmatpush1.bf16.msk.msra.mxu1 %vm10825_vm2, %v10501_v5  ;;  %2712 = vmatprep.mubr.f32.mxu1 %v10506_v38 }
 0x19e   :  { %3524 = vmatmul.mubr.f32.gmra.mrb[14].mxu0 %v10708_v63  ;;  %5845 = vmatprep.subr.msk.mxu1 %vm10818_vm11, %v9490_v12  ;;  %vm6830_vm11 = vmmov 0  }
 0x19f   :  { %6438 = vmatpush3.bf16.msk.msra.mxu0 %vm9277_vm6, %v10501_v5  ;;  %3529 = vmatprep.mubr.f32.mxu0 %v10506_v38 }
 0x1a0   :  { %5980 = vmatprep.subr.mxu0 %v10506_v38  ;;  %2714 = vmatmul.mubr.f32.gmra.mrb[16].mxu1 %v10716_v1 }
 0x1a1   :  { %5846 = vmatpush1.msk.msra.mxu1 %vm10827_vm15, %v9507_v40  ;;  %2719 = vmatprep.mubr.f32.mxu1 %v10506_v38  ;;  %vm5060_vm15 = vcmask 1040384  }
 0x1a2   :  { %3531 = vmatmul.mubr.f32.gmra.mrb[16].mxu0 %v10716_v1  ;;  %6371 = vmatprep.subr.bf16.mxu1 %v8778_v36  ;;  %v10831_v36 = vld [vmem:[#allocation35_spill] sm:$0xff] }
 0x1a3   :  { %5981 = vmatpush3.msk.msra.mxu0 %vm10828_vm0, %v9516_v13  ;;  %3536 = vmatprep.mubr.f32.mxu0 %v10506_v38 }
 0x1a4   :  { %2721 = vmatmul.mubr.f32.gmra.mrb[18].mxu1 %v10724_v19  ;;  %6439 = vmatprep.subr.bf16.mxu0 %v6829_v4 }
 0x1a5   :  { %3622 = vmatprep.mubr.f32.mxu1 %v10506_v38 }
 0x1a6   :  { %3538 = vmatmul.mubr.f32.gmra.mrb[18].mxu0 %v10724_v19 }
 0x1a7   :  { %5982 = vmatprep.mubr.msk.f32.mxu0 %vm6830_vm11, %v10506_v38 }
 0x1a8   :  { %3628 = vmatmul.mubr.f32.vlgmr.msra.gmra.mrb[20].mxu1 %v10831_v36 }
 0x1a9   :  { %6373 = vmatpush1.bf16.msra.mxu1 %v10832_v45  ;;  %3633 = vmatprep.mubr.f32.mxu1 %v10506_v38  ;;  %v10853_v45 = vld [vmem:[#allocation38_spill] sm:$0xff] }
 0x1aa   :  { %5983 = vmatmul.mubr.f32.vlgmr.msra.gmra.mrb[20].mxu0 %v10831_v36  ;;  %6375 = vmatprep.subr.bf16.mxu1 %v10833_v20  ;;  %v10852_v36 = vpack.c.bf16 %v10850_v47, %v10851_v18  ;;  %v10854_v20 = vld [vmem:[#allocation61_spill] sm:$0xff] }
 0x1ab   :  { %6441 = vmatpush3.bf16.msra.mxu0 %v10834_v0  ;;  %5985 = vmatprep.mubr.msk.f32.mxu0 %vm6830_vm11, %v10506_v38  ;;  %v10855_v0 = vpack.c.bf16 %v10853_v45, %v10854_v20  ;;  %v10866_v20 = vld [vmem:[#allocation36_spill] sm:$0xff] }
 0x1ac   :  { %6442 = vmatprep.subr.bf16.mxu0 %v6829_v4  ;;  %3639 = vmatmul.mubr.f32.gmra.mrb[22].mxu1 %v10835_v52 }
 0x1ad   :  { %6377 = vmatpush1.bf16.msra.mxu1 %v10836_v7  ;;  %3644 = vmatprep.mubr.f32.mxu1 %v10506_v38 }
 0x1ae   :  { %5986 = vmatmul.mubr.f32.gmra.mrb[22].mxu0 %v10835_v52  ;;  %6379 = vmatprep.subr.bf16.mxu1 %v9247_v61  ;;  %v4529_v61 = vsub.f32 %v9538_v6, %v4528_v25  ;;  %v10856_v52 = vld [vmem:[#allocation52_spill] sm:$0xff] }
 0x1af   :  { %6444 = vmatpush3.bf16.msra.mxu0 %v10837_v3  ;;  %5988 = vmatprep.mubr.msk.f32.mxu0 %vm6830_vm11, %v10506_v38  ;;  %v10858_v7 = vpack.c.bf16 %v10856_v52, %v10857_v46  ;;  %v10859_v3 = vld [vmem:[#allocation32_spill] sm:$0xff] }
 0x1b0   :  { %6445 = vmatprep.subr.bf16.mxu0 %v6829_v4  ;;  %3650 = vmatmul.mubr.f32.gmra.mrb[24].mxu1 %v10838_v10 }
 0x1b1   :  { %6381 = vmatpush1.bf16.msra.mxu1 %v9301_v37  ;;  %3655 = vmatprep.mubr.f32.mxu1 %v10506_v38  ;;  %v4530_v37 = vand.u32 4294901760, %v4529_v61  ;;  %v10863_v61 = vpack.c.bf16 %v9287_v59, %v9281_v60 }
 0x1b2   :  { %5989 = vmatmul.mubr.f32.gmra.mrb[24].mxu0 %v10838_v10  ;;  %3755 = vmatprep.subr.mxu1 %v3754_v29  ;;  %v10861_v10 = vpack.c.bf16 %v10859_v3, %v10860_v62  ;;  %v10862_v29 = vpack.c.bf16 %v9229_v24, %v9220_v16 }
 0x1b3   :  { %6447 = vmatpush3.bf16.msra.mxu0 %v9355_v53  ;;  %5991 = vmatprep.mubr.msk.f32.mxu0 %vm6830_vm11, %v10506_v38  ;;  %v10843_v53 = vld [vmem:[#allocation55_spill] sm:$0xff] }
 0x1b4   :  { %6009 = vmatprep.subr.mxu0 %v10506_v38  ;;  %3661 = vmatmul.mubr.f32.gmra.mrb[26].mxu1 %v10839_v55 }
 0x1b5   :  { %3761 = vmatpush1.msra.mxu1 %v3760_v2  ;;  %3666 = vmatprep.mubr.f32.mxu1 %v10506_v38 }
 0x1b6   :  { %5992 = vmatmul.mubr.f32.gmra.mrb[26].mxu0 %v10839_v55  ;;  %6383 = vmatprep.subr.bf16.mxu1 %v10842_v8  ;;  %v10864_v55 = vld [vmem:[#allocation24_spill] sm:$0xff] }
 0x1b7   :  { %6010 = vmatpush3.msra.mxu0 %v4530_v37  ;;  %5994 = vmatprep.mubr.msk.f32.mxu0 %vm6830_vm11, %v10506_v38 }
 0x1b8   :  { %3672 = vmatmul.mubr.f32.gmra.mrb[28].mxu1 %v10843_v53  ;;  %6448 = vmatprep.subr.bf16.mxu0 %v6829_v4 }
 0x1b9   :  { %3812 = vmatprep.mubr.f32.mxu1 %v10506_v38 }
 0x1ba   :  { %5995 = vmatmul.mubr.f32.gmra.mrb[28].mxu0 %v10843_v53 }
 0x1bb   :  { %6011 = vmatprep.mubr.msk.f32.mxu0 %vm6830_vm11, %v10506_v38 }
 0x1bc   :  { %3814 = vmatmul.mubr.f32.vlgmr.msra.gmra.mrb[20].mxu1 %v10566_v34 }
 0x1bd   :  { %6385 = vmatpush1.bf16.msra.mxu1 %v10846_v26  ;;  %3819 = vmatprep.mubr.f32.mxu1 %v10506_v38 }
 0x1be   :  { %6012 = vmatmul.mubr.f32.vlgmr.msra.gmra.mrb[20].mxu0 %v10566_v34  ;;  %6387 = vmatprep.subr.bf16.mxu1 %v10849_v31  ;;  %v9880_v32 = vpop.permute.xlu0 %5435 }
 0x1bf   :  { %6450 = vmatpush3.bf16.msra.mxu0 %v10852_v36  ;;  %6014 = vmatprep.mubr.msk.f32.mxu0 %vm6830_vm11, %v10506_v38 }
 0x1c0   :  { %6451 = vmatprep.subr.bf16.mxu0 %v6829_v4  ;;  %3821 = vmatmul.mubr.f32.gmra.mrb[22].mxu1 %v10691_v11  ;;  %v1493_v24 = vpop.f32.mrb[0].mxu1  ;;  %v1877_v16 = vpop.f32.mrb[0].mxu0 }
 0x1c1   :  { %6389 = vmatpush1.bf16.msra.mxu1 %v10855_v0  ;;  %3826 = vmatprep.mubr.f32.mxu1 %v10506_v38  ;;  %v9649_v60 = vadd.f32 %v1877_v16, %v1493_v24  ;;  %v1495_v59 = vpop.f32.mrb[1].mxu1  ;;  %v1879_v2 = vpop.f32.mrb[1].mxu0 }
 0x1c2   :  { %6015 = vmatmul.mubr.f32.gmra.mrb[22].mxu0 %v10691_v11  ;;  %6391 = vmatprep.subr.bf16.mxu1 %v10858_v7  ;;  %v9652_v37 = vadd.f32 %v1879_v2, %v1495_v59  ;;  %v10870_v59 = vld [vmem:[#allocation9_spill] sm:$0xff] }
 0x1c3   :  { %6453 = vmatpush3.bf16.msra.mxu0 %v10861_v10  ;;  %6017 = vmatprep.mubr.msk.f32.mxu0 %vm6830_vm11, %v10506_v38 }
 0x1c4   :  { %6454 = vmatprep.subr.bf16.mxu0 %v6829_v4  ;;  %3828 = vmatmul.mubr.f32.gmra.mrb[24].mxu1 %v10708_v63  ;;  %v1501_v48 = vpop.f32.mrb[2].mxu1  ;;  %v1884_v43 = vpop.f32.mrb[2].mxu0 }
 0x1c5   :  { %6393 = vmatpush1.bf16.msra.mxu1 %v10862_v29  ;;  %3833 = vmatprep.mubr.f32.mxu1 %v10506_v38  ;;  %v9667_v8 = vadd.f32 %v1884_v43, %v1501_v48  ;;  %v1503_v53 = vpop.f32.mrb[3].mxu1  ;;  %v1886_v49 = vpop.f32.mrb[3].mxu0 }
 0x1c6   :  { %6018 = vmatmul.mubr.f32.gmra.mrb[24].mxu0 %v10708_v63  ;;  %3886 = vmatprep.subr.mxu1 %v9522_v15  ;;  %v9671_v26 = vadd.f32 %v1886_v49, %v1503_v53 }
 0x1c7   :  { %6456 = vmatpush3.bf16.msra.mxu0 %v10863_v61  ;;  %6020 = vmatprep.mubr.msk.f32.mxu0 %vm6830_vm11, %v10506_v38  ;;  %v5057_v57 = vadd.f32 %v9667_v8, %v9649_v60  ;;  %v10868_v61 = vld [vmem:[#allocation37_spill] sm:$0xff] }
 0x1c8   :  { %6038 = vmatprep.subr.mxu0 %v10506_v38  ;;  %3835 = vmatmul.mubr.f32.gmra.mrb[26].mxu1 %v10716_v1  ;;  %v5069_v54 = vadd.f32 %v9671_v26, %v9652_v37  ;;  %v1509_v31 = vpop.f32.mrb[4].mxu1  ;;  %v1891_v47 = vpop.f32.mrb[4].mxu0 }
 0x1c9   :  { %3889 = vmatpush1.msra.mxu1 %v9532_v30  ;;  %3840 = vmatprep.mubr.f32.mxu1 %v10506_v38  ;;  %v9690_v18 = vadd.f32 %v1891_v47, %v1509_v31  ;;  %v1511_v36 = vpop.f32.mrb[5].mxu1  ;;  %v1893_v45 = vpop.f32.mrb[5].mxu0 }
 0x1ca   :  { %6021 = vmatmul.mubr.f32.gmra.mrb[26].mxu0 %v10716_v1  ;;  %6395 = vmatprep.subr.msk.bf16.mxu1 %vm10817_vm7, %v10501_v5  ;;  %v9694_v0 = vadd.f32 %v1893_v45, %v1511_v36  ;;  %v10871_v45 = vld [vmem:[#allocation47_spill] sm:$0xff] }
 0x1cb   :  { %6039 = vmatpush3.msra.mxu0 %v9538_v6  ;;  %6023 = vmatprep.mubr.msk.f32.mxu0 %vm6830_vm11, %v10506_v38  ;;  %v5058_v52 = vadd.f32 %v9690_v18, %v5057_v57 }
 0x1cc   :  { %3842 = vmatmul.mubr.f32.gmra.mrb[28].mxu1 %v10724_v19  ;;  %6457 = vmatprep.subr.bf16.mxu0 %v6829_v4  ;;  %v5070_v46 = vadd.f32 %v9694_v0, %v5069_v54  ;;  %v1517_v7 = vpop.f32.mrb[6].mxu1  ;;  %v1898_v3 = vpop.f32.mrb[6].mxu0 }
 0x1cd   :  { %3940 = vmatprep.mubr.f32.mxu1 %v10506_v38  ;;  %v9710_v62 = vadd.f32 %v1898_v3, %v1517_v7  ;;  %v1519_v10 = vpop.f32.mrb[7].mxu1  ;;  %v1900_v29 = vpop.f32.mrb[7].mxu0 }
 0x1ce   :  { %6024 = vmatmul.mubr.f32.gmra.mrb[28].mxu0 %v10724_v19  ;;  %v9714_v24 = vadd.f32 %v1900_v29, %v1519_v10  ;;  %v10874_v10 = vld [vmem:[#allocation66_spill] sm:$0xff] }
 0x1cf   :  { %6040 = vmatprep.mubr.msk.f32.mxu0 %vm6830_vm11, %v10506_v38  ;;  %v5059_v16 = vadd.f32 %v9710_v62, %v5058_v52  ;;  %v10872_v52 = vld [vmem:[#allocation62_spill] sm:$0xff] }
 0x1d0   :  { %3943 = vmatmul.mubr.f32.vlgmr.msra.gmra.mrb[20].mxu1 %v10864_v55  ;;  %v5071_v2 = vadd.f32 %v9714_v24, %v5070_v46  ;;  %v1905_v48 = vpop.f32.mrb[8].mxu0  ;;  %v10873_v46 = vld [vmem:[#allocation58_spill] sm:$0xff] }
 0x1d1   :  { %6397 = vmatpush1.bf16.msk.msra.mxu1 %vm10819_vm8, %v10501_v5  ;;  %3948 = vmatprep.mubr.f32.mxu1 %v10506_v38  ;;  %v1907_v49 = vpop.f32.mrb[9].mxu0 }
 0x1d2   :  { %6041 = vmatmul.mubr.f32.vlgmr.msra.gmra.mrb[20].mxu0 %v10864_v55  ;;  %6399 = vmatprep.subr.msk.bf16.mxu1 %vm10820_vm10, %v10501_v5  ;;  %v1525_v55 = vpop.f32.mrb[8].mxu1 }
 0x1d3   :  { %6459 = vmatpush3.bf16.msk.msra.mxu0 %vm10821_vm9, %v10501_v5  ;;  %6043 = vmatprep.mubr.msk.f32.mxu0 %vm6830_vm11, %v10506_v38  ;;  %v6492_v43 = vadd.f32 %v1905_v48, %v1525_v55  ;;  %v1527_v53 = vpop.f32.mrb[9].mxu1  ;;  %v10877_v55 = vld [vmem:[#allocation23_spill] sm:$0xff] }
 0x1d4   :  { %6460 = vmatprep.subr.bf16.mxu0 %v6829_v4  ;;  %3951 = vmatmul.mubr.f32.gmra.mrb[22].mxu1 %v10865_v39 }
 0x1d5   :  { %6401 = vmatpush1.bf16.msk.msra.mxu1 %vm10822_vm12, %v10501_v5  ;;  %3956 = vmatprep.mubr.f32.mxu1 %v10506_v38  ;;  %v5061_v57 = vsel %vm5060_vm15, %v6492_v43, 0.0 }
 0x1d6   :  { %6044 = vmatmul.mubr.f32.gmra.mrb[22].mxu0 %v10865_v39  ;;  %6403 = vmatprep.subr.msk.bf16.mxu1 %vm10823_vm5, %v10501_v5  ;;  %v9729_v39 = vadd.f32 %v1907_v49, %v1527_v53  ;;  %v5062_v54 = vadd.f32 %v5061_v57, %v5059_v16  ;;  %v10876_v16 = vld [vmem:[#allocation33_spill] sm:$0xff] }
 0x1d7   :  { %6462 = vmatpush3.bf16.msk.msra.mxu0 %vm10824_vm1, %v10501_v5  ;;  %6046 = vmatprep.mubr.msk.f32.mxu0 %vm6830_vm11, %v10506_v38 }
 0x1d8   :  { %6463 = vmatprep.subr.bf16.mxu0 %v6829_v4  ;;  %3959 = vmatmul.mubr.f32.gmra.mrb[24].mxu1 %v10866_v20  ;;  %v5072_v31 = vsel %vm5060_vm15, %v9729_v39, 0.0  ;;  %v5063_v36 = vrot.slane %v5062_v54, 4 }
 0x1d9   :  { %6405 = vmatpush1.bf16.msk.msra.mxu1 %vm10825_vm2, %v10501_v5  ;;  %3964 = vmatprep.mubr.f32.mxu1 %v10506_v38  ;;  %v5073_v47 = vadd.f32 %v5072_v31, %v5071_v2 }
 0x1da   :  { %6047 = vmatmul.mubr.f32.gmra.mrb[24].mxu0 %v10866_v20  ;;  %5859 = vmatprep.subr.msk.mxu1 %vm10867_vm3, %v9490_v12 }
 0x1db   :  { %6465 = vmatpush3.bf16.msk.msra.mxu0 %vm9277_vm6, %v10501_v5  ;;  %6049 = vmatprep.mubr.msk.f32.mxu0 %vm6830_vm11, %v10506_v38  ;;  %v5074_v20 = vrot.slane %v5073_v47, 4 }
 0x1dc   :  { %6067 = vmatprep.subr.mxu0 %v10506_v38  ;;  %3967 = vmatmul.mubr.f32.gmra.mrb[26].mxu1 %v10868_v61 }
 0x1dd   :  { %5860 = vmatpush1.msk.msra.mxu1 %vm10869_vm14, %v9507_v40  ;;  %3972 = vmatprep.mubr.f32.mxu1 %v10506_v38  ;;  %v5075_v7 = vadd.f32 %v5074_v20, %v5073_v47 }
 0x1de   :  { %6050 = vmatmul.mubr.f32.gmra.mrb[26].mxu0 %v10868_v61  ;;  %6407 = vmatprep.subr.bf16.mxu1 %v10870_v59 }
 0x1df   :  { %6068 = vmatpush3.msk.msra.mxu0 %vm10828_vm0, %v9516_v13  ;;  %6052 = vmatprep.mubr.msk.f32.mxu0 %vm6830_vm11, %v10506_v38  ;;  %v5076_v29 = vrot.slane %v5075_v7, 2 }
 0x1e0   :  { %3975 = vmatmul.mubr.f32.gmra.mrb[28].mxu1 %v10780_v56  ;;  %6466 = vmatprep.subr.bf16.mxu0 %v6829_v4 }
 0x1e1   :  { %4059 = vmatprep.mubr.f32.mxu1 %v10506_v38  ;;  %v5077_v59 = vadd.f32 %v5076_v29, %v5075_v7 }
 0x1e2   :  { %6053 = vmatmul.mubr.f32.gmra.mrb[28].mxu0 %v10780_v56  ;;  %v5064_v56 = vadd.f32 %v5063_v36, %v5062_v54 }
 0x1e3   :  { %6069 = vmatprep.mubr.msk.f32.mxu0 %vm6830_vm11, %v10506_v38  ;;  %v5078_v48 = vrot.slane %v5077_v59, 1 }
 0x1e4   :  { %4063 = vmatmul.mubr.f32.vlgmr.msra.gmra.mrb[20].mxu1 %v10782_v58  ;;  %v5065_v3 = vrot.slane %v5064_v56, 2 }
 0x1e5   :  { %6409 = vmatpush1.bf16.msra.mxu1 %v10871_v45  ;;  %4068 = vmatprep.mubr.f32.mxu1 %v10506_v38  ;;  %v5079_v53 = vadd.f32 %v5078_v48, %v5077_v59 }
 0x1e6   :  { %6070 = vmatmul.mubr.f32.vlgmr.msra.gmra.mrb[20].mxu0 %v10782_v58  ;;  %6411 = vmatprep.subr.bf16.mxu1 %v10872_v52  ;;  %v10875_v58 = vld [vmem:[#allocation19_spill] sm:$0xff]  ;;  %v5066_v61 = vadd.f32 %v5065_v3, %v5064_v56 }
 0x1e7   :  { %6468 = vmatpush3.bf16.msra.mxu0 %v10873_v46  ;;  %6072 = vmatprep.mubr.msk.f32.mxu0 %vm6830_vm11, %v10506_v38 }
 0x1e8   :  { %6469 = vmatprep.subr.bf16.mxu0 %v6829_v4  ;;  %4072 = vmatmul.mubr.f32.gmra.mrb[22].mxu1 %v10790_v14  ;;  %v5067_v2 = vrot.slane %v5066_v61, 1 }
 0x1e9   :  { %6413 = vmatpush1.bf16.msra.mxu1 %v10874_v10  ;;  %4077 = vmatprep.mubr.f32.mxu1 %v10506_v38  ;;  %v9895_v10 = vpop.permute.xlu0 %5440 }
 0x1ea   :  { %6073 = vmatmul.mubr.f32.gmra.mrb[22].mxu0 %v10790_v14  ;;  %6415 = vmatprep.subr.bf16.mxu1 %v10875_v58  ;;  %v5068_v14 = vadd.f32 %v5067_v2, %v5066_v61 }
 0x1eb   :  { %6471 = vmatpush3.bf16.msra.mxu0 %v10876_v16  ;;  %6075 = vmatprep.mubr.msk.f32.mxu0 %vm6830_vm11, %v10506_v38 }
 0x1ec   :  { %6472 = vmatprep.subr.bf16.mxu0 %v6829_v4  ;;  %4081 = vmatmul.mubr.f32.gmra.mrb[24].mxu1 %v10799_v22  ;;  %v5158_v49 = vmul.f32 0.030303031, %v5068_v14 }
 0x1ed   :  { %6417 = vmatpush1.bf16.msra.mxu1 %v10877_v55  ;;  %4086 = vmatprep.mubr.f32.mxu1 %v10506_v38  ;;  %v9907_v59 = vpop.permute.xlu0 %5455 }
 0x1ee   :  { %6076 = vmatmul.mubr.f32.gmra.mrb[24].mxu0 %v10799_v22  ;;  %4156 = vmatprep.subr.mxu1 %v3752_v42  ;;  %v5159_v22 = vmul.f32 0.030303031, %v5079_v53  ;;  %v9778_v15 = vsub.f32 %v9667_v8, %v5158_v49  ;;  %v9781_v42 = vsub.f32 %v9690_v18, %v5158_v49  ;;  %v9790_v28 = vsub.f32 %v6492_v43, %v5158_v49 }
 0x1ef   :  { %6474 = vmatpush3.bf16.msra.mxu0 %v9338_v21  ;;  %6078 = vmatprep.mubr.msk.f32.mxu0 %vm6830_vm11, %v10506_v38  ;;  %v9775_v21 = vsub.f32 %v9649_v60, %v5158_v49 }
 0x1f0   :  { %6096 = vmatprep.subr.mxu0 %v10506_v38  ;;  %4090 = vmatmul.mubr.f32.gmra.mrb[26].mxu1 %v10805_v51  ;;  %v9793_v30 = vsub.f32 %v9652_v37, %v5159_v22  ;;  %v5221_v6 = vmul.f32 %v9778_v15, %v9778_v15  ;;  %v9805_v60 = vsub.f32 %v9671_v26, %v5159_v22 }
 0x1f1   :  { %4160 = vmatpush1.msra.mxu1 %v3758_v35  ;;  %4095 = vmatprep.mubr.f32.mxu1 %v10506_v38  ;;  %v5212_v35 = vmul.f32 %v9775_v21, %v9775_v21  ;;  %v9808_v37 = vsub.f32 %v9694_v0, %v5159_v22  ;;  %v9812_v18 = vsub.f32 %v9714_v24, %v5159_v22 }
 0x1f2   :  { %6079 = vmatmul.mubr.f32.gmra.mrb[26].mxu0 %v10805_v51  ;;  %6419 = vmatprep.subr.msk.bf16.mxu1 %vm10817_vm7, %v10501_v5  ;;  %v9788_v51 = vsub.f32 %v9710_v62, %v5158_v49  ;;  %v9815_v62 = vsub.f32 %v9729_v39, %v5159_v22  ;;  %v5213_v43 = vmul.f32 %v9793_v30, %v9793_v30  ;;  %vm10878_vm7 = vmmov %vm10828_vm0 }
 0x1f3   :  { %6097 = vmatpush3.msra.mxu0 %v4528_v25  ;;  %6081 = vmatprep.mubr.msk.f32.mxu0 %vm6830_vm11, %v10506_v38  ;;  %v5230_v25 = vmul.f32 %v9781_v42, %v9781_v42  ;;  %v5257_v8 = vadd.f32 %v5221_v6, %v5212_v35  ;;  %v5248_v26 = vmul.f32 %v9790_v28, %v9790_v28 }
 0x1f4   :  { %4099 = vmatmul.mubr.f32.gmra.mrb[28].mxu1 %v10808_v44  ;;  %6475 = vmatprep.subr.bf16.mxu0 %v6829_v4  ;;  %v5222_v0 = vmul.f32 %v9805_v60, %v9805_v60  ;;  %v5231_v39 = vmul.f32 %v9808_v37, %v9808_v37  ;;  %v5249_v31 = vmul.f32 %v9815_v62, %v9815_v62 }
 0x1f5   :  { %4211 = vmatprep.mubr.f32.mxu1 %v10506_v38  ;;  %v5258_v24 = vadd.f32 %v5257_v8, %v5230_v25  ;;  %v5260_v33 = vsel %vm5060_vm15, %v5248_v26, 0.0  ;;  %v5240_v47 = vmul.f32 %v9812_v18, %v9812_v18 }
 0x1f6   :  { %6082 = vmatmul.mubr.f32.gmra.mrb[28].mxu0 %v10808_v44  ;;  %v5239_v44 = vmul.f32 %v9788_v51, %v9788_v51  ;;  %v5268_v57 = vadd.f32 %v5222_v0, %v5213_v43  ;;  %v5271_v20 = vsel %vm5060_vm15, %v5249_v31, 0.0 }
 0x1f7   :  { %6098 = vmatprep.mubr.msk.f32.mxu0 %vm6830_vm11, %v10506_v38 }
 0x1f8   :  { %4213 = vmatmul.mubr.f32.vlgmr.msra.gmra.mrb[20].mxu1 %v10566_v34  ;;  %v5259_v54 = vadd.f32 %v5258_v24, %v5239_v44  ;;  %v5269_v36 = vadd.f32 %v5268_v57, %v5231_v39 }
 0x1f9   :  { %6421 = vmatpush1.bf16.msk.msra.mxu1 %vm10819_vm8, %v10501_v5  ;;  %4218 = vmatprep.mubr.f32.mxu1 %v10506_v38  ;;  %vm10879_vm8 = vmmov %vm10828_vm0 }
 0x1fa   :  { %6099 = vmatmul.mubr.f32.vlgmr.msra.gmra.mrb[20].mxu0 %v10566_v34  ;;  %6423 = vmatprep.subr.msk.bf16.mxu1 %vm10820_vm10, %v10501_v5  ;;  %v5261_v41 = vadd.f32 %v5260_v33, %v5259_v54  ;;  %v5270_v50 = vadd.f32 %v5269_v36, %v5240_v47 }
 0x1fb   :  { %6477 = vmatpush3.bf16.msk.msra.mxu0 %vm10821_vm9, %v10501_v5  ;;  %6101 = vmatprep.mubr.msk.f32.mxu0 %vm6830_vm11, %v10506_v38 }
 0x1fc   :  { %6478 = vmatprep.subr.bf16.mxu0 %v6829_v4  ;;  %4220 = vmatmul.mubr.f32.gmra.mrb[22].mxu1 %v10691_v11  ;;  %v5262_v45 = vrot.slane %v5261_v41, 4  ;;  %v5272_v27 = vadd.f32 %v5271_v20, %v5270_v50 }
 0x1fd   :  { %6425 = vmatpush1.bf16.msk.msra.mxu1 %vm10822_vm12, %v10501_v5  ;;  %4225 = vmatprep.mubr.f32.mxu1 %v10506_v38 }
 0x1fe   :  { %6102 = vmatmul.mubr.f32.gmra.mrb[22].mxu0 %v10691_v11  ;;  %6427 = vmatprep.subr.msk.bf16.mxu1 %vm10823_vm5, %v10501_v5  ;;  %v5263_v52 = vadd.f32 %v5262_v45, %v5261_v41  ;;  %v5273_v56 = vrot.slane %v5272_v27, 4 }
 0x1ff   :  { %6480 = vmatpush3.bf16.msk.msra.mxu0 %vm10824_vm1, %v10501_v5  ;;  %6104 = vmatprep.mubr.msk.f32.mxu0 %vm6830_vm11, %v10506_v38 }
 0x200   :  { %6481 = vmatprep.subr.bf16.mxu0 %v6829_v4  ;;  %4227 = vmatmul.mubr.f32.gmra.mrb[24].mxu1 %v10708_v63  ;;  %v5264_v9 = vrot.slane %v5263_v52, 2  ;;  %v5274_v17 = vadd.f32 %v5273_v56, %v5272_v27 }
 0x201   :  { %6429 = vmatpush1.bf16.msk.msra.mxu1 %vm10825_vm2, %v10501_v5  ;;  %4232 = vmatprep.mubr.f32.mxu1 %v10506_v38 }
 0x202   :  { %6105 = vmatmul.mubr.f32.gmra.mrb[24].mxu0 %v10708_v63  ;;  %5873 = vmatprep.subr.msk.mxu1 %vm10878_vm7, %v9490_v12  ;;  %v5265_v4 = vadd.f32 %v5264_v9, %v5263_v52  ;;  %v5275_v46 = vrot.slane %v5274_v17, 2  ;;  %v9885_v12 = vpop.permute.xlu1 %5445 }
 0x203   :  { %6483 = vmatpush3.bf16.msk.msra.mxu0 %vm9277_vm6, %v10501_v5  ;;  %6107 = vmatprep.mubr.msk.f32.mxu0 %vm6830_vm11, %v10506_v38  ;;  %vm10880_vm6 = vmmov %vm10828_vm0 }
 0x204   :  { %6125 = vmatprep.subr.mxu0 %v10506_v38  ;;  %4234 = vmatmul.mubr.f32.gmra.mrb[26].mxu1 %v10716_v1  ;;  %v5266_v23 = vrot.slane %v5265_v4, 1  ;;  %v5276_v5 = vadd.f32 %v5275_v46, %v5274_v17 }
 0x205   :  { %5874 = vmatpush1.msk.msra.mxu1 %vm10879_vm8, %v9507_v40  ;;  %4239 = vmatprep.mubr.f32.mxu1 %v10506_v38 }
 0x206   :  { %6108 = vmatmul.mubr.f32.gmra.mrb[26].mxu0 %v10716_v1  ;;  %v5267_v7 = vadd.f32 %v5266_v23, %v5265_v4  ;;  %v5277_v3 = vrot.slane %v5276_v5, 1  ;;  %v9899_v58 = vpop.permute.xlu1 %5450 }
 0x207   :  { %6126 = vmatpush3.msk.msra.mxu0 %vm10880_vm6, %v9516_v13  ;;  %6110 = vmatprep.mubr.msk.f32.mxu0 %vm6830_vm11, %v10506_v38 }
 0x208   :  { %4241 = vmatmul.mubr.f32.gmra.mrb[28].mxu1 %v10724_v19  ;;  %v5356_v40 = vmul.f32 0.030303031, %v5267_v7  ;;  %v5278_v29 = vadd.f32 %v5277_v3, %v5276_v5 }
 0x209   :  { %4325 = vmatprep.mubr.f32.mxu1 %v10506_v38 }
 0x20a   :  { %6111 = vmatmul.mubr.f32.gmra.mrb[28].mxu0 %v10724_v19  ;;  %v5365_v13 = vadd.f32 1e-05, %v5356_v40  ;;  %v5357_v61 = vmul.f32 0.030303031, %v5278_v29  ;;  %v9910_v2 = vpop.permute.xlu1 %5510 }
 0x20b   :  { %6127 = vmatprep.mubr.msk.f32.mxu0 %vm6830_vm11, %v10506_v38 }
 0x20c   :  { %4327 = vmatmul.mubr.f32.vlgmr.msra.gmra.mrb[20].mxu1 %v10566_v34  ;;  %6766 = vrsqrt.f32 %v5365_v13  ;;  %v5366_v16 = vadd.f32 1e-05, %v5357_v61 }
 0x20d   :  { %4332 = vmatprep.mubr.f32.mxu1 %v10506_v38 }
 0x20e   :  { %6128 = vmatmul.mubr.f32.vlgmr.msra.gmra.mrb[20].mxu0 %v10566_v34  ;;  %6768 = vrsqrt.f32 %v5366_v16  ;;  %v9918_v34 = vpop.permute.xlu0 %5515  ;;  %v9922_v55 = vpop.permute.xlu1 %5520 }
 0x20f   :  { %6130 = vmatprep.mubr.msk.f32.mxu0 %vm6830_vm11, %v10506_v38 }
 0x210   :  { %4334 = vmatmul.mubr.f32.gmra.mrb[22].mxu1 %v10691_v11 }
 0x211   :  { %4339 = vmatprep.mubr.f32.mxu1 %v10506_v38 }
 0x212   :  { %6131 = vmatmul.mubr.f32.gmra.mrb[22].mxu0 %v10691_v11  ;;  %v9943_v25 = vpop.permute.xlu0 %5525  ;;  %v9949_v0 = vpop.permute.xlu1 %5530 }
 0x213   :  { %6133 = vmatprep.mubr.msk.f32.mxu0 %vm6830_vm11, %v10506_v38 }
 0x214   :  { %4341 = vmatmul.mubr.f32.gmra.mrb[24].mxu1 %v10708_v63 }
 0x215   :  { %4346 = vmatprep.mubr.f32.mxu1 %v10506_v38 }
 0x216   :  { %6134 = vmatmul.mubr.f32.gmra.mrb[24].mxu0 %v10708_v63  ;;  %v6767_v48 = vpop.eup %6766 }
 0x217   :  { %6136 = vmatprep.mubr.msk.f32.mxu0 %vm6830_vm11, %v10506_v38  ;;  %v5383_v11 = vmul.f32 %v6767_v48, %v9775_v21  ;;  %v5392_v14 = vmul.f32 %v6767_v48, %v9778_v15  ;;  %v5401_v53 = vmul.f32 %v6767_v48, %v9781_v42  ;;  %v5410_v49 = vmul.f32 %v6767_v48, %v9788_v51 }
 0x218   :  { %4348 = vmatmul.mubr.f32.gmra.mrb[26].mxu1 %v10716_v1  ;;  %v5419_v63 = vmul.f32 %v6767_v48, %v9790_v28  ;;  %v6769_v22 = vpop.eup %6768 }
 0x219   :  { %4353 = vmatprep.mubr.f32.mxu1 %v10506_v38  ;;  %v5476_v35 = vmul.f32 %v9885_v12, %v5401_v53  ;;  %v5458_v21 = vmul.f32 %v9880_v32, %v5383_v11  ;;  %v5467_v15 = vmul.f32 %v9895_v10, %v5392_v14  ;;  %v5485_v42 = vmul.f32 %v9899_v58, %v5410_v49 }
 0x21a   :  { %6137 = vmatmul.mubr.f32.gmra.mrb[26].mxu0 %v10716_v1  ;;  %v5384_v51 = vmul.f32 %v6769_v22, %v9793_v30  ;;  %v5393_v6 = vmul.f32 %v6769_v22, %v9805_v60  ;;  %v5402_v28 = vmul.f32 %v6769_v22, %v9808_v37  ;;  %v5411_v1 = vmul.f32 %v6769_v22, %v9812_v18 }
 0x21b   :  { %6139 = vmatprep.mubr.msk.f32.mxu0 %vm6830_vm11, %v10506_v38  ;;  %v5420_v38 = vmul.f32 %v6769_v22, %v9815_v62  ;;  %v5533_v8 = vadd.f32 %v9910_v2, %v5458_v21  ;;  %v5551_v43 = vadd.f32 %v9922_v55, %v5476_v35  ;;  %v5542_v26 = vadd.f32 %v9918_v34, %v5467_v15 }
 0x21c   :  { %4355 = vmatmul.mubr.f32.gmra.mrb[28].mxu1 %v10724_v19  ;;  %v5477_v30 = vmul.f32 %v9885_v12, %v5402_v28  ;;  %v5459_v60 = vmul.f32 %v9880_v32, %v5384_v51  ;;  %v5468_v37 = vmul.f32 %v9895_v10, %v5393_v6  ;;  %v5494_v18 = vmul.f32 %v9907_v59, %v5419_v63 }
 0x21d   :  { %5578 = vst [vmem:[#allocation4] sm:$0xff] %v5533_v8  ;;  %5596 = vst [vmem:[#allocation4 + $0x90] sm:$0xff] %v5551_v43  ;;  %v5495_v62 = vmul.f32 %v9907_v59, %v5420_v38  ;;  %v5486_v44 = vmul.f32 %v9899_v58, %v5411_v1  ;;  %v5560_v24 = vadd.f32 %v9943_v25, %v5485_v42 }
 0x21e   :  { %6140 = vmatmul.mubr.f32.gmra.mrb[28].mxu0 %v10724_v19  ;;  %5587 = vst [vmem:[#allocation4 + $0x48] sm:$0xff] %v5542_v26  ;;  %v5534_v39 = vadd.f32 %v9910_v2, %v5459_v60  ;;  %v5552_v19 = vadd.f32 %v9922_v55, %v5477_v30  ;;  %v5543_v57 = vadd.f32 %v9918_v34, %v5468_v37 }
 0x21f   :  { %v5569_v54 = vadd.f32 %v9949_v0, %v5494_v18  ;;  %v5570_v31 = vadd.f32 %v9949_v0, %v5495_v62  ;;  %v5561_v33 = vadd.f32 %v9943_v25, %v5486_v44  ;;  %5605 = vst [vmem:[#allocation4 + $0xd8] sm:$0xff] %v5560_v24 }
 0x220   :  { %5579 = vst [vmem:[#allocation4 + $0x8] sm:$0xff] %v5534_v39  ;;  %5597 = vst [vmem:[#allocation4 + $0x98] sm:$0xff] %v5552_v19 }
 0x221   :  { %5588 = vst [vmem:[#allocation4 + $0x50] sm:$0xff] %v5543_v57  ;;  %5614 = vst [vmem:[#allocation4 + $0x120] sm:$0x1] %v5569_v54 }
 0x222   :  { %5615 = vst [vmem:[#allocation4 + $0x128] sm:$0x1] %v5570_v31  ;;  %5606 = vst [vmem:[#allocation4 + $0xe0] sm:$0xff] %v5561_v33 }
 0x267   :  { %v9965_v47 = vpop.f32.mrb[10].mxu1 }
 0x268   :  { %v9967_v36 = vpop.f32.mrb[11].mxu1 }
 0x269   :  { %v9969_v41 = vpop.f32.mrb[10].mxu0 }
 0x26a   :  { %v9971_v50 = vpop.f32.mrb[11].mxu0 }
 0x26b   :  { %v2701_v45 = vpop.f32.mrb[12].mxu1 }
 0x26c   :  { %v5080_v20 = vadd.f32 %v2701_v45, %v9965_v47  ;;  %v9974_v27 = vpop.f32.mrb[13].mxu1 }
 0x26d   :  { %v9976_v52 = vpop.f32.mrb[12].mxu0  ;;  %v5091_v56 = vadd.f32 %v9974_v27, %v9967_v36 }
 0x26e   :  { %v5102_v9 = vadd.f32 %v9976_v52, %v9969_v41  ;;  %v9982_v17 = vpop.f32.mrb[13].mxu0 }
 0x26f   :  { %v5113_v4 = vadd.f32 %v9982_v17, %v9971_v50  ;;  %v2708_v46 = vpop.f32.mrb[14].mxu1 }
 0x270   :  { %v5081_v23 = vadd.f32 %v5080_v20, %v2708_v46  ;;  %v9986_v5 = vpop.f32.mrb[15].mxu1 }
 0x271   :  { %v9988_v7 = vpop.f32.mrb[14].mxu0  ;;  %v5092_v3 = vadd.f32 %v5091_v56, %v9986_v5 }
 0x272   :  { %v5103_v40 = vadd.f32 %v5102_v9, %v9988_v7  ;;  %v9992_v29 = vpop.f32.mrb[15].mxu0 }
 0x273   :  { %v5114_v13 = vadd.f32 %v5113_v4, %v9992_v29  ;;  %v2715_v61 = vpop.f32.mrb[16].mxu1 }
 0x274   :  { %v5082_v16 = vadd.f32 %v5081_v23, %v2715_v61  ;;  %v9995_v48 = vpop.f32.mrb[17].mxu1 }
 0x275   :  { %v3532_v11 = vpop.f32.mrb[16].mxu0  ;;  %v5093_v14 = vadd.f32 %v5092_v3, %v9995_v48 }
 0x276   :  { %v5104_v53 = vadd.f32 %v5103_v40, %v3532_v11  ;;  %v9998_v49 = vpop.f32.mrb[17].mxu0 }
 0x277   :  { %v5115_v63 = vadd.f32 %v5114_v13, %v9998_v49  ;;  %v2722_v22 = vpop.f32.mrb[18].mxu1 }
 0x278   :  { %v5083_v35 = vsel %vm5060_vm15, %v2722_v22, 0.0  ;;  %v10002_v21 = vpop.f32.mrb[19].mxu1 }
 0x279   :  { %v5084_v15 = vadd.f32 %v5083_v35, %v5082_v16  ;;  %v3539_v42 = vpop.f32.mrb[18].mxu0  ;;  %v5094_v51 = vsel %vm5060_vm15, %v10002_v21, 0.0 }
 0x27a   :  { %v5105_v6 = vsel %vm5060_vm15, %v3539_v42, 0.0  ;;  %v5095_v28 = vadd.f32 %v5094_v51, %v5093_v14  ;;  %v10007_v1 = vpop.f32.mrb[19].mxu0 }
 0x27b   :  { %v5085_v38 = vrot.slane %v5084_v15, 4  ;;  %v5106_v8 = vadd.f32 %v5105_v6, %v5104_v53  ;;  %v5116_v43 = vsel %vm5060_vm15, %v10007_v1, 0.0 }
 0x27c   :  { %v5096_v26 = vrot.slane %v5095_v28, 4  ;;  %v5117_v30 = vadd.f32 %v5116_v43, %v5115_v63 }
 0x27d   :  { %v5086_v60 = vadd.f32 %v5085_v38, %v5084_v15  ;;  %v5107_v37 = vrot.slane %v5106_v8, 4 }
 0x27e   :  { %v5097_v18 = vadd.f32 %v5096_v26, %v5095_v28  ;;  %v5118_v62 = vrot.slane %v5117_v30, 4 }
 0x27f   :  { %v5087_v44 = vrot.slane %v5086_v60, 2  ;;  %v5108_v24 = vadd.f32 %v5107_v37, %v5106_v8 }
 0x280   :  { %v5098_v39 = vrot.slane %v5097_v18, 2  ;;  %v5119_v19 = vadd.f32 %v5118_v62, %v5117_v30 }
 0x281   :  { %v5088_v57 = vadd.f32 %v5087_v44, %v5086_v60  ;;  %v5109_v54 = vrot.slane %v5108_v24, 2 }
 0x282   :  { %v5099_v31 = vadd.f32 %v5098_v39, %v5097_v18  ;;  %v5120_v33 = vrot.slane %v5119_v19, 2 }
 0x283   :  { %v5089_v20 = vrot.slane %v5088_v57, 1  ;;  %v5110_v56 = vadd.f32 %v5109_v54, %v5108_v24 }
 0x284   :  { %v5100_v9 = vrot.slane %v5099_v31, 1  ;;  %v5121_v4 = vadd.f32 %v5120_v33, %v5119_v19 }
 0x285   :  { %v5090_v23 = vadd.f32 %v5089_v20, %v5088_v57  ;;  %v5111_v3 = vrot.slane %v5110_v56, 1 }
 0x286   :  { %v5101_v40 = vadd.f32 %v5100_v9, %v5099_v31  ;;  %v5122_v53 = vrot.slane %v5121_v4, 1 }
 0x287   :  { %v5160_v13 = vmul.f32 0.030303031, %v5090_v23  ;;  %v5112_v16 = vadd.f32 %v5111_v3, %v5110_v56 }
 0x288   :  { %v5161_v14 = vmul.f32 0.030303031, %v5101_v40  ;;  %v5123_v18 = vadd.f32 %v5122_v53, %v5121_v4 }
 0x289   :  { %v10012_v63 = vsub.f32 %v9965_v47, %v5160_v13  ;;  %v10014_v35 = vsub.f32 %v2701_v45, %v5160_v13  ;;  %v10016_v15 = vsub.f32 %v2708_v46, %v5160_v13  ;;  %v10018_v51 = vsub.f32 %v2715_v61, %v5160_v13 }
 0x28a   :  { %v10020_v6 = vsub.f32 %v2722_v22, %v5160_v13  ;;  %v5162_v28 = vmul.f32 0.030303031, %v5112_v16  ;;  %v10023_v38 = vsub.f32 %v9967_v36, %v5161_v14  ;;  %v10026_v8 = vsub.f32 %v9974_v27, %v5161_v14 }
 0x28b   :  { %v5214_v43 = vmul.f32 %v10012_v63, %v10012_v63  ;;  %v5223_v47 = vmul.f32 %v10014_v35, %v10014_v35  ;;  %v5232_v45 = vmul.f32 %v10016_v15, %v10016_v15  ;;  %v10050_v60 = vsub.f32 %v9986_v5, %v5161_v14 }
 0x28c   :  { %v5250_v46 = vmul.f32 %v10020_v6, %v10020_v6  ;;  %v10037_v61 = vsub.f32 %v9969_v41, %v5162_v28  ;;  %v10040_v36 = vsub.f32 %v9976_v52, %v5162_v28  ;;  %v10043_v27 = vsub.f32 %v9988_v7, %v5162_v28 }
 0x28d   :  { %v5279_v22 = vadd.f32 %v5223_v47, %v5214_v43  ;;  %v10045_v26 = vsub.f32 %v3532_v11, %v5162_v28  ;;  %v10047_v30 = vsub.f32 %v3539_v42, %v5162_v28  ;;  %v5241_v37 = vmul.f32 %v10018_v51, %v10018_v51 }
 0x28e   :  { %v5216_v41 = vmul.f32 %v10037_v61, %v10037_v61  ;;  %v5225_v52 = vmul.f32 %v10040_v36, %v10040_v36  ;;  %v5234_v11 = vmul.f32 %v10043_v27, %v10043_v27  ;;  %v10063_v5 = vsub.f32 %v9995_v48, %v5161_v14 }
 0x28f   :  { %v5280_v7 = vadd.f32 %v5279_v22, %v5232_v45  ;;  %v5252_v42 = vmul.f32 %v10047_v30, %v10047_v30  ;;  %v10066_v44 = vsub.f32 %v10002_v21, %v5161_v14  ;;  %v5215_v24 = vmul.f32 %v10023_v38, %v10023_v38 }
 0x290   :  { %v5301_v62 = vadd.f32 %v5225_v52, %v5216_v41  ;;  %v5224_v39 = vmul.f32 %v10026_v8, %v10026_v8  ;;  %v5282_v57 = vsel %vm5060_vm15, %v5250_v46, 0.0  ;;  %v5243_v54 = vmul.f32 %v10045_v26, %v10045_v26 }
 0x291   :  { %v5281_v19 = vadd.f32 %v5280_v7, %v5241_v37  ;;  %v5233_v48 = vmul.f32 %v10050_v60, %v10050_v60  ;;  %v5163_v20 = vmul.f32 0.030303031, %v5123_v18  ;;  %v5304_v56 = vsel %vm5060_vm15, %v5252_v42, 0.0 }
 0x292   :  { %v5302_v31 = vadd.f32 %v5301_v62, %v5234_v11  ;;  %v5290_v33 = vadd.f32 %v5224_v39, %v5215_v24  ;;  %v5251_v9 = vmul.f32 %v10066_v44, %v10066_v44  ;;  %v5242_v23 = vmul.f32 %v10063_v5, %v10063_v5 }
 0x293   :  { %v5283_v21 = vadd.f32 %v5282_v57, %v5281_v19  ;;  %v10083_v40 = vsub.f32 %v9971_v50, %v5163_v20  ;;  %v10086_v16 = vsub.f32 %v9982_v17, %v5163_v20  ;;  %v10089_v14 = vsub.f32 %v9992_v29, %v5163_v20 }
 0x294   :  { %v5303_v4 = vadd.f32 %v5302_v31, %v5243_v54  ;;  %v5291_v3 = vadd.f32 %v5290_v33, %v5233_v48  ;;  %v10092_v53 = vsub.f32 %v9998_v49, %v5163_v20  ;;  %v10095_v47 = vsub.f32 %v10007_v1, %v5163_v20 }
 0x295   :  { %v5284_v13 = vrot.slane %v5283_v21, 4  ;;  %v5217_v45 = vmul.f32 %v10083_v40, %v10083_v40  ;;  %v5293_v46 = vsel %vm5060_vm15, %v5251_v9, 0.0  ;;  %v5226_v17 = vmul.f32 %v10086_v16, %v10086_v16 }
 0x296   :  { %v5305_v28 = vadd.f32 %v5304_v56, %v5303_v4  ;;  %v5292_v43 = vadd.f32 %v5291_v3, %v5242_v23  ;;  %v5235_v49 = vmul.f32 %v10089_v14, %v10089_v14  ;;  %v5253_v1 = vmul.f32 %v10095_v47, %v10095_v47 }
 0x297   :  { %v5285_v50 = vadd.f32 %v5284_v13, %v5283_v21  ;;  %v5312_v41 = vadd.f32 %v5226_v17, %v5217_v45  ;;  %v5244_v11 = vmul.f32 %v10092_v53, %v10092_v53 }
 0x298   :  { %v5306_v22 = vrot.slane %v5305_v28, 4  ;;  %v5294_v29 = vadd.f32 %v5293_v46, %v5292_v43  ;;  %v5315_v31 = vsel %vm5060_vm15, %v5253_v1, 0.0 }
 0x299   :  { %v5286_v37 = vrot.slane %v5285_v50, 2  ;;  %v5313_v42 = vadd.f32 %v5312_v41, %v5235_v49 }
 0x29a   :  { %v5307_v52 = vadd.f32 %v5306_v22, %v5305_v28  ;;  %v5295_v18 = vrot.slane %v5294_v29, 4 }
 0x29b   :  { %v5287_v7 = vadd.f32 %v5286_v37, %v5285_v50  ;;  %v5314_v19 = vadd.f32 %v5313_v42, %v5244_v11 }
 0x29c   :  { %v5308_v62 = vrot.slane %v5307_v52, 2  ;;  %v5296_v24 = vadd.f32 %v5295_v18, %v5294_v29 }
 0x29d   :  { %v5288_v39 = vrot.slane %v5287_v7, 1  ;;  %v5316_v33 = vadd.f32 %v5315_v31, %v5314_v19 }
 0x29e   :  { %v5309_v57 = vadd.f32 %v5308_v62, %v5307_v52  ;;  %v5297_v54 = vrot.slane %v5296_v24, 2 }
 0x29f   :  { %v5289_v48 = vadd.f32 %v5288_v39, %v5287_v7  ;;  %v5317_v9 = vrot.slane %v5316_v33, 4 }
 0x2a0   :  { %v5310_v20 = vrot.slane %v5309_v57, 1  ;;  %v5298_v21 = vadd.f32 %v5297_v54, %v5296_v24 }
 0x2a1   :  { %v5358_v56 = vmul.f32 0.030303031, %v5289_v48  ;;  %v5318_v13 = vadd.f32 %v5317_v9, %v5316_v33 }
 0x2a2   :  { %v5311_v4 = vadd.f32 %v5310_v20, %v5309_v57  ;;  %v5299_v23 = vrot.slane %v5298_v21, 1 }
 0x2a3   :  { %v5367_v3 = vadd.f32 1e-05, %v5358_v56  ;;  %v5319_v45 = vrot.slane %v5318_v13, 2 }
 0x2a4   :  { %v5360_v28 = vmul.f32 0.030303031, %v5311_v4  ;;  %v5300_v43 = vadd.f32 %v5299_v23, %v5298_v21 }
 0x2a5   :  { %6770 = vrsqrt.f32 %v5367_v3  ;;  %v5320_v17 = vadd.f32 %v5319_v45, %v5318_v13 }
 0x2a6   :  { %v5369_v50 = vadd.f32 1e-05, %v5360_v28  ;;  %v5359_v46 = vmul.f32 0.030303031, %v5300_v43 }
 0x2a7   :  { %v5321_v29 = vrot.slane %v5320_v17, 1 }
 0x2a8   :  { %6772 = vrsqrt.f32 %v5369_v50  ;;  %v5368_v22 = vadd.f32 1e-05, %v5359_v46 }
 0x2a9   :  { %v5322_v37 = vadd.f32 %v5321_v29, %v5320_v17 }
 0x2aa   :  { %6774 = vrsqrt.f32 %v5368_v22 }
 0x2ab   :  { %v5361_v49 = vmul.f32 0.030303031, %v5322_v37 }
 0x2ad   :  { %v5370_v52 = vadd.f32 1e-05, %v5361_v49 }
 0x2af   :  { %v6771_v41 = vpop.eup %6770  ;;  %6776 = vrsqrt.f32 %v5370_v52 }
 0x2b0   :  { %v5385_v18 = vmul.f32 %v6771_v41, %v10012_v63  ;;  %v5394_v1 = vmul.f32 %v6771_v41, %v10014_v35  ;;  %v5403_v7 = vmul.f32 %v6771_v41, %v10016_v15  ;;  %v5412_v11 = vmul.f32 %v6771_v41, %v10018_v51 }
 0x2b1   :  { %v5421_v42 = vmul.f32 %v6771_v41, %v10020_v6 }
 0x2b2   :  { %v6773_v62 = vpop.eup %6772  ;;  %v5460_v24 = vmul.f32 %v9880_v32, %v5385_v18  ;;  %v5469_v39 = vmul.f32 %v9895_v10, %v5394_v1  ;;  %v5478_v19 = vmul.f32 %v9885_v12, %v5403_v7  ;;  %v5487_v57 = vmul.f32 %v9899_v58, %v5412_v11 }
 0x2b3   :  { %v5496_v63 = vmul.f32 %v9907_v59, %v5421_v42  ;;  %v5387_v35 = vmul.f32 %v6773_v62, %v10037_v61  ;;  %v5396_v15 = vmul.f32 %v6773_v62, %v10040_v36  ;;  %v5405_v51 = vmul.f32 %v6773_v62, %v10043_v27 }
 0x2b4   :  { %v6775_v54 = vpop.eup %6774  ;;  %v5535_v6 = vadd.f32 %v9910_v2, %v5460_v24  ;;  %v5544_v31 = vadd.f32 %v9918_v34, %v5469_v39  ;;  %v5553_v48 = vadd.f32 %v9922_v55, %v5478_v19  ;;  %v5562_v33 = vadd.f32 %v9943_v25, %v5487_v57 }
 0x2b5   :  { %v5571_v20 = vadd.f32 %v9949_v0, %v5496_v63  ;;  %v5414_v21 = vmul.f32 %v6773_v62, %v10045_v26  ;;  %v5423_v56 = vmul.f32 %v6773_v62, %v10047_v30  ;;  %v5462_v61 = vmul.f32 %v9880_v32, %v5387_v35 }
 0x2b6   :  { %5580 = vst [vmem:[#allocation4 + $0x10] sm:$0xff] %v5535_v6  ;;  %5589 = vst [vmem:[#allocation4 + $0x58] sm:$0xff] %v5544_v31  ;;  %v5471_v36 = vmul.f32 %v9895_v10, %v5396_v15  ;;  %v5480_v27 = vmul.f32 %v9885_v12, %v5405_v51  ;;  %v5386_v9 = vmul.f32 %v6775_v54, %v10023_v38 }
 0x2b7   :  { %5598 = vst [vmem:[#allocation4 + $0xa0] sm:$0xff] %v5553_v48  ;;  %5607 = vst [vmem:[#allocation4 + $0xe8] sm:$0xff] %v5562_v33  ;;  %v5395_v4 = vmul.f32 %v6775_v54, %v10026_v8  ;;  %v5489_v23 = vmul.f32 %v9899_v58, %v5414_v21  ;;  %v5498_v26 = vmul.f32 %v9907_v59, %v5423_v56 }
 0x2b8   :  { %5616 = vst [vmem:[#allocation4 + $0x130] sm:$0x1] %v5571_v20  ;;  %v5537_v30 = vadd.f32 %v9910_v2, %v5462_v61  ;;  %v5404_v3 = vmul.f32 %v6775_v54, %v10050_v60  ;;  %v5546_v13 = vadd.f32 %v9918_v34, %v5471_v36  ;;  %v5555_v28 = vadd.f32 %v9922_v55, %v5480_v27 }
 0x2b9   :  { %v5413_v43 = vmul.f32 %v6775_v54, %v10063_v5  ;;  %v5422_v45 = vmul.f32 %v6775_v54, %v10066_v44  ;;  %v5564_v38 = vadd.f32 %v9943_v25, %v5489_v23  ;;  %v5573_v8 = vadd.f32 %v9949_v0, %v5498_v26  ;;  %v6777_v5 = vpop.eup %6776 }
 0x2ba   :  { %5582 = vst [vmem:[#allocation4 + $0x20] sm:$0xff] %v5537_v30  ;;  %v5461_v50 = vmul.f32 %v9880_v32, %v5386_v9  ;;  %v5470_v46 = vmul.f32 %v9895_v10, %v5395_v4  ;;  %5591 = vst [vmem:[#allocation4 + $0x68] sm:$0xff] %v5546_v13  ;;  %v5479_v60 = vmul.f32 %v9885_v12, %v5404_v3 }
 0x2bb   :  { %5600 = vst [vmem:[#allocation4 + $0xb0] sm:$0xff] %v5555_v28  ;;  %v5488_v17 = vmul.f32 %v9899_v58, %v5413_v43  ;;  %v5497_v22 = vmul.f32 %v9907_v59, %v5422_v45  ;;  %5609 = vst [vmem:[#allocation4 + $0xf8] sm:$0xff] %v5564_v38  ;;  %v5388_v52 = vmul.f32 %v6777_v5, %v10083_v40 }
 0x2bc   :  { %5618 = vst [vmem:[#allocation4 + $0x140] sm:$0x1] %v5573_v8  ;;  %v5536_v44 = vadd.f32 %v9910_v2, %v5461_v50  ;;  %v5545_v29 = vadd.f32 %v9918_v34, %v5470_v46  ;;  %v5554_v37 = vadd.f32 %v9922_v55, %v5479_v60  ;;  %v5397_v18 = vmul.f32 %v6777_v5, %v10086_v16 }
 0x2bd   :  { %v5563_v49 = vadd.f32 %v9943_v25, %v5488_v17  ;;  %v5572_v41 = vadd.f32 %v9949_v0, %v5497_v22  ;;  %v5406_v1 = vmul.f32 %v6777_v5, %v10089_v14  ;;  %v5415_v7 = vmul.f32 %v6777_v5, %v10092_v53 }
 0x2be   :  { %5581 = vst [vmem:[#allocation4 + $0x18] sm:$0xff] %v5536_v44  ;;  %5590 = vst [vmem:[#allocation4 + $0x60] sm:$0xff] %v5545_v29  ;;  %v5424_v11 = vmul.f32 %v6777_v5, %v10095_v47  ;;  %v5463_v42 = vmul.f32 %v9880_v32, %v5388_v52  ;;  %v5472_v62 = vmul.f32 %v9895_v10, %v5397_v18 }
 0x2bf   :  { %5599 = vst [vmem:[#allocation4 + $0xa8] sm:$0xff] %v5554_v37  ;;  %5608 = vst [vmem:[#allocation4 + $0xf0] sm:$0xff] %v5563_v49  ;;  %v5481_v24 = vmul.f32 %v9885_v12, %v5406_v1  ;;  %v5490_v40 = vmul.f32 %v9899_v58, %v5415_v7 }
 0x2c0   :  { %5617 = vst [vmem:[#allocation4 + $0x138] sm:$0x1] %v5572_v41  ;;  %v5499_v39 = vmul.f32 %v9907_v59, %v5424_v11  ;;  %v5538_v16 = vadd.f32 %v9910_v2, %v5463_v42  ;;  %v5547_v14 = vadd.f32 %v9918_v34, %v5472_v62 }
 0x2c1   :  { %v5556_v53 = vadd.f32 %v9922_v55, %v5481_v24  ;;  %v5565_v47 = vadd.f32 %v9943_v25, %v5490_v40 }
 0x2c2   :  { %v5574_v19 = vadd.f32 %v9949_v0, %v5499_v39  ;;  %5583 = vst [vmem:[#allocation4 + $0x28] sm:$0xff] %v5538_v16  ;;  %5592 = vst [vmem:[#allocation4 + $0x70] sm:$0xff] %v5547_v14 }
 0x2c3   :  { %5601 = vst [vmem:[#allocation4 + $0xb8] sm:$0xff] %v5556_v53  ;;  %5610 = vst [vmem:[#allocation4 + $0x100] sm:$0xff] %v5565_v47 }
 0x2c4   :  { %5619 = vst [vmem:[#allocation4 + $0x148] sm:$0x1] %v5574_v19 }
 0x2df   :  { %v4328_v57 = vpop.f32.mrb[20].mxu1 }
 0x2e0   :  { %v4330_v63 = vpop.f32.mrb[21].mxu1 }
 0x2e1   :  { %v10169_v35 = vpop.f32.mrb[20].mxu0 }
 0x2e2   :  { %v6129_v15 = vpop.f32.mrb[21].mxu0 }
 0x2e3   :  { %v4335_v51 = vpop.f32.mrb[22].mxu1 }
 0x2e4   :  { %v5124_v54 = vadd.f32 %v4335_v51, %v4328_v57  ;;  %v4337_v6 = vpop.f32.mrb[23].mxu1 }
 0x2e5   :  { %v5035_v31 = vpop.f32.mrb[22].mxu0  ;;  %v5135_v48 = vadd.f32 %v4337_v6, %v4330_v63 }
 0x2e6   :  { %v5146_v33 = vadd.f32 %v5035_v31, %v10169_v35  ;;  %v6132_v20 = vpop.f32.mrb[23].mxu0 }
 0x2e7   :  { %v4342_v21 = vpop.f32.mrb[24].mxu1 }
 0x2e8   :  { %v5125_v56 = vadd.f32 %v5124_v54, %v4342_v21  ;;  %v4344_v61 = vpop.f32.mrb[25].mxu1 }
 0x2e9   :  { %v5041_v36 = vpop.f32.mrb[24].mxu0  ;;  %v5136_v27 = vadd.f32 %v5135_v48, %v4344_v61 }
 0x2ea   :  { %v5147_v9 = vadd.f32 %v5146_v33, %v5041_v36  ;;  %v6135_v4 = vpop.f32.mrb[25].mxu0 }
 0x2eb   :  { %v4349_v23 = vpop.f32.mrb[26].mxu1 }
 0x2ec   :  { %v5126_v26 = vadd.f32 %v5125_v56, %v4349_v23  ;;  %v4351_v30 = vpop.f32.mrb[27].mxu1 }
 0x2ed   :  { %v5047_v3 = vpop.f32.mrb[26].mxu0  ;;  %v5137_v13 = vadd.f32 %v5136_v27, %v4351_v30 }
 0x2ee   :  { %v5148_v28 = vadd.f32 %v5147_v9, %v5047_v3  ;;  %v6138_v43 = vpop.f32.mrb[27].mxu0 }
 0x2ef   :  { %v4356_v45 = vpop.f32.mrb[28].mxu1 }
 0x2f0   :  { %v5127_v38 = vsel %vm5060_vm15, %v4356_v45, 0.0  ;;  %v4358_v8 = vpop.f32.mrb[29].mxu1 }
 0x2f1   :  { %v5128_v50 = vadd.f32 %v5127_v38, %v5126_v26  ;;  %v5053_v46 = vpop.f32.mrb[28].mxu0  ;;  %v5138_v60 = vsel %vm5060_vm15, %v4358_v8, 0.0 }
 0x2f2   :  { %v5149_v17 = vsel %vm5060_vm15, %v5053_v46, 0.0  ;;  %v5139_v22 = vadd.f32 %v5138_v60, %v5137_v13  ;;  %v6141_v5 = vpop.f32.mrb[29].mxu0 }
 0x2f3   :  { %v5129_v44 = vrot.slane %v5128_v50, 4  ;;  %v5150_v29 = vadd.f32 %v5149_v17, %v5148_v28 }
 0x2f4   :  { %v5140_v37 = vrot.slane %v5139_v22, 4 }
 0x2f5   :  { %v5130_v49 = vadd.f32 %v5129_v44, %v5128_v50  ;;  %v5151_v41 = vrot.slane %v5150_v29, 4 }
 0x2f6   :  { %v5141_v52 = vadd.f32 %v5140_v37, %v5139_v22 }
 0x2f7   :  { %v5131_v18 = vrot.slane %v5130_v49, 2  ;;  %v5152_v1 = vadd.f32 %v5151_v41, %v5150_v29 }
 0x2f8   :  { %v5142_v7 = vrot.slane %v5141_v52, 2 }
 0x2f9   :  { %v5132_v11 = vadd.f32 %v5131_v18, %v5130_v49  ;;  %v5153_v42 = vrot.slane %v5152_v1, 2 }
 0x2fa   :  { %v5143_v62 = vadd.f32 %v5142_v7, %v5141_v52 }
 0x2fb   :  { %v5133_v24 = vrot.slane %v5132_v11, 1  ;;  %v5154_v40 = vadd.f32 %v5153_v42, %v5152_v1 }
 0x2fc   :  { %v5144_v39 = vrot.slane %v5143_v62, 1 }
 0x2fd   :  { %v5134_v16 = vadd.f32 %v5133_v24, %v5132_v11  ;;  %v5155_v14 = vrot.slane %v5154_v40, 1 }
 0x2fe   :  { %v5145_v53 = vadd.f32 %v5144_v39, %v5143_v62 }
 0x2ff   :  { %v5164_v47 = vmul.f32 0.030303031, %v5134_v16  ;;  %v5156_v19 = vadd.f32 %v5155_v14, %v5154_v40 }
 0x300   :  { %v5165_v15 = vmul.f32 0.030303031, %v5145_v53 }
 0x301   :  { %v10175_v54 = vsub.f32 %v4328_v57, %v5164_v47  ;;  %v10177_v48 = vsub.f32 %v4335_v51, %v5164_v47  ;;  %v10179_v33 = vsub.f32 %v4342_v21, %v5164_v47  ;;  %v10181_v20 = vsub.f32 %v4349_v23, %v5164_v47 }
 0x302   :  { %v10183_v56 = vsub.f32 %v4356_v45, %v5164_v47  ;;  %v5166_v27 = vmul.f32 0.030303031, %v5156_v19  ;;  %v10185_v9 = vsub.f32 %v4330_v63, %v5165_v15  ;;  %v10187_v4 = vsub.f32 %v4337_v6, %v5165_v15 }
 0x303   :  { %v5218_v26 = vmul.f32 %v10175_v54, %v10175_v54  ;;  %v5227_v57 = vmul.f32 %v10177_v48, %v10177_v48  ;;  %v5236_v51 = vmul.f32 %v10179_v33, %v10179_v33  ;;  %v10208_v45 = vsub.f32 %v4344_v61, %v5165_v15 }
 0x304   :  { %v5254_v21 = vmul.f32 %v10183_v56, %v10183_v56  ;;  %v10198_v23 = vsub.f32 %v10169_v35, %v5166_v27  ;;  %v10200_v13 = vsub.f32 %v5035_v31, %v5166_v27  ;;  %v10202_v63 = vsub.f32 %v5041_v36, %v5166_v27 }
 0x305   :  { %v5323_v6 = vadd.f32 %v5227_v57, %v5218_v26  ;;  %v10204_v28 = vsub.f32 %v5047_v3, %v5166_v27  ;;  %v10206_v43 = vsub.f32 %v5053_v46, %v5166_v27  ;;  %v5245_v35 = vmul.f32 %v10181_v20, %v10181_v20 }
 0x306   :  { %v5220_v38 = vmul.f32 %v10198_v23, %v10198_v23  ;;  %v5229_v50 = vmul.f32 %v10200_v13, %v10200_v13  ;;  %v5238_v36 = vmul.f32 %v10202_v63, %v10202_v63  ;;  %v10218_v60 = vsub.f32 %v4351_v30, %v5165_v15 }
 0x307   :  { %v5324_v31 = vadd.f32 %v5323_v6, %v5236_v51  ;;  %v10220_v46 = vsub.f32 %v4358_v8, %v5165_v15  ;;  %v5219_v61 = vmul.f32 %v10185_v9, %v10185_v9  ;;  %v5228_v17 = vmul.f32 %v10187_v4, %v10187_v4 }
 0x308   :  { %v5345_v3 = vadd.f32 %v5229_v50, %v5220_v38  ;;  %v5326_v5 = vsel %vm5060_vm15, %v5254_v21, 0.0  ;;  %v5256_v44 = vmul.f32 %v10206_v43, %v10206_v43  ;;  %v5247_v29 = vmul.f32 %v10204_v28, %v10204_v28 }
 0x309   :  { %v5325_v22 = vadd.f32 %v5324_v31, %v5245_v35  ;;  %v5237_v8 = vmul.f32 %v10208_v45, %v10208_v45  ;;  %v5334_v37 = vadd.f32 %v5228_v17, %v5219_v61  ;;  %v5255_v41 = vmul.f32 %v10220_v46, %v10220_v46 }
 0x30a   :  { %v5346_v30 = vadd.f32 %v5345_v3, %v5238_v36  ;;  %v5246_v18 = vmul.f32 %v10218_v60, %v10218_v60  ;;  %v5348_v11 = vsel %vm5060_vm15, %v5256_v44, 0.0 }
 0x30b   :  { %v5327_v49 = vadd.f32 %v5326_v5, %v5325_v22  ;;  %v5335_v1 = vadd.f32 %v5334_v37, %v5237_v8  ;;  %v5337_v40 = vsel %vm5060_vm15, %v5255_v41, 0.0 }
 0x30c   :  { %v5347_v52 = vadd.f32 %v5346_v30, %v5247_v29 }
 0x30d   :  { %v5328_v7 = vrot.slane %v5327_v49, 4  ;;  %v5336_v62 = vadd.f32 %v5335_v1, %v5246_v18 }
 0x30e   :  { %v5349_v42 = vadd.f32 %v5348_v11, %v5347_v52 }
 0x30f   :  { %v5329_v24 = vadd.f32 %v5328_v7, %v5327_v49  ;;  %v5338_v16 = vadd.f32 %v5337_v40, %v5336_v62 }
 0x310   :  { %v5350_v39 = vrot.slane %v5349_v42, 4 }
 0x311   :  { %v5330_v14 = vrot.slane %v5329_v24, 2  ;;  %v5339_v47 = vrot.slane %v5338_v16, 4 }
 0x312   :  { %v5351_v53 = vadd.f32 %v5350_v39, %v5349_v42 }
 0x313   :  { %v5331_v19 = vadd.f32 %v5330_v14, %v5329_v24  ;;  %v5340_v27 = vadd.f32 %v5339_v47, %v5338_v16 }
 0x314   :  { %v5352_v15 = vrot.slane %v5351_v53, 2 }
 0x315   :  { %v5332_v26 = vrot.slane %v5331_v19, 1  ;;  %v5341_v51 = vrot.slane %v5340_v27, 2 }
 0x316   :  { %v5353_v57 = vadd.f32 %v5352_v15, %v5351_v53 }
 0x317   :  { %v5333_v21 = vadd.f32 %v5332_v26, %v5331_v19  ;;  %v5342_v38 = vadd.f32 %v5341_v51, %v5340_v27 }
 0x318   :  { %v5354_v6 = vrot.slane %v5353_v57, 1 }
 0x319   :  { %v5362_v50 = vmul.f32 0.030303031, %v5333_v21  ;;  %v5343_v31 = vrot.slane %v5342_v38, 1 }
 0x31a   :  { %v5355_v35 = vadd.f32 %v5354_v6, %v5353_v57 }
 0x31b   :  { %v5371_v36 = vadd.f32 1e-05, %v5362_v50  ;;  %v5344_v61 = vadd.f32 %v5343_v31, %v5342_v38 }
 0x31c   :  { %v5364_v3 = vmul.f32 0.030303031, %v5355_v35 }
 0x31d   :  { %6778 = vrsqrt.f32 %v5371_v36  ;;  %v5363_v22 = vmul.f32 0.030303031, %v5344_v61 }
 0x31e   :  { %v5373_v17 = vadd.f32 1e-05, %v5364_v3 }
 0x31f   :  { %v5372_v5 = vadd.f32 1e-05, %v5363_v22 }
 0x320   :  { %6780 = vrsqrt.f32 %v5373_v17 }
 0x321   :  { %6782 = vrsqrt.f32 %v5372_v5 }
 0x327   :  { %v6779_v44 = vpop.eup %6778 }
 0x328   :  { %v5389_v29 = vmul.f32 %v6779_v44, %v10175_v54  ;;  %v5398_v30 = vmul.f32 %v6779_v44, %v10177_v48  ;;  %v5407_v8 = vmul.f32 %v6779_v44, %v10179_v33  ;;  %v5416_v37 = vmul.f32 %v6779_v44, %v10181_v20 }
 0x329   :  { %v5425_v49 = vmul.f32 %v6779_v44, %v10183_v56 }
 0x32a   :  { %v6781_v41 = vpop.eup %6780  ;;  %v5464_v52 = vmul.f32 %v9880_v32, %v5389_v29  ;;  %v5473_v18 = vmul.f32 %v9895_v10, %v5398_v30  ;;  %v5482_v1 = vmul.f32 %v9885_v12, %v5407_v8  ;;  %v5491_v7 = vmul.f32 %v9899_v58, %v5416_v37 }
 0x32b   :  { %v5500_v11 = vmul.f32 %v9907_v59, %v5425_v49  ;;  %v5391_v54 = vmul.f32 %v6781_v41, %v10198_v23  ;;  %v5400_v48 = vmul.f32 %v6781_v41, %v10200_v13  ;;  %v5409_v33 = vmul.f32 %v6781_v41, %v10202_v63  ;;  %v6783_v20 = vpop.eup %6782 }
 0x32c   :  { %v5539_v56 = vadd.f32 %v9910_v2, %v5464_v52  ;;  %v5548_v42 = vadd.f32 %v9918_v34, %v5473_v18  ;;  %v5557_v62 = vadd.f32 %v9922_v55, %v5482_v1  ;;  %v5566_v24 = vadd.f32 %v9943_v25, %v5491_v7 }
 0x32d   :  { %v5575_v40 = vadd.f32 %v9949_v0, %v5500_v11  ;;  %v5418_v39 = vmul.f32 %v6781_v41, %v10204_v28  ;;  %v5427_v16 = vmul.f32 %v6781_v41, %v10206_v43  ;;  %v5466_v23 = vmul.f32 %v9880_v32, %v5391_v54 }
 0x32e   :  { %5584 = vst [vmem:[#allocation4 + $0x30] sm:$0xff] %v5539_v56  ;;  %5593 = vst [vmem:[#allocation4 + $0x78] sm:$0xff] %v5548_v42  ;;  %v5475_v13 = vmul.f32 %v9895_v10, %v5400_v48  ;;  %v5484_v63 = vmul.f32 %v9885_v12, %v5409_v33  ;;  %v5390_v14 = vmul.f32 %v6783_v20, %v10185_v9 }
 0x32f   :  { %5602 = vst [vmem:[#allocation4 + $0xc0] sm:$0xff] %v5557_v62  ;;  %5611 = vst [vmem:[#allocation4 + $0x108] sm:$0xff] %v5566_v24  ;;  %v5399_v53 = vmul.f32 %v6783_v20, %v10187_v4  ;;  %v5493_v47 = vmul.f32 %v9899_v58, %v5418_v39  ;;  %v5502_v28 = vmul.f32 %v9907_v59, %v5427_v16 }
 0x330   :  { %5620 = vst [vmem:[#allocation4 + $0x150] sm:$0x1] %v5575_v40  ;;  %v5541_v43 = vadd.f32 %v9910_v2, %v5466_v23  ;;  %v5408_v19 = vmul.f32 %v6783_v20, %v10208_v45  ;;  %v5550_v15 = vadd.f32 %v9918_v34, %v5475_v13  ;;  %v5559_v27 = vadd.f32 %v9922_v55, %v5484_v63 }
 0x331   :  { %v5417_v26 = vmul.f32 %v6783_v20, %v10218_v60  ;;  %v5426_v57 = vmul.f32 %v6783_v20, %v10220_v46  ;;  %v5568_v9 = vadd.f32 %v9943_v25, %v5493_v47  ;;  %v5577_v4 = vadd.f32 %v9949_v0, %v5502_v28 }
 0x332   :  { %5586 = vst [vmem:[#allocation4 + $0x40] sm:$0xff] %v5541_v43  ;;  %v5465_v51 = vmul.f32 %v9880_v32, %v5390_v14  ;;  %v5474_v21 = vmul.f32 %v9895_v10, %v5399_v53  ;;  %5595 = vst [vmem:[#allocation4 + $0x88] sm:$0xff] %v5550_v15  ;;  %v5483_v45 = vmul.f32 %v9885_v12, %v5408_v19 }
 0x333   :  { %5604 = vst [vmem:[#allocation4 + $0xd0] sm:$0xff] %v5559_v27  ;;  %v5492_v6 = vmul.f32 %v9899_v58, %v5417_v26  ;;  %v5501_v60 = vmul.f32 %v9907_v59, %v5426_v57  ;;  %5613 = vst [vmem:[#allocation4 + $0x118] sm:$0xff] %v5568_v9 }
 0x334   :  { %5622 = vst [vmem:[#allocation4 + $0x160] sm:$0x1] %v5577_v4  ;;  %v5540_v46 = vadd.f32 %v9910_v2, %v5465_v51  ;;  %v5549_v38 = vadd.f32 %v9918_v34, %v5474_v21  ;;  %v5558_v32 = vadd.f32 %v9922_v55, %v5483_v45 }
 0x335   :  { %v5567_v10 = vadd.f32 %v9943_v25, %v5492_v6  ;;  %v5576_v50 = vadd.f32 %v9949_v0, %v5501_v60 }
 0x336   :  { %5585 = vst [vmem:[#allocation4 + $0x38] sm:$0xff] %v5540_v46  ;;  %5594 = vst [vmem:[#allocation4 + $0x80] sm:$0xff] %v5549_v38 }
 0x337   :  { %5603 = vst [vmem:[#allocation4 + $0xc8] sm:$0xff] %v5558_v32  ;;  %5612 = vst [vmem:[#allocation4 + $0x110] sm:$0xff] %v5567_v10 }
 0x338   :  { %5621 = vst [vmem:[#allocation4 + $0x158] sm:$0x1] %v5576_v50 }
 0x339   :  { %6809 = shalt.err (!%p6806_p11)
}
 0x33a   :  { %s6810_s8 = scalar_lea.hbm %s10302_s6, 5760 }
 0x33b   :  { %p6811_p12 = scmp.ne.s32.totalorder %s10302_s6, %s6810_s8  ;;  %p6814_p13 = scmp.lt.u32.totalorder %s6810_s8, %s10302_s6 }
 0x33d   :  { %p6816_p0 = pnand %p6814_p13, %p6811_p12 }
 0x33f   :  { %6819 = shalt.err (!%p6816_p0)
}
 0x340   :  { %s6832_s3 = smov 1152   ;;  %s6833_s12 = smov 72  }
 0x341   :  { %5634 = dma.vmem_to_hbm [thread:$0]  %s5629_s29, 5760, %s10302_s6, [#allocation5], %s6832_s3, %s6832_s3, %s6833_s12  }
 0x342   :  { %6822 = dma.done.wait [#allocation5], 5760  }
 0x343   :  { %6823 = vsyncadd [#allocation5], 4294961536 }
 0x344   :  { %5638 = vsyncpa [#allocation5], 1 }

</bundles_post_ra>
